<compile_context>
chip_gen: v7x
topology: tpu7x:2x2x1
jax: 0.10.0
libtpu: 0.0.40
codegen_flags: <defaults>
</compile_context>

<pallas_src>
import functools

import jax
import jax.numpy as jnp
from jax import lax
from jax.experimental import pallas as pl
from jax.experimental.pallas import tpu as pltpu

_LANE = 128                      # TPU lane width: channel dim padded to this
_COMPUTE_DTYPE = jnp.bfloat16    # MXU operand / activation storage dtype


def _round_up(x, m):
    return (x + m - 1) // m * m


# ----------------------------- Pallas kernels ------------------------------ #

def _accum_conv3x3(phase_refs, w_ref, acc_ref, *, ho, wo, stride):
    """acc += 3x3 conv as 9 shifted-slice MXU matmuls (in-kernel im2col).

    phase_refs[ph*stride + pw][0, h, w, :] == x_padded[stride*h + ph, stride*w + pw, :]
    w_ref  : (9, C, Cpad) BN-scale-folded weight, tap index kh*3 + kw.
    acc_ref: (ho*wo, Cpad) f32 VMEM scratch accumulator.
    """
    c = phase_refs[0].shape[-1]
    for kh in range(3):
        for kw in range(3):
            pidx = (kh % stride) * stride + (kw % stride)
            qh, qw = kh // stride, kw // stride
            xs = phase_refs[pidx][0, qh:qh + ho, qw:qw + wo, :]
            xs = xs.reshape(ho * wo, c)
            acc_ref[...] += jnp.dot(xs, w_ref[kh * 3 + kw],
                                    preferred_element_type=jnp.float32)


def _conv1_kernel(*refs, ho, wo, stride):
    """conv1(3x3, stride, pad=1) + folded-BN shift + ReLU, bf16 lane-dense store."""
    n_ph = stride * stride
    phase_refs = refs[:n_ph]
    w_ref, b_ref, o_ref, acc_ref = refs[n_ph:]
    acc_ref[...] = jnp.zeros_like(acc_ref)
    _accum_conv3x3(phase_refs, w_ref, acc_ref, ho=ho, wo=wo, stride=stride)
    out = jnp.maximum(acc_ref[...] + b_ref[...], 0.0)
    o_ref[0] = out.reshape(ho, wo, o_ref.shape[-1]).astype(o_ref.dtype)


def _conv2_proj_kernel(y_ref, w_ref, b_ref, xr_ref, wsc_ref, bsc_ref, o_ref,
                       acc_ref, *, ho, wo):
    """conv2 + BN fused with the 1x1-conv projection shortcut, add and ReLU."""
    acc_ref[...] = jnp.zeros_like(acc_ref)
    _accum_conv3x3((y_ref,), w_ref, acc_ref, ho=ho, wo=wo, stride=1)
    xr = xr_ref[0].reshape(ho * wo, xr_ref.shape[-1])
    res = jnp.dot(xr, wsc_ref[...], preferred_element_type=jnp.float32)
    out = jnp.maximum(acc_ref[...] + b_ref[...] + res + bsc_ref[...], 0.0)
    o_ref[0] = out.reshape(ho, wo, o_ref.shape[-1]).astype(o_ref.dtype)


def _conv2_identity_kernel(y_ref, w_ref, b_ref, xr_ref, o_ref, acc_ref, *, ho, wo):
    """conv2 + BN fused with the identity shortcut: the block input rows are
    added directly in f32 (no identity-matrix matmul), then ReLU."""
    acc_ref[...] = jnp.zeros_like(acc_ref)
    _accum_conv3x3((y_ref,), w_ref, acc_ref, ho=ho, wo=wo, stride=1)
    xr = xr_ref[0].astype(jnp.float32).reshape(ho * wo, o_ref.shape[-1])
    out = jnp.maximum(acc_ref[...] + b_ref[...] + xr, 0.0)
    o_ref[0] = out.reshape(ho, wo, o_ref.shape[-1]).astype(o_ref.dtype)


# ------------------------------ helpers ------------------------------------ #

def _fold_conv_weight(w_hwio, scale, cin_eff, cpad):
    """Fold the BN scale into the conv weight (one-time), zero-pad input
    channels to `cin_eff` and output channels to `cpad` (lane multiple), cast
    to bf16, flatten spatial taps: (K,K,Cin,Cout) -> (K*K, cin_eff, cpad)."""
    k, _, cin, cout = w_hwio.shape
    w = w_hwio * scale
    w = jnp.pad(w, ((0, 0), (0, 0), (0, cin_eff - cin), (0, cpad - cout)))
    return w.reshape(k * k, cin_eff, cpad).astype(_COMPUTE_DTYPE)


def _pad_shift(shift, cpad):
    return jnp.pad(shift, (0, cpad - shift.shape[0])).reshape(1, cpad).astype(jnp.float32)


def _phase_views(xpad, stride, hq, wq):
    """Decompose the spatially padded input into stride*stride phase images so
    every 3x3 tap becomes a contiguous (un-strided) slice inside the kernel.
    For stride == 1 this is just [xpad] (no data movement)."""
    if stride == 1:
        return [xpad]
    views = []
    for ph in range(stride):
        for pw in range(stride):
            v = xpad[:, ph::stride, pw::stride, :][:, :hq, :wq, :]
            v = jnp.pad(v, ((0, 0), (0, hq - v.shape[1]),
                            (0, wq - v.shape[2]), (0, 0)))
            views.append(v)
    return views


def _vmem_limit_bytes(need_bytes):
    """Generation-aware scoped-VMEM request.  Never below the estimated need
    (under-provisioning risks compile failure / spills); leave headroom under
    the physical capacity (64 MiB/TC on v7x, 128 MiB on v5e/v6e); None when it
    already fits the most conservative default scoped limit (16 MiB on v5e)."""
    need = int(1.25 * need_bytes) + (2 << 20)
    if need <= 16 << 20:
        return None
    try:
        cap = int(pltpu.get_tpu_info().vmem_capacity_bytes)
    except Exception:
        cap = 64 << 20
    budget = cap - (8 << 20)
    return need if need > budget else min(max(need, 24 << 20), budget)


# --------------------------- fused conv wrappers ---------------------------- #

def conv1_bn_relu(x, w_hwio, scale, shift, *, stride):
    """First ConvBlock: 3x3 conv (pad=1, stride) + folded BN + ReLU.
    x: (N,H,W,Cx) NHWC (Cx may include zero channel padding).
    Returns (N, Ho, Wo, Cpad) bf16 with Cpad = round_up(cout, 128)."""
    x = x.astype(_COMPUTE_DTYPE)
    n, h, wdim, cx = x.shape
    cout = w_hwio.shape[-1]
    cpad = _round_up(cout, _LANE)
    ho = (h + 2 - 3) // stride + 1
    wo = (wdim + 2 - 3) // stride + 1
    qmax = 2 // stride
    hq, wq = ho + qmax, wo + qmax

    xpad = jnp.pad(x, ((0, 0), (1, 1), (1, 1), (0, 0)))
    phases = _phase_views(xpad, stride, hq, wq)
    w_eff = _fold_conv_weight(w_hwio, scale, cx, cpad)   # BN scale folded once
    b_eff = _pad_shift(shift, cpad)

    n_ph = stride * stride
    need = (2 * n_ph * hq * wq * cx * 2          # double-buffered input phases
            + 2 * ho * wo * cpad * 2             # double-buffered output block
            + 2 * 9 * cx * cpad * 2              # folded weight
            + ho * wo * cpad * 4 + cpad * 8)     # f32 accumulator + shift
    in_specs = ([pl.BlockSpec((1, hq, wq, cx), lambda i: (i, 0, 0, 0))] * n_ph
                + [pl.BlockSpec((9, cx, cpad), lambda i: (0, 0, 0)),
                   pl.BlockSpec((1, cpad), lambda i: (0, 0))])

    return pl.pallas_call(
        functools.partial(_conv1_kernel, ho=ho, wo=wo, stride=stride),
        out_shape=jax.ShapeDtypeStruct((n, ho, wo, cpad), _COMPUTE_DTYPE),
        grid=(n,),
        in_specs=in_specs,
        out_specs=pl.BlockSpec((1, ho, wo, cpad), lambda i: (i, 0, 0, 0)),
        scratch_shapes=[pltpu.VMEM((ho * wo, cpad), jnp.float32)],
        compiler_params=pltpu.CompilerParams(
            dimension_semantics=("parallel",),
            vmem_limit_bytes=_vmem_limit_bytes(need)),
    )(*phases, w_eff, b_eff)


def conv2_bn_shortcut_relu(y, w_hwio, scale, shift, x_sc,
                           wsc_hwio=None, ssc=None, bsc=None):
    """Second ConvBlock (3x3, stride 1, pad 1) + BN, fused with the shortcut
    branch, residual add and final ReLU.

    y    : (N, Ho, Wo, Cpad_in) bf16 conv1 output (lane-padded channels).
    x_sc : (N, Ho, Wo, Csc) bf16 shortcut input rows.  For a projection
           shortcut it is matmul'd with the folded 1x1 weight; for the
           identity shortcut it is already lane-padded (zeros) and added
           directly in f32.
    Returns (N, Ho, Wo, Cpad_out) bf16.
    """
    n, ho, wo, cpad_in = y.shape
    cout = w_hwio.shape[-1]
    cpad = _round_up(cout, _LANE)
    csc = x_sc.shape[-1]

    # Spatial pad so every conv2 tap is a contiguous in-kernel slice.
    yp = jnp.pad(y, ((0, 0), (1, 1), (1, 1), (0, 0)))
    hq, wq = ho + 2, wo + 2
    w_eff = _fold_conv_weight(w_hwio, scale, cpad_in, cpad)
    b_eff = _pad_shift(shift, cpad)

    need = (2 * hq * wq * cpad_in * 2 + 2 * ho * wo * csc * 2
            + 2 * ho * wo * cpad * 2 + 2 * 9 * cpad_in * cpad * 2
            + ho * wo * cpad * 4 + 4 * cpad * 8)
    in_specs = [pl.BlockSpec((1, hq, wq, cpad_in), lambda i: (i, 0, 0, 0)),
                pl.BlockSpec((9, cpad_in, cpad), lambda i: (0, 0, 0)),
                pl.BlockSpec((1, cpad), lambda i: (0, 0)),
                pl.BlockSpec((1, ho, wo, csc), lambda i: (i, 0, 0, 0))]
    args = [yp, w_eff, b_eff, x_sc]

    if wsc_hwio is None:                 # identity shortcut: direct f32 add
        kernel = functools.partial(_conv2_identity_kernel, ho=ho, wo=wo)
    else:                                # projection shortcut: second MXU matmul
        wsc_eff = _fold_conv_weight(wsc_hwio, ssc, csc, cpad)[0]
        bsc_eff = _pad_shift(bsc, cpad)
        need += 2 * csc * cpad * 2
        in_specs += [pl.BlockSpec((csc, cpad), lambda i: (0, 0)),
                     pl.BlockSpec((1, cpad), lambda i: (0, 0))]
        args += [wsc_eff, bsc_eff]
        kernel = functools.partial(_conv2_proj_kernel, ho=ho, wo=wo)

    return pl.pallas_call(
        kernel,
        out_shape=jax.ShapeDtypeStruct((n, ho, wo, cpad), _COMPUTE_DTYPE),
        grid=(n,),
        in_specs=in_specs,
        out_specs=pl.BlockSpec((1, ho, wo, cpad), lambda i: (i, 0, 0, 0)),
        scratch_shapes=[pltpu.VMEM((ho * wo, cpad), jnp.float32)],
        compiler_params=pltpu.CompilerParams(
            dimension_semantics=("parallel",),
            vmem_limit_bytes=_vmem_limit_bytes(need)),
    )(*args)


# --------------------------- BasicBlock module ----------------------------- #

def init_basic_block_params(key, in_planes, planes, stride, eps=1e-5):
    keys = jax.random.split(key, 6)

    def conv_w(k, ksz, cin, cout):
        fan_in = ksz * ksz * cin
        return jax.random.normal(k, (ksz, ksz, cin, cout), jnp.float32) * (2.0 / fan_in) ** 0.5

    def bn_fold(k, c):
        kg, kb, km, kv = jax.random.split(k, 4)
        gamma = 1.0 + 0.1 * jax.random.normal(kg, (c,), jnp.float32)
        beta = 0.1 * jax.random.normal(kb, (c,), jnp.float32)
        mean = 0.1 * jax.random.normal(km, (c,), jnp.float32)
        var = jnp.abs(jax.random.normal(kv, (c,), jnp.float32)) + 0.5
        scale = gamma * jax.lax.rsqrt(var + eps)
        shift = beta - mean * scale
        return scale, shift

    p = {
        "w1": conv_w(keys[0], 3, in_planes, planes),
        "w2": conv_w(keys[1], 3, planes, planes),
        "has_shortcut": (stride != 1 or in_planes != planes),
        "stride": stride,
    }
    p["s1"], p["b1"] = bn_fold(keys[2], planes)
    p["s2"], p["b2"] = bn_fold(keys[3], planes)
    if p["has_shortcut"]:
        p["wsc"] = conv_w(keys[4], 1, in_planes, planes)
        p["ssc"], p["bsc"] = bn_fold(keys[5], planes)
    return p


def basic_block_forward_nhwc(x, params):
    """Chainable NHWC forward: bf16 in (channels may carry zero lane-padding
    from a previous block), bf16 out with channels zero-padded to a multiple
    of 128.  No transposes, no channel slicing, no f32 up-cast inside the net."""
    stride = params["stride"]
    x = x.astype(_COMPUTE_DTYPE)
    out1 = conv1_bn_relu(x, params["w1"], params["s1"], params["b1"], stride=stride)
    ho, wo = out1.shape[1], out1.shape[2]
    if params["has_shortcut"]:
        x_sc = x[:, ::stride, ::stride, :][:, :ho, :wo, :]
        return conv2_bn_shortcut_relu(out1, params["w2"], params["s2"], params["b2"],
                                      x_sc, params["wsc"], params["ssc"], params["bsc"])
    # Identity shortcut: lane-pad the block input once (zeros) so the in-kernel
    # add is full-width (already padded when chaining blocks -> no extra cost).
    cpad = _round_up(params["w2"].shape[-1], _LANE)
    x_sc = x if x.shape[-1] == cpad else jnp.pad(
        x, ((0, 0), (0, 0), (0, 0), (0, cpad - x.shape[-1])))
    return conv2_bn_shortcut_relu(out1, params["w2"], params["s2"], params["b2"], x_sc)


def basic_block_forward(x_nchw, params):
    """PyTorch-style single-block interface: NCHW f32 in, NCHW f32 out.
    (Conversion + channel slice + f32 cast happen only at this boundary.)"""
    planes = params["w2"].shape[-1]
    x = jnp.transpose(x_nchw, (0, 2, 3, 1))               # NCHW -> NHWC
    out = basic_block_forward_nhwc(x, params)
    return jnp.transpose(out[..., :planes].astype(jnp.float32), (0, 3, 1, 2))


# ------------------------- pure-JAX reference check ------------------------ #
# The reference mirrors the kernel's bf16 operand casts / bf16 activation
# stores (f32 accumulation), so the comparison checks the kernel math.

def _ref_conv(x, w, scale, stride, pad):
    w_eff = (w * scale).astype(_COMPUTE_DTYPE)
    return lax.conv_general_dilated(
        x.astype(_COMPUTE_DTYPE), w_eff, (stride, stride), [(pad, pad), (pad, pad)],
        dimension_numbers=("NHWC", "HWIO", "NHWC"),
        preferred_element_type=jnp.float32)


def _ref_forward(x_nchw, params):
    stride = params["stride"]
    x = jnp.transpose(x_nchw, (0, 2, 3, 1))
    y = jnp.maximum(_ref_conv(x, params["w1"], params["s1"], stride, 1) + params["b1"], 0.0)
    y = y.astype(_COMPUTE_DTYPE)                          # conv1 output stored bf16
    z = _ref_conv(y, params["w2"], params["s2"], 1, 1) + params["b2"]
    if params["has_shortcut"]:
        sc = _ref_conv(x, params["wsc"], params["ssc"], stride, 0) + params["bsc"]
    else:
        sc = x.astype(_COMPUTE_DTYPE).astype(jnp.float32)
    out = jnp.maximum(z + sc, 0.0).astype(_COMPUTE_DTYPE)  # block output stored bf16
    return jnp.transpose(out.astype(jnp.float32), (0, 3, 1, 2))


# --------------------------------- main ------------------------------------ #

if __name__ == "__main__":
    key = jax.random.PRNGKey(0)
    kx, kp, kx2, kp2, kx3, kp3 = jax.random.split(key, 6)

    def _check(x, params, expect_shape, name):
        out = jax.block_until_ready(basic_block_forward(x, params))
        ref = jax.block_until_ready(_ref_forward(x, params))
        assert out.shape == expect_shape, (name, out.shape)
        err = float(jnp.max(jnp.abs(out - ref)))
        assert jnp.allclose(out, ref, rtol=2e-2, atol=5e-2), f"{name} mismatch, max|err|={err}"

    # Case 1: projection (1x1-conv) shortcut, stride 1.
    x = jax.random.normal(kx, (2, 4, 16, 16), jnp.float32)            # NCHW
    params = init_basic_block_params(kp, 4, 8, 1)
    _check(x, params, (2, 8, 16, 16), "projection")

    # Case 2: identity shortcut (in_planes == planes, stride 1) -> direct add path.
    x2 = jax.random.normal(kx2, (2, 8, 16, 16), jnp.float32)
    params2 = init_basic_block_params(kp2, 8, 8, 1)
    _check(x2, params2, (2, 8, 16, 16), "identity")

    # Case 3: downsampling block (stride 2, projection shortcut) -> phase path.
    x3 = jax.random.normal(kx3, (2, 4, 16, 16), jnp.float32)
    params3 = init_basic_block_params(kp3, 4, 8, 2)
    _check(x3, params3, (2, 8, 8, 8), "stride-2 projection")

    print("KERNEL_OK")
</pallas_src>

<mosaic_0001>
module attributes {stable_mosaic.version = 11 : i64} {
  func.func @_conv1_kernel(%arg0: i32, %arg1: memref<1x18x18x4xbf16, #tpu.memory_space<vmem>>, %arg2: memref<9x4x128xbf16, #tpu.memory_space<vmem>>, %arg3: memref<1x128xf32, #tpu.memory_space<vmem>>, %arg4: memref<1x16x16x128xbf16, #tpu.memory_space<vmem>>, %arg5: memref<256x128xf32, #tpu.memory_space<vmem>>) attributes {dimension_semantics = [#tpu.dimension_semantics<parallel>], iteration_bounds = array<i64: 2>, scalar_prefetch = 0 : i64, scratch_operands = 1 : i64, tpu.core_type = #tpu.core_type<tc>, window_params = [{transform_indices = @transform_0, window_bounds = array<i64: 1, 18, 18, 4>}, {pipeline_mode = #tpu.pipeline_mode<synchronous>, transform_indices = @transform_1, window_bounds = array<i64: 9, 4, 128>}, {pipeline_mode = #tpu.pipeline_mode<synchronous>, transform_indices = @transform_2, window_bounds = array<i64: 1, 128>}, {transform_indices = @transform_3, window_bounds = array<i64: 1, 16, 16, 128>}]} {
    %cst = arith.constant 0.000000e+00 : f32
    %0 = vector.broadcast %cst : f32 to vector<256x128xf32>
    %c0 = arith.constant 0 : index
    %c0_0 = arith.constant 0 : index
    %1 = vector.load %arg5[%c0, %c0_0] : memref<256x128xf32, #tpu.memory_space<vmem>>, vector<256x128xf32>
    tpu.vector_store %arg5[%c0, %c0_0], %0 {strides = array<i32>} : memref<256x128xf32, #tpu.memory_space<vmem>>, vector<256x128xf32>,
    %c0_1 = arith.constant 0 : index
    %c0_2 = arith.constant 0 : index
    %c0_3 = arith.constant 0 : index
    %c0_4 = arith.constant 0 : index
    %2 = vector.load %arg1[%c0_1, %c0_2, %c0_3, %c0_4] : memref<1x18x18x4xbf16, #tpu.memory_space<vmem>>, vector<1x16x16x4xbf16>
    %3 = vector.shape_cast %2 : vector<1x16x16x4xbf16> to vector<16x16x4xbf16>
    %4 = vector.shape_cast %3 : vector<16x16x4xbf16> to vector<256x4xbf16>
    %c0_5 = arith.constant 0 : index
    %c0_6 = arith.constant 0 : index
    %5 = vector.load %arg5[%c0_5, %c0_6] : memref<256x128xf32, #tpu.memory_space<vmem>>, vector<256x128xf32>
    %c0_7 = arith.constant 0 : index
    %c0_8 = arith.constant 0 : index
    %c0_9 = arith.constant 0 : index
    %6 = vector.load %arg2[%c0_7, %c0_8, %c0_9] : memref<9x4x128xbf16, #tpu.memory_space<vmem>>, vector<1x4x128xbf16>
    %7 = vector.shape_cast %6 : vector<1x4x128xbf16> to vector<4x128xbf16>
    %cst_10 = arith.constant dense<0.000000e+00> : vector<256x128xf32>
    %8 = tpu.matmul %4, %7, %cst_10 {dimension_numbers = #tpu.dot_dimension_numbers<[1], [0], [0], [1], [0, 0, 1, 1], [], []>} : vector<256x4xbf16>, vector<4x128xbf16>, vector<256x128xf32> -> vector<256x128xf32>
    %9 = arith.addf %5, %8 : vector<256x128xf32>
    %c0_11 = arith.constant 0 : index
    %c0_12 = arith.constant 0 : index
    %10 = vector.load %arg5[%c0_11, %c0_12] : memref<256x128xf32, #tpu.memory_space<vmem>>, vector<256x128xf32>
    tpu.vector_store %arg5[%c0_11, %c0_12], %9 {strides = array<i32>} : memref<256x128xf32, #tpu.memory_space<vmem>>, vector<256x128xf32>,
    %c0_13 = arith.constant 0 : index
    %c0_14 = arith.constant 0 : index
    %c1 = arith.constant 1 : index
    %c0_15 = arith.constant 0 : index
    %11 = vector.load %arg1[%c0_13, %c0_14, %c1, %c0_15] : memref<1x18x18x4xbf16, #tpu.memory_space<vmem>>, vector<1x16x16x4xbf16>
    %12 = vector.shape_cast %11 : vector<1x16x16x4xbf16> to vector<16x16x4xbf16>
    %13 = vector.shape_cast %12 : vector<16x16x4xbf16> to vector<256x4xbf16>
    %c0_16 = arith.constant 0 : index
    %c0_17 = arith.constant 0 : index
    %14 = vector.load %arg5[%c0_16, %c0_17] : memref<256x128xf32, #tpu.memory_space<vmem>>, vector<256x128xf32>
    %c1_18 = arith.constant 1 : index
    %c0_19 = arith.constant 0 : index
    %c0_20 = arith.constant 0 : index
    %15 = vector.load %arg2[%c1_18, %c0_19, %c0_20] : memref<9x4x128xbf16, #tpu.memory_space<vmem>>, vector<1x4x128xbf16>
    %16 = vector.shape_cast %15 : vector<1x4x128xbf16> to vector<4x128xbf16>
    %cst_21 = arith.constant dense<0.000000e+00> : vector<256x128xf32>
    %17 = tpu.matmul %13, %16, %cst_21 {dimension_numbers = #tpu.dot_dimension_numbers<[1], [0], [0], [1], [0, 0, 1, 1], [], []>} : vector<256x4xbf16>, vector<4x128xbf16>, vector<256x128xf32> -> vector<256x128xf32>
    %18 = arith.addf %14, %17 : vector<256x128xf32>
    %c0_22 = arith.constant 0 : index
    %c0_23 = arith.constant 0 : index
    %19 = vector.load %arg5[%c0_22, %c0_23] : memref<256x128xf32, #tpu.memory_space<vmem>>, vector<256x128xf32>
    tpu.vector_store %arg5[%c0_22, %c0_23], %18 {strides = array<i32>} : memref<256x128xf32, #tpu.memory_space<vmem>>, vector<256x128xf32>,
    %c0_24 = arith.constant 0 : index
    %c0_25 = arith.constant 0 : index
    %c2 = arith.constant 2 : index
    %c0_26 = arith.constant 0 : index
    %20 = vector.load %arg1[%c0_24, %c0_25, %c2, %c0_26] : memref<1x18x18x4xbf16, #tpu.memory_space<vmem>>, vector<1x16x16x4xbf16>
    %21 = vector.shape_cast %20 : vector<1x16x16x4xbf16> to vector<16x16x4xbf16>
    %22 = vector.shape_cast %21 : vector<16x16x4xbf16> to vector<256x4xbf16>
    %c0_27 = arith.constant 0 : index
    %c0_28 = arith.constant 0 : index
    %23 = vector.load %arg5[%c0_27, %c0_28] : memref<256x128xf32, #tpu.memory_space<vmem>>, vector<256x128xf32>
    %c2_29 = arith.constant 2 : index
    %c0_30 = arith.constant 0 : index
    %c0_31 = arith.constant 0 : index
    %24 = vector.load %arg2[%c2_29, %c0_30, %c0_31] : memref<9x4x128xbf16, #tpu.memory_space<vmem>>, vector<1x4x128xbf16>
    %25 = vector.shape_cast %24 : vector<1x4x128xbf16> to vector<4x128xbf16>
    %cst_32 = arith.constant dense<0.000000e+00> : vector<256x128xf32>
    %26 = tpu.matmul %22, %25, %cst_32 {dimension_numbers = #tpu.dot_dimension_numbers<[1], [0], [0], [1], [0, 0, 1, 1], [], []>} : vector<256x4xbf16>, vector<4x128xbf16>, vector<256x128xf32> -> vector<256x128xf32>
    %27 = arith.addf %23, %26 : vector<256x128xf32>
    %c0_33 = arith.constant 0 : index
    %c0_34 = arith.constant 0 : index
    %28 = vector.load %arg5[%c0_33, %c0_34] : memref<256x128xf32, #tpu.memory_space<vmem>>, vector<256x128xf32>
    tpu.vector_store %arg5[%c0_33, %c0_34], %27 {strides = array<i32>} : memref<256x128xf32, #tpu.memory_space<vmem>>, vector<256x128xf32>,
    %c0_35 = arith.constant 0 : index
    %c1_36 = arith.constant 1 : index
    %c0_37 = arith.constant 0 : index
    %c0_38 = arith.constant 0 : index
    %29 = vector.load %arg1[%c0_35, %c1_36, %c0_37, %c0_38] : memref<1x18x18x4xbf16, #tpu.memory_space<vmem>>, vector<1x16x16x4xbf16>
    %30 = vector.shape_cast %29 : vector<1x16x16x4xbf16> to vector<16x16x4xbf16>
    %31 = vector.shape_cast %30 : vector<16x16x4xbf16> to vector<256x4xbf16>
    %c0_39 = arith.constant 0 : index
    %c0_40 = arith.constant 0 : index
    %32 = vector.load %arg5[%c0_39, %c0_40] : memref<256x128xf32, #tpu.memory_space<vmem>>, vector<256x128xf32>
    %c3 = arith.constant 3 : index
    %c0_41 = arith.constant 0 : index
    %c0_42 = arith.constant 0 : index
    %33 = vector.load %arg2[%c3, %c0_41, %c0_42] : memref<9x4x128xbf16, #tpu.memory_space<vmem>>, vector<1x4x128xbf16>
    %34 = vector.shape_cast %33 : vector<1x4x128xbf16> to vector<4x128xbf16>
    %cst_43 = arith.constant dense<0.000000e+00> : vector<256x128xf32>
    %35 = tpu.matmul %31, %34, %cst_43 {dimension_numbers = #tpu.dot_dimension_numbers<[1], [0], [0], [1], [0, 0, 1, 1], [], []>} : vector<256x4xbf16>, vector<4x128xbf16>, vector<256x128xf32> -> vector<256x128xf32>
    %36 = arith.addf %32, %35 : vector<256x128xf32>
    %c0_44 = arith.constant 0 : index
    %c0_45 = arith.constant 0 : index
    %37 = vector.load %arg5[%c0_44, %c0_45] : memref<256x128xf32, #tpu.memory_space<vmem>>, vector<256x128xf32>
    tpu.vector_store %arg5[%c0_44, %c0_45], %36 {strides = array<i32>} : memref<256x128xf32, #tpu.memory_space<vmem>>, vector<256x128xf32>,
    %c0_46 = arith.constant 0 : index
    %c1_47 = arith.constant 1 : index
    %c1_48 = arith.constant 1 : index
    %c0_49 = arith.constant 0 : index
    %38 = vector.load %arg1[%c0_46, %c1_47, %c1_48, %c0_49] : memref<1x18x18x4xbf16, #tpu.memory_space<vmem>>, vector<1x16x16x4xbf16>
    %39 = vector.shape_cast %38 : vector<1x16x16x4xbf16> to vector<16x16x4xbf16>
    %40 = vector.shape_cast %39 : vector<16x16x4xbf16> to vector<256x4xbf16>
    %c0_50 = arith.constant 0 : index
    %c0_51 = arith.constant 0 : index
    %41 = vector.load %arg5[%c0_50, %c0_51] : memref<256x128xf32, #tpu.memory_space<vmem>>, vector<256x128xf32>
    %c4 = arith.constant 4 : index
    %c0_52 = arith.constant 0 : index
    %c0_53 = arith.constant 0 : index
    %42 = vector.load %arg2[%c4, %c0_52, %c0_53] : memref<9x4x128xbf16, #tpu.memory_space<vmem>>, vector<1x4x128xbf16>
    %43 = vector.shape_cast %42 : vector<1x4x128xbf16> to vector<4x128xbf16>
    %cst_54 = arith.constant dense<0.000000e+00> : vector<256x128xf32>
    %44 = tpu.matmul %40, %43, %cst_54 {dimension_numbers = #tpu.dot_dimension_numbers<[1], [0], [0], [1], [0, 0, 1, 1], [], []>} : vector<256x4xbf16>, vector<4x128xbf16>, vector<256x128xf32> -> vector<256x128xf32>
    %45 = arith.addf %41, %44 : vector<256x128xf32>
    %c0_55 = arith.constant 0 : index
    %c0_56 = arith.constant 0 : index
    %46 = vector.load %arg5[%c0_55, %c0_56] : memref<256x128xf32, #tpu.memory_space<vmem>>, vector<256x128xf32>
    tpu.vector_store %arg5[%c0_55, %c0_56], %45 {strides = array<i32>} : memref<256x128xf32, #tpu.memory_space<vmem>>, vector<256x128xf32>,
    %c0_57 = arith.constant 0 : index
    %c1_58 = arith.constant 1 : index
    %c2_59 = arith.constant 2 : index
    %c0_60 = arith.constant 0 : index
    %47 = vector.load %arg1[%c0_57, %c1_58, %c2_59, %c0_60] : memref<1x18x18x4xbf16, #tpu.memory_space<vmem>>, vector<1x16x16x4xbf16>
    %48 = vector.shape_cast %47 : vector<1x16x16x4xbf16> to vector<16x16x4xbf16>
    %49 = vector.shape_cast %48 : vector<16x16x4xbf16> to vector<256x4xbf16>
    %c0_61 = arith.constant 0 : index
    %c0_62 = arith.constant 0 : index
    %50 = vector.load %arg5[%c0_61, %c0_62] : memref<256x128xf32, #tpu.memory_space<vmem>>, vector<256x128xf32>
    %c5 = arith.constant 5 : index
    %c0_63 = arith.constant 0 : index
    %c0_64 = arith.constant 0 : index
    %51 = vector.load %arg2[%c5, %c0_63, %c0_64] : memref<9x4x128xbf16, #tpu.memory_space<vmem>>, vector<1x4x128xbf16>
    %52 = vector.shape_cast %51 : vector<1x4x128xbf16> to vector<4x128xbf16>
    %cst_65 = arith.constant dense<0.000000e+00> : vector<256x128xf32>
    %53 = tpu.matmul %49, %52, %cst_65 {dimension_numbers = #tpu.dot_dimension_numbers<[1], [0], [0], [1], [0, 0, 1, 1], [], []>} : vector<256x4xbf16>, vector<4x128xbf16>, vector<256x128xf32> -> vector<256x128xf32>
    %54 = arith.addf %50, %53 : vector<256x128xf32>
    %c0_66 = arith.constant 0 : index
    %c0_67 = arith.constant 0 : index
    %55 = vector.load %arg5[%c0_66, %c0_67] : memref<256x128xf32, #tpu.memory_space<vmem>>, vector<256x128xf32>
    tpu.vector_store %arg5[%c0_66, %c0_67], %54 {strides = array<i32>} : memref<256x128xf32, #tpu.memory_space<vmem>>, vector<256x128xf32>,
    %c0_68 = arith.constant 0 : index
    %c2_69 = arith.constant 2 : index
    %c0_70 = arith.constant 0 : index
    %c0_71 = arith.constant 0 : index
    %56 = vector.load %arg1[%c0_68, %c2_69, %c0_70, %c0_71] : memref<1x18x18x4xbf16, #tpu.memory_space<vmem>>, vector<1x16x16x4xbf16>
    %57 = vector.shape_cast %56 : vector<1x16x16x4xbf16> to vector<16x16x4xbf16>
    %58 = vector.shape_cast %57 : vector<16x16x4xbf16> to vector<256x4xbf16>
    %c0_72 = arith.constant 0 : index
    %c0_73 = arith.constant 0 : index
    %59 = vector.load %arg5[%c0_72, %c0_73] : memref<256x128xf32, #tpu.memory_space<vmem>>, vector<256x128xf32>
    %c6 = arith.constant 6 : index
    %c0_74 = arith.constant 0 : index
    %c0_75 = arith.constant 0 : index
    %60 = vector.load %arg2[%c6, %c0_74, %c0_75] : memref<9x4x128xbf16, #tpu.memory_space<vmem>>, vector<1x4x128xbf16>
    %61 = vector.shape_cast %60 : vector<1x4x128xbf16> to vector<4x128xbf16>
    %cst_76 = arith.constant dense<0.000000e+00> : vector<256x128xf32>
    %62 = tpu.matmul %58, %61, %cst_76 {dimension_numbers = #tpu.dot_dimension_numbers<[1], [0], [0], [1], [0, 0, 1, 1], [], []>} : vector<256x4xbf16>, vector<4x128xbf16>, vector<256x128xf32> -> vector<256x128xf32>
    %63 = arith.addf %59, %62 : vector<256x128xf32>
    %c0_77 = arith.constant 0 : index
    %c0_78 = arith.constant 0 : index
    %64 = vector.load %arg5[%c0_77, %c0_78] : memref<256x128xf32, #tpu.memory_space<vmem>>, vector<256x128xf32>
    tpu.vector_store %arg5[%c0_77, %c0_78], %63 {strides = array<i32>} : memref<256x128xf32, #tpu.memory_space<vmem>>, vector<256x128xf32>,
    %c0_79 = arith.constant 0 : index
    %c2_80 = arith.constant 2 : index
    %c1_81 = arith.constant 1 : index
    %c0_82 = arith.constant 0 : index
    %65 = vector.load %arg1[%c0_79, %c2_80, %c1_81, %c0_82] : memref<1x18x18x4xbf16, #tpu.memory_space<vmem>>, vector<1x16x16x4xbf16>
    %66 = vector.shape_cast %65 : vector<1x16x16x4xbf16> to vector<16x16x4xbf16>
    %67 = vector.shape_cast %66 : vector<16x16x4xbf16> to vector<256x4xbf16>
    %c0_83 = arith.constant 0 : index
    %c0_84 = arith.constant 0 : index
    %68 = vector.load %arg5[%c0_83, %c0_84] : memref<256x128xf32, #tpu.memory_space<vmem>>, vector<256x128xf32>
    %c7 = arith.constant 7 : index
    %c0_85 = arith.constant 0 : index
    %c0_86 = arith.constant 0 : index
    %69 = vector.load %arg2[%c7, %c0_85, %c0_86] : memref<9x4x128xbf16, #tpu.memory_space<vmem>>, vector<1x4x128xbf16>
    %70 = vector.shape_cast %69 : vector<1x4x128xbf16> to vector<4x128xbf16>
    %cst_87 = arith.constant dense<0.000000e+00> : vector<256x128xf32>
    %71 = tpu.matmul %67, %70, %cst_87 {dimension_numbers = #tpu.dot_dimension_numbers<[1], [0], [0], [1], [0, 0, 1, 1], [], []>} : vector<256x4xbf16>, vector<4x128xbf16>, vector<256x128xf32> -> vector<256x128xf32>
    %72 = arith.addf %68, %71 : vector<256x128xf32>
    %c0_88 = arith.constant 0 : index
    %c0_89 = arith.constant 0 : index
    %73 = vector.load %arg5[%c0_88, %c0_89] : memref<256x128xf32, #tpu.memory_space<vmem>>, vector<256x128xf32>
    tpu.vector_store %arg5[%c0_88, %c0_89], %72 {strides = array<i32>} : memref<256x128xf32, #tpu.memory_space<vmem>>, vector<256x128xf32>,
    %c0_90 = arith.constant 0 : index
    %c2_91 = arith.constant 2 : index
    %c2_92 = arith.constant 2 : index
    %c0_93 = arith.constant 0 : index
    %74 = vector.load %arg1[%c0_90, %c2_91, %c2_92, %c0_93] : memref<1x18x18x4xbf16, #tpu.memory_space<vmem>>, vector<1x16x16x4xbf16>
    %75 = vector.shape_cast %74 : vector<1x16x16x4xbf16> to vector<16x16x4xbf16>
    %76 = vector.shape_cast %75 : vector<16x16x4xbf16> to vector<256x4xbf16>
    %c0_94 = arith.constant 0 : index
    %c0_95 = arith.constant 0 : index
    %77 = vector.load %arg5[%c0_94, %c0_95] : memref<256x128xf32, #tpu.memory_space<vmem>>, vector<256x128xf32>
    %c8 = arith.constant 8 : index
    %c0_96 = arith.constant 0 : index
    %c0_97 = arith.constant 0 : index
    %78 = vector.load %arg2[%c8, %c0_96, %c0_97] : memref<9x4x128xbf16, #tpu.memory_space<vmem>>, vector<1x4x128xbf16>
    %79 = vector.shape_cast %78 : vector<1x4x128xbf16> to vector<4x128xbf16>
    %cst_98 = arith.constant dense<0.000000e+00> : vector<256x128xf32>
    %80 = tpu.matmul %76, %79, %cst_98 {dimension_numbers = #tpu.dot_dimension_numbers<[1], [0], [0], [1], [0, 0, 1, 1], [], []>} : vector<256x4xbf16>, vector<4x128xbf16>, vector<256x128xf32> -> vector<256x128xf32>
    %81 = arith.addf %77, %80 : vector<256x128xf32>
    %c0_99 = arith.constant 0 : index
    %c0_100 = arith.constant 0 : index
    %82 = vector.load %arg5[%c0_99, %c0_100] : memref<256x128xf32, #tpu.memory_space<vmem>>, vector<256x128xf32>
    tpu.vector_store %arg5[%c0_99, %c0_100], %81 {strides = array<i32>} : memref<256x128xf32, #tpu.memory_space<vmem>>, vector<256x128xf32>,
    %c0_101 = arith.constant 0 : index
    %c0_102 = arith.constant 0 : index
    %83 = vector.load %arg5[%c0_101, %c0_102] : memref<256x128xf32, #tpu.memory_space<vmem>>, vector<256x128xf32>
    %c0_103 = arith.constant 0 : index
    %c0_104 = arith.constant 0 : index
    %84 = vector.load %arg3[%c0_103, %c0_104] : memref<1x128xf32, #tpu.memory_space<vmem>>, vector<1x128xf32>
    %85 = vector.broadcast %84 : vector<1x128xf32> to vector<256x128xf32>
    %86 = arith.addf %83, %85 : vector<256x128xf32>
    %cst_105 = arith.constant 0.000000e+00 : f32
    %87 = vector.broadcast %cst_105 : f32 to vector<256x128xf32>
    %88 = arith.maximumf %86, %87 : vector<256x128xf32>
    %89 = vector.shape_cast %88 : vector<256x128xf32> to vector<16x16x128xf32>
    %90 = arith.truncf %89 : vector<16x16x128xf32> to vector<16x16x128xbf16>
    %c0_106 = arith.constant 0 : index
    %c0_107 = arith.constant 0 : index
    %c0_108 = arith.constant 0 : index
    %c0_109 = arith.constant 0 : index
    %91 = vector.load %arg4[%c0_106, %c0_107, %c0_108, %c0_109] : memref<1x16x16x128xbf16, #tpu.memory_space<vmem>>, vector<1x16x16x128xbf16>
    %92 = vector.shape_cast %91 : vector<1x16x16x128xbf16> to vector<16x16x128xbf16>
    %93 = vector.shape_cast %90 : vector<16x16x128xbf16> to vector<1x16x16x128xbf16>
    tpu.vector_store %arg4[%c0_106, %c0_107, %c0_108, %c0_109], %93 {strides = array<i32>} : memref<1x16x16x128xbf16, #tpu.memory_space<vmem>>, vector<1x16x16x128xbf16>,
    return
  }
  func.func @transform_0(%arg0: i32) -> (i32, i32, i32, i32) {
    %c0_i32 = arith.constant 0 : i32
    %c0_i32_0 = arith.constant 0 : i32
    %c0_i32_1 = arith.constant 0 : i32
    %c0_i32_2 = arith.constant 0 : i32
    return %arg0, %c0_i32, %c0_i32_0, %c0_i32_1 : i32, i32, i32, i32
  }
  func.func @transform_1(%arg0: i32) -> (i32, i32, i32) {
    %c0_i32 = arith.constant 0 : i32
    %c0_i32_0 = arith.constant 0 : i32
    %c0_i32_1 = arith.constant 0 : i32
    %c0_i32_2 = arith.constant 0 : i32
    return %c0_i32, %c0_i32_0, %c0_i32_1 : i32, i32, i32
  }
  func.func @transform_2(%arg0: i32) -> (i32, i32) {
    %c0_i32 = arith.constant 0 : i32
    %c0_i32_0 = arith.constant 0 : i32
    %c0_i32_1 = arith.constant 0 : i32
    return %c0_i32, %c0_i32_0 : i32, i32
  }
  func.func @transform_3(%arg0: i32) -> (i32, i32, i32, i32) {
    %c0_i32 = arith.constant 0 : i32
    %c0_i32_0 = arith.constant 0 : i32
    %c0_i32_1 = arith.constant 0 : i32
    %c0_i32_2 = arith.constant 0 : i32
    return %arg0, %c0_i32, %c0_i32_0, %c0_i32_1 : i32, i32, i32, i32
  }
}

</mosaic_0001>

<bundles_post_ra>
// kernel: tpu_custom_call.1
= control target key start
LH: loop header
LB: loop body
LE: loop exit
PB: predicated region body
PF: predicated region fallthrough
CT: control target
= control target key end

     0   :  { %8 = vsyncpa [#allocation4], 0  ;;  %s8987_s0 = inlined_call_operand.vmem [shape: bf16[2,18,18,4], index: 0, kind: input, shape index: {}]   ;;  %s8988_s1 = inlined_call_operand.vmem [shape: bf16[9,4,128], index: 1, kind: input, shape index: {}]   ;;  %s8989_s2 = inlined_call_operand.vmem [shape: f32[1,128], index: 2, kind: input, shape index: {}]   ;;  %s8990_s3 = inlined_call_operand.hbm [shape: bf16[2,16,16,128], index: 3, kind: output, shape index: {}]  }
   0x1   :  { %10 = vsyncpa [#allocation4 + $0x1], 0  ;;  %s7561_s12 = smov 0   ;;  %s7563_s13 = smov 0  }
   0x2   :  { %s7565_s14 = smov 0   ;;  %s7567_s15 = smov 0  }
   0x3 LB: > { %s7582_s16 = sadd.s32 4294967295, %s7536_s15   ;;  %s5884_s17 = sadd.s32 4294967294, %s7536_s15   ;;  %s7536_s15 = sphi %s7567_s15, %s9000_s15   ;;  %s7532_s14 = sphi %s7565_s14, %s8999_s14   ;;  %s7528_s13 = sphi %s7563_s13, %s8998_s13   ;;  %s7524_s12 = sphi %s7561_s12, %s8997_s12  }
   0x4   : > { %s7586_s18 = sadd.s32 1, %s7536_s15   ;;  %s91_s19 = sadd.s32 1, %s7532_s14 }
   0x5   : > { %s88_s20 = ssub.s32 %s7536_s15, %s7586_s18  ;;  %p101_p0 = scmp.ne.s32.totalorder %s7532_s14, %s7528_s13 }
   0x6   : > { %p89_p1 = scmp.eq.s32.totalorder %s88_s20, 0  ;;  %p102_p2 = scmp.eq.s32.totalorder %s7582_s16, 1 }
   0x7   : > { %p107_p3 = scmp.ne.s32.totalorder %s7528_s13, %s7524_s12  ;;  %p108_p4 = scmp.eq.s32.totalorder %s5884_s17, 1 }
   0x8   : > { %s7597_s21 = scalar_select %p89_p1, %s7532_s14, %s91_s19  }
   0x9   : > { %p7599_p5 = por %p102_p2, %p101_p0  ;;  %p7603_p6 = por %p108_p4, %p107_p3 }
   0xa   : > { %p5887_p7 = scmp.ge.s32.totalorder %s7536_s15, 1  ;;  %p140_p8 = scmp.lt.s32.totalorder %s7536_s15, 3 }
   0xc   : > { %p141_p9 = pnand %p5887_p7, %p140_p8 }
   0xd   : > { %v266_v0 = vld [vmem:[%s8988_s1] sm:$0x3] (!%p141_p9)  ;;  %vm396_vm0 = vcmask (!%p141_p9), 1041408   ;;  %p164_p10 = scmp.lt.s32.totalorder (!%p141_p9), %s7582_s16, 1  ;;  %v6117_v2 = vld [vmem:[%s8988_s1 + $0x8] sm:$0x3] (!%p141_p9) }
   0xe   : > { %144 = sbr.rel (%p141_p9) target bundleno = 567 (0x237), region = 32  ;;  %7373 = vmatprep.subr.msk.bf16.mxu1 (!%p141_p9), %vm396_vm0, %v266_v0  ;;  %v398_v1 = vsel (!%p141_p9), %vm396_vm0, %v266_v0, 0  ;;  %v5922_v3 = vld [vmem:[%s8988_s1 + $0x2] sm:$0x3] (!%p141_p9)  ;;  %7377 = vmatprep.subr.msk.bf16.mxu0 (!%p141_p9), %vm396_vm0, %v6117_v2  ;;  %v7624_v4 = vsel (!%p141_p9), %vm396_vm0, %v6117_v2, 0  ;;  %vm347_vm1 = vcmask (!%p141_p9), 31744  }
   0xf   : > { %6810 = vmatpush3.bf16.msra.mxu1 (!%p141_p9), %v398_v1  ;;  %6946 = vmatpush3.bf16.msra.mxu0 (!%p141_p9), %v7624_v4  ;;  %v6214_v5 = vld [vmem:[%s8988_s1 + $0xa] sm:$0x3] (!%p141_p9)  ;;  %vm673_vm2 = vsmask.f32 (!%p141_p9), 3328  ;;  %vm674_vm3 = vsmask.f32 (!%p141_p9), 7440 }
  0x10   : > { %7374 = vmatprep.subr.msk.bf16.mxu1 (!%p141_p9), %vm396_vm0, %v5922_v3  ;;  %7379 = vmatprep.subr.msk.bf16.mxu0 (!%p141_p9), %vm396_vm0, %v6214_v5  ;;  %v7640_v6 = vld [vmem:[%s8988_s1 + $0xc] sm:$0x3] (!%p141_p9)  ;;  %v5971_v7 = vld [vmem:[%s8988_s1 + $0x4] sm:$0x3] (!%p141_p9)  ;;  %v7648_v8 = vld [vmem:[%s8988_s1 + $0xe] sm:$0x3] (!%p141_p9) }
  0x11   : > { %v1191_v10 = vsel (!%p141_p9), %vm396_vm0, %v5922_v3, 0  ;;  %v7654_v12 = vsel (!%p141_p9), %vm396_vm0, %v6214_v5, 0  ;;  %v7660_v14 = vsel (!%p141_p9), %vm396_vm0, %v7640_v6, 0  ;;  %v7664_v15 = vsel (!%p141_p9), %vm396_vm0, %v5971_v7, 0  ;;  %vm7682_vm4 = vmor (!%p141_p9), %vm673_vm2, %vm674_vm3  ;;  %s7538_s24 = smov (!%p141_p9), [#allocation3]  }
  0x12   : > { %v7668_v16 = vsel (!%p141_p9), %vm396_vm0, %v7648_v8, 0  ;;  %vm1514_vm5 = vcmask (!%p141_p9), 1042432   ;;  %vm1515_vm6 = vcmask (!%p141_p9), 1046532   ;;  %s7478_s25 = sshll.u32 (!%p141_p9), %s7538_s24, 4  ;;  %s7479_s25 = int_to_ptr.vmem [resolvable:$false] %s7478_s25 }
  0x13   : > { %vm7757_vm7 = vmor (!%p141_p9), %vm1514_vm5, %vm1515_vm6  ;;  %s7480_s26 = scalar_lea.vmem (!%p141_p9), %s7479_s25, 4096 }
  0x15   : > { %s165_s30 = scalar_select %p164_p10, %s7582_s16, 1 }
  0x17   : > { %s7383_s6 = smul.u32 216, %s165_s30 }
  0x19   : > { %s7635_s9 = scalar_lea.vmem %s8987_s0, %s7383_s6  ;;  %s161_s6 = sand.u32 1, %s7528_s13  }
  0x1a   : > { %v7425_v9 = vld [vmem:[%s7635_s9] sm:$0xff]   ;;  %v7426_v11 = vld [vmem:[%s7635_s9 + $0xc] sm:$0xff]   ;;  %v7427_v13 = vld [vmem:[%s7635_s9 + $0x18] sm:$0xff]   ;;  %s5888_s7 = sshll.u32 %s161_s6, 7 }
  0x1b   : > { %6811 = vmatprep.mubr.msk.bf16.mxu1 %vm347_vm1, %v7425_v9  ;;  %v6069_v17 = vld [vmem:[%s7635_s9 + $0xc] sm:$0xf]  ;;  %v6070_v18 = vld [vmem:[%s7635_s9 + $0x10] sm:$0xf]  ;;  %v6071_v19 = vld [vmem:[%s7635_s9 + $0x14] sm:$0x1] }
  0x1c   : > { %6812 = vmatmul.mubr.msk.bf16.vlgmr.msra.gmra.mrb[0].mxu1 %vm347_vm1, %v7426_v11  ;;  %v7428_v20 = vld [vmem:[%s7635_s9 + $0x24] sm:$0xff]   ;;  %v2459_v21 = vshrl.u32 %v6069_v17, 16  ;;  %v2462_v22 = vshll.u32 %v6069_v17, 16  ;;  %v2468_v23 = vshll.u32 %v6070_v18, 16  ;;  %v2472_v24 = vshrl.u32 %v6070_v18, 16  ;;  %v7429_v42 = vld [vmem:[%s7635_s9 + $0x30] sm:$0xff]  }
  0x1d   : > { %6815 = vmatprep.mubr.msk.bf16.mxu1 %vm347_vm1, %v7427_v13  ;;  %6844 = vmatpush3.bf16.msra.mxu1 %v1191_v10  ;;  %v6072_v25 = vld [vmem:[%s7635_s9 + $0x18] sm:$0xf]  ;;  %v2478_v26 = vshll.u32 %v6071_v19, 16  ;;  %v6073_v27 = vld [vmem:[%s7635_s9 + $0x1c] sm:$0xf]  ;;  %s8885_s8 = scalar_lea.vmem [#allocation3], %s5888_s7 }
  0x1e   : > { %7375 = vmatprep.subr.msk.bf16.mxu1 %vm396_vm0, %v5971_v7  ;;  %v6074_v28 = vld [vmem:[%s7635_s9 + $0x20] sm:$0x1]  ;;  %v2483_v29 = vshrl.u32 %v6072_v25, 16  ;;  %v2461_v30 = vrot.slane %v2459_v21, 4  ;;  %v2464_v31 = vrot.slane %v2462_v22, 5  ;;  %v2470_v32 = vrot.slane %v2468_v23, 5 }
  0x1f   : > { %v2474_v33 = vrot.slane %v2472_v24, 4  ;;  %v2480_v34 = vrot.slane %v2478_v26, 5  ;;  %v2486_v36 = vshll.u32 %v6072_v25, 16  ;;  %v2492_v37 = vshll.u32 %v6073_v27, 16  ;;  %v6075_v46 = vld [vmem:[%s7635_s9 + $0x24] sm:$0xf] }
  0x20   : > { %v2485_v35 = vrot.slane %v2483_v29, 4  ;;  %v2465_v38 = vor.u32 %v2464_v31, %v2461_v30  ;;  %v2496_v40 = vshrl.u32 %v6073_v27, 16  ;;  %v2502_v41 = vshll.u32 %v6074_v28, 16  ;;  %v6076_v51 = vld [vmem:[%s7635_s9 + $0x28] sm:$0xf]  ;;  %v7430_v60 = vld [vmem:[%s7635_s9 + $0x3c] sm:$0xff]  }
  0x21   : > { %v2475_v39 = vor.u32 %v2474_v33, %v2470_v32  ;;  %v2488_v44 = vrot.slane %v2486_v36, 5  ;;  %v2494_v45 = vrot.slane %v2492_v37, 5  ;;  %v6077_v53 = vld [vmem:[%s7635_s9 + $0x2c] sm:$0x1]  ;;  %v2507_v54 = vshrl.u32 %v6075_v46, 16  ;;  %s5822_s10 = sshll.u32 %s8885_s8, 4  ;;  %s8940_s10 = int_to_ptr.vmem [resolvable:$true] %s5822_s10 }
  0x22   : > { %v2466_v47 = vrot.slane %v2465_v38, 4  ;;  %v2498_v49 = vrot.slane %v2496_v40, 4  ;;  %v2504_v50 = vrot.slane %v2502_v41, 5  ;;  %v2510_v55 = vshll.u32 %v6075_v46, 16  ;;  %v6078_v62 = vld [vmem:[%s7635_s9 + $0x30] sm:$0xf]  ;;  %p7481_p0 = scmp.lt.s32.totalorder %s8940_s10, %s7479_s25 }
  0x23   : > { %v2476_v48 = vrot.slane %v2475_v39, 4  ;;  %v2489_v52 = vor.u32 %v2488_v44, %v2485_v35  ;;  %v2516_v56 = vshll.u32 %v6076_v51, 16  ;;  %v2520_v61 = vshrl.u32 %v6076_v51, 16  ;;  %v6079_v63 = vld [vmem:[%s7635_s9 + $0x34] sm:$0xf]  ;;  %v7431_v7 = vld [vmem:[%s7635_s9 + $0x48] sm:$0xff]  }
  0x24   : > { %6816 = vmatmul.mubr.msk.bf16.gmra.mrb[4].mxu1 %vm347_vm1, %v7428_v20  ;;  %v2471_v57 = vsel %vm7682_vm4, %v2466_v47, %v2470_v32  ;;  %v2499_v59 = vor.u32 %v2498_v49, %v2494_v45  ;;  %v2509_v2 = vrot.slane %v2507_v54, 4  ;;  %v2512_v3 = vrot.slane %v2510_v55, 5  ;;  %v6080_v5 = vld [vmem:[%s7635_s9 + $0x38] sm:$0x1]  ;;  %v6081_v25 = vld [vmem:[%s7635_s9 + $0x3c] sm:$0xf] }
  0x25   : > { %6819 = vmatprep.mubr.msk.bf16.mxu1 %vm347_vm1, %v7429_v42  ;;  %v2481_v58 = vsel %vm7682_vm4, %v2476_v48, %v2480_v34  ;;  %v2490_v1 = vrot.slane %v2489_v52, 4  ;;  %v2518_v10 = vrot.slane %v2516_v56, 5  ;;  %v2522_v11 = vrot.slane %v2520_v61, 4  ;;  %v6082_v30 = vld [vmem:[%s7635_s9 + $0x40] sm:$0xf]  ;;  %v7432_v49 = vld [vmem:[%s7635_s9 + $0x54] sm:$0xff]  }
  0x26   : > { %v6118_v0 = vcombine.low %v2471_v57, %v2481_v58  ;;  %v2500_v9 = vrot.slane %v2499_v59, 4  ;;  %v2526_v13 = vshll.u32 %v6077_v53, 16  ;;  %v2513_v18 = vor.u32 %v2512_v3, %v2509_v2  ;;  %v6083_v37 = vld [vmem:[%s7635_s9 + $0x44] sm:$0x1]  ;;  %v6084_v40 = vld [vmem:[%s7635_s9 + $0x48] sm:$0xf] }
  0x27   : > { %v2495_v17 = vsel %vm7682_vm4, %v2490_v1, %v2494_v45  ;;  %v2531_v19 = vshrl.u32 %v6078_v62, 16  ;;  %v2534_v20 = vshll.u32 %v6078_v62, 16  ;;  %v2523_v22 = vor.u32 %v2522_v11, %v2518_v10  ;;  %v6085_v46 = vld [vmem:[%s7635_s9 + $0x4c] sm:$0xf]  ;;  %v6086_v52 = vld [vmem:[%s7635_s9 + $0x50] sm:$0x1] }
  0x28   : > { %6947 = vmatprep.mubr.msk.bf16.mxu0 %vm347_vm1, %v6118_v0  ;;  %v2505_v21 = vsel %vm7682_vm4, %v2500_v9, %v2504_v50  ;;  %v2528_v23 = vrot.slane %v2526_v13, 5  ;;  %v2540_v24 = vshll.u32 %v6079_v63, 16  ;;  %v2514_v27 = vrot.slane %v2513_v18, 4  ;;  %v7433_v56 = vld [vmem:[%s7635_s9 + $0x60] sm:$0xff]   ;;  %v6088_v13 = vld [vmem:[%s7635_s9 + $0x58] sm:$0xf] }
  0x29   : > { %v6119_v26 = vcombine.low %v2495_v17, %v2505_v21  ;;  %v2533_v28 = vrot.slane %v2531_v19, 4  ;;  %v2536_v29 = vrot.slane %v2534_v20, 5  ;;  %v2524_v31 = vrot.slane %v2523_v22, 4  ;;  %v6089_v21 = vld [vmem:[%s7635_s9 + $0x5c] sm:$0x1]  ;;  %s7474_s20 = scalar_lea.vmem %s8940_s10, 2048 }
  0x2a   : > { %v2542_v32 = vrot.slane %v2540_v24, 5  ;;  %v2544_v33 = vshrl.u32 %v6079_v63, 16  ;;  %v2550_v34 = vshll.u32 %v6080_v5, 16  ;;  %v2519_v35 = vsel %vm7682_vm4, %v2514_v27, %v2518_v10  ;;  %v6087_v5 = vld [vmem:[%s7635_s9 + $0x54] sm:$0xf]  ;;  %p7475_p11 = scmp.ne.s32.totalorder %s8940_s10, %s7474_s20  ;;  %p7482_p1 = scmp.lt.s32.totalorder %s7480_s26, %s7474_s20 }
  0x2b   : > { %6948 = vmatmul.mubr.msk.bf16.vlgmr.msra.gmra.mrb[0].mxu0 %vm347_vm1, %v6119_v26  ;;  %v2537_v36 = vor.u32 %v2536_v29, %v2533_v28  ;;  %v2555_v38 = vshrl.u32 %v6081_v25, 16  ;;  %v2558_v39 = vshll.u32 %v6081_v25, 16  ;;  %v2529_v41 = vsel %vm7682_vm4, %v2524_v31, %v2528_v23  ;;  %v6090_v22 = vld [vmem:[%s7635_s9 + $0x60] sm:$0xf]  ;;  %v6091_v27 = vld [vmem:[%s7635_s9 + $0x64] sm:$0xf] }
  0x2c   : > { %6820 = vmatmul.mubr.msk.bf16.gmra.mrb[8].mxu1 %vm347_vm1, %v7430_v60  ;;  %6980 = vmatpush3.bf16.msra.mxu0 %v7654_v12  ;;  %v2546_v42 = vrot.slane %v2544_v33, 4  ;;  %v2552_v44 = vrot.slane %v2550_v34, 5  ;;  %v2564_v45 = vshll.u32 %v6082_v30, 16  ;;  %v6120_v47 = vcombine.low %v2519_v35, %v2529_v41  ;;  %p7476_p12 = pnand %p7475_p11, %p7599_p5  ;;  %p7483_p2 = por %p7482_p1, %p7481_p0 }
  0x2d   : > { %6823 = vmatprep.mubr.msk.bf16.mxu1 %vm347_vm1, %v7431_v7  ;;  %v2538_v48 = vrot.slane %v2537_v36, 4  ;;  %v2557_v50 = vrot.slane %v2555_v38, 4  ;;  %v2560_v51 = vrot.slane %v2558_v39, 5  ;;  %7380 = vmatprep.subr.msk.bf16.mxu0 %vm396_vm0, %v7640_v6  ;;  %v2568_v12 = vshrl.u32 %v6082_v30, 16  ;;  %v7434_v30 = vld [vmem:[%s7635_s9 + $0x6c] sm:$0xff]   ;;  %v7435_v38 = vld [vmem:[%s7635_s9 + $0x78] sm:$0xff]  }
  0x2e   : > { %v2547_v53 = vor.u32 %v2546_v42, %v2542_v32  ;;  %v2566_v54 = vrot.slane %v2564_v45, 5  ;;  %v2574_v55 = vshll.u32 %v6083_v37, 16  ;;  %6951 = vmatprep.mubr.msk.bf16.mxu0 %vm347_vm1, %v6120_v47  ;;  %v2579_v59 = vshrl.u32 %v6084_v40, 16  ;;  %v6092_v37 = vld [vmem:[%s7635_s9 + $0x68] sm:$0x1]  ;;  %p7477_p13 = pneg %p7476_p12 }
  0x2f   : > { %v2543_v57 = vsel %vm7682_vm4, %v2538_v48, %v2542_v32  ;;  %v2561_v58 = vor.u32 %v2560_v51, %v2557_v50  ;;  %v2582_v60 = vshll.u32 %v6084_v40, 16  ;;  %v2570_v62 = vrot.slane %v2568_v12, 4 }
  0x30   : > { %v2548_v61 = vrot.slane %v2547_v53, 4  ;;  %v2576_v63 = vrot.slane %v2574_v55, 5  ;;  %v2588_v0 = vshll.u32 %v6085_v46, 16  ;;  %v2581_v1 = vrot.slane %v2579_v59, 4  ;;  %v6154_v59 = vld [vmem:[%s7635_s9 + $0x1c] sm:$0xf]  ;;  %p7484_p3 = pnand %p7483_p2, %p7477_p13 }
  0x31   : > { %v2562_v6 = vrot.slane %v2561_v58, 4  ;;  %v2584_v2 = vrot.slane %v2582_v60, 5  ;;  %v2592_v3 = vshrl.u32 %v6085_v46, 16  ;;  %v2571_v9 = vor.u32 %v2570_v62, %v2566_v54  ;;  %v6153_v58 = vld [vmem:[%s7635_s9 + $0x18] sm:$0xe] }
  0x32   : > { %v2553_v7 = vsel %vm7682_vm4, %v2548_v61, %v2552_v44  ;;  %v2590_v10 = vrot.slane %v2588_v0, 5  ;;  %v2598_v11 = vshll.u32 %v6086_v52, 16  ;;  %v2603_v25 = vshrl.u32 %v6087_v5, 16  ;;  %v6150_v44 = vld [vmem:[%s7635_s9 + $0xc] sm:$0xe] }
  0x33   : > { %v6121_v17 = vcombine.low %v2543_v57, %v2553_v7  ;;  %v2567_v18 = vsel %vm7682_vm4, %v2562_v6, %v2566_v54  ;;  %v2585_v19 = vor.u32 %v2584_v2, %v2581_v1  ;;  %v2594_v20 = vrot.slane %v2592_v3, 4  ;;  %v6152_v54 = vld [vmem:[%s7635_s9 + $0x14] sm:$0x1]  ;;  %v6155_v6 = vld [vmem:[%s7635_s9 + $0x20] sm:$0x1]  ;;  %v7436_v3 = vld [vmem:[%s7635_s9 + $0x84] sm:$0xff]  }
  0x34   : > { %6824 = vmatmul.mubr.msk.bf16.gmra.mrb[12].mxu1 %vm347_vm1, %v7432_v49  ;;  %v2572_v23 = vrot.slane %v2571_v9, 4  ;;  %v2600_v24 = vrot.slane %v2598_v11, 5  ;;  %v2606_v26 = vshll.u32 %v6087_v5, 16  ;;  %v2612_v31 = vshll.u32 %v6088_v13, 16  ;;  %v6151_v49 = vld [vmem:[%s7635_s9 + $0x10] sm:$0xf] }
  0x35   : > { %6827 = vmatprep.mubr.msk.bf16.mxu1 %vm347_vm1, %v7433_v56  ;;  %6952 = vmatmul.mubr.msk.bf16.gmra.mrb[4].mxu0 %vm347_vm1, %v6121_v17  ;;  %v2586_v28 = vrot.slane %v2585_v19, 4  ;;  %v2595_v29 = vor.u32 %v2594_v20, %v2590_v10  ;;  %v2616_v32 = vshrl.u32 %v6088_v13, 16  ;;  %v2605_v34 = vrot.slane %v2603_v25, 4 }
  0x36   : > { %v2577_v33 = vsel %vm7682_vm4, %v2572_v23, %v2576_v63  ;;  %v2608_v35 = vrot.slane %v2606_v26, 5  ;;  %v2622_v36 = vshll.u32 %v6089_v21, 16  ;;  %v2614_v42 = vrot.slane %v2612_v31, 5  ;;  %v6156_v21 = vld [vmem:[%s7635_s9 + $0x24] sm:$0xe]  ;;  %v7437_v26 = vld [vmem:[%s7635_s9 + $0x90] sm:$0xff]  }
  0x37   : > { %v6122_v39 = vcombine.low %v2567_v18, %v2577_v33  ;;  %v2591_v40 = vsel %vm7682_vm4, %v2586_v28, %v2590_v10  ;;  %v2596_v41 = vrot.slane %v2595_v29, 4  ;;  %v2618_v46 = vrot.slane %v2616_v32, 4 }
  0x38   : > { %v2609_v45 = vor.u32 %v2608_v35, %v2605_v34  ;;  %v2624_v47 = vrot.slane %v2622_v36, 5  ;;  %v2627_v48 = vshrl.u32 %v6090_v22, 16  ;;  %v2630_v51 = vshll.u32 %v6090_v22, 16  ;;  %v6159_v36 = vld [vmem:[%s7635_s9 + $0x30] sm:$0xe] }
  0x39   : > { %6955 = vmatprep.mubr.msk.bf16.mxu0 %vm347_vm1, %v6122_v39  ;;  %v2601_v50 = vsel %vm7682_vm4, %v2596_v41, %v2600_v24  ;;  %v2636_v52 = vshll.u32 %v6091_v27, 16  ;;  %v2640_v53 = vshrl.u32 %v6091_v27, 16  ;;  %v2619_v56 = vor.u32 %v2618_v46, %v2614_v42  ;;  %v6157_v27 = vld [vmem:[%s7635_s9 + $0x28] sm:$0xf] }
  0x3a   : > { %v6123_v12 = vcombine.low %v2591_v40, %v2601_v50  ;;  %v2610_v55 = vrot.slane %v2609_v45, 4  ;;  %v2629_v57 = vrot.slane %v2627_v48, 4  ;;  %v2632_v60 = vrot.slane %v2630_v51, 5  ;;  %v6162_v50 = vld [vmem:[%s7635_s9 + $0x3c] sm:$0xe] }
  0x3b   : > { %v2638_v61 = vrot.slane %v2636_v52, 5  ;;  %v2642_v62 = vrot.slane %v2640_v53, 4  ;;  %v2646_v63 = vshll.u32 %v6092_v37, 16  ;;  %v2620_v2 = vrot.slane %v2619_v56, 4  ;;  %v6160_v37 = vld [vmem:[%s7635_s9 + $0x34] sm:$0xf] }
  0x3c   : > { %6828 = vmatmul.mubr.msk.bf16.gmra.mrb[16].mxu1 %vm347_vm1, %v7434_v30  ;;  %v2615_v1 = vsel %vm7682_vm4, %v2610_v55, %v2614_v42  ;;  %v6198_v5 = vrot.slane %v6150_v44, 9  ;;  %v3298_v7 = vrot.slane %v6151_v49, 5  ;;  %v2633_v9 = vor.u32 %v2632_v60, %v2629_v57  ;;  %v6158_v30 = vld [vmem:[%s7635_s9 + $0x2c] sm:$0x1]  ;;  %v6163_v51 = vld [vmem:[%s7635_s9 + $0x40] sm:$0xf] }
  0x3d   : > { %6831 = vmatprep.mubr.msk.bf16.mxu1 %vm347_vm1, %v7435_v38  ;;  %6956 = vmatmul.mubr.msk.bf16.gmra.mrb[8].mxu0 %vm347_vm1, %v6123_v12  ;;  %v2643_v10 = vor.u32 %v2642_v62, %v2638_v61  ;;  %v2648_v11 = vrot.slane %v2646_v63, 5  ;;  %v3301_v13 = vrot.slane %v6152_v54, 5  ;;  %v2625_v17 = vsel %vm7682_vm4, %v2620_v2, %v2624_v47  ;;  %v6161_v38 = vld [vmem:[%s7635_s9 + $0x38] sm:$0x1]  ;;  %v7438_v52 = vld [vmem:[%s7635_s9 + $0x9c] sm:$0xff]  }
  0x3e   : > { %v3299_v18 = vsel %vm7757_vm7, %v6198_v5, %v3298_v7  ;;  %v3300_v19 = vrot.slane %v3298_v7, 4  ;;  %v6199_v20 = vrot.slane %v6153_v58, 9  ;;  %v6124_v22 = vcombine.low %v2615_v1, %v2625_v17  ;;  %v6164_v55 = vld [vmem:[%s7635_s9 + $0x44] sm:$0x1]  ;;  %v6165_v56 = vld [vmem:[%s7635_s9 + $0x48] sm:$0xe] }
  0x3f   : > { %v2634_v23 = vrot.slane %v2633_v9, 4  ;;  %v2644_v24 = vrot.slane %v2643_v10, 4  ;;  %v3305_v25 = vrot.slane %v6154_v59, 5  ;;  %v3308_v29 = vrot.slane %v6155_v6, 5  ;;  %v7439_v58 = vld [vmem:[%s7635_s9 + $0xa8] sm:$0xff]  }
  0x40   : > { %v3302_v28 = vsel %vm7757_vm7, %v3300_v19, %v3301_v13  ;;  %v6200_v31 = vrot.slane %v6156_v21, 9  ;;  %v3312_v32 = vrot.slane %v6157_v27, 5  ;;  %6959 = vmatprep.mubr.msk.bf16.mxu0 %vm347_vm1, %v6124_v22  ;;  %v3315_v44 = vrot.slane %v6158_v30, 5  ;;  %v6166_v62 = vld [vmem:[%s7635_s9 + $0x4c] sm:$0xf] }
  0x41   : > { %v2639_v33 = vsel %vm7682_vm4, %v2634_v23, %v2638_v61  ;;  %v2649_v34 = vsel %vm7682_vm4, %v2644_v24, %v2648_v11  ;;  %v6215_v35 = vcombine.low %v3299_v18, %v3302_v28  ;;  %v3306_v40 = vsel %vm7757_vm7, %v6199_v20, %v3305_v25  ;;  %v6167_v1 = vld [vmem:[%s7635_s9 + $0x50] sm:$0x1]  ;;  %v625_v5 = vld [vmem:[%s7635_s9] sm:$0xf]  ;;  %v626_v13 = vld [vmem:[%s7635_s9 + $0x4] sm:$0xf] }
  0x42   : > { %v6125_v39 = vcombine.low %v2639_v33, %v2649_v34  ;;  %v3307_v41 = vrot.slane %v3305_v25, 4  ;;  %v3314_v42 = vrot.slane %v3312_v32, 4  ;;  %v6201_v45 = vrot.slane %v6159_v36, 9  ;;  %v627_v17 = vld [vmem:[%s7635_s9 + $0x8] sm:$0x1] }
  0x43   : > { %v3319_v46 = vrot.slane %v6160_v37, 5  ;;  %v3322_v47 = vrot.slane %v6161_v38, 5  ;;  %v3313_v49 = vsel %vm7757_vm7, %v6200_v31, %v3312_v32  ;;  %v6202_v59 = vrot.slane %v6162_v50, 9  ;;  %v628_v22 = vld [vmem:[%s7635_s9 + $0xc] sm:$0xf] }
  0x44   : > { %6832 = vmatmul.mubr.msk.bf16.gmra.mrb[20].mxu1 %vm347_vm1, %v7436_v3  ;;  %v3309_v48 = vsel %vm7757_vm7, %v3307_v41, %v3308_v29  ;;  %v3316_v53 = vsel %vm7757_vm7, %v3314_v42, %v3315_v44  ;;  %v3326_v60 = vrot.slane %v6163_v51, 5  ;;  %v3329_v61 = vrot.slane %v6164_v55, 5  ;;  %v629_v27 = vld [vmem:[%s7635_s9 + $0x10] sm:$0xf]  ;;  %v630_v32 = vld [vmem:[%s7635_s9 + $0x14] sm:$0x1] }
  0x45   : > { %6835 = vmatprep.mubr.msk.bf16.mxu1 %vm347_vm1, %v7437_v26  ;;  %6960 = vmatmul.mubr.msk.bf16.gmra.mrb[12].mxu0 %vm347_vm1, %v6125_v39  ;;  %v7800_v54 = vsel %vm7757_vm7, %v6201_v45, %v3319_v46  ;;  %v3321_v12 = vrot.slane %v3319_v46, 4  ;;  %v6216_v57 = vcombine.low %v3306_v40, %v3309_v48  ;;  %v6217_v63 = vcombine.low %v3313_v49, %v3316_v53  ;;  %v6168_v33 = vld [vmem:[%s7635_s9 + $0x54] sm:$0xe]  ;;  %v6169_v38 = vld [vmem:[%s7635_s9 + $0x58] sm:$0xf] }
  0x46   : > { %6981 = vmatprep.mubr.msk.bf16.mxu0 %vm347_vm1, %v6215_v35  ;;  %v6203_v2 = vrot.slane %v6165_v56, 9  ;;  %v3333_v3 = vrot.slane %v6166_v62, 5  ;;  %v7817_v9 = vsel %vm7757_vm7, %v6202_v59, %v3326_v60  ;;  %v3328_v10 = vrot.slane %v3326_v60, 4  ;;  %v6170_v44 = vld [vmem:[%s7635_s9 + $0x5c] sm:$0x1]  ;;  %v7440_v45 = vld [vmem:[%s7635_s9 + $0xb4] sm:$0xff]  }
  0x47   : > { %v7809_v6 = vsel %vm7757_vm7, %v3321_v12, %v3322_v47  ;;  %v3336_v11 = vrot.slane %v6167_v1, 5  ;;  %v677_v20 = vshrl.u32 %v625_v5, 16  ;;  %v680_v21 = vshll.u32 %v625_v5, 16  ;;  %v6171_v50 = vld [vmem:[%s7635_s9 + $0x60] sm:$0xe] }
  0x48   : > { %v6218_v7 = vcombine.low %v7800_v54, %v7809_v6  ;;  %v7823_v18 = vsel %vm7757_vm7, %v6203_v2, %v3333_v3  ;;  %v3335_v19 = vrot.slane %v3333_v3, 4  ;;  %v7829_v23 = vsel %vm7757_vm7, %v3328_v10, %v3329_v61  ;;  %v6172_v55 = vld [vmem:[%s7635_s9 + $0x64] sm:$0xf]  ;;  %v6173_v59 = vld [vmem:[%s7635_s9 + $0x68] sm:$0x1] }
  0x49   : > { %v686_v24 = vshll.u32 %v626_v13, 16  ;;  %v690_v25 = vshrl.u32 %v626_v13, 16  ;;  %v696_v26 = vshll.u32 %v627_v17, 16  ;;  %v6219_v28 = vcombine.low %v7817_v9, %v7829_v23  ;;  %v631_v1 = vld [vmem:[%s7635_s9 + $0x18] sm:$0xf] }
  0x4a   : > { %v7837_v29 = vsel %vm7757_vm7, %v3335_v19, %v3336_v11  ;;  %v679_v30 = vrot.slane %v677_v20, 4  ;;  %v682_v31 = vrot.slane %v680_v21, 5  ;;  %v701_v40 = vshrl.u32 %v628_v22, 16  ;;  %v632_v19 = vld [vmem:[%s7635_s9 + $0x1c] sm:$0xf] }
  0x4b   : > { %v6220_v34 = vcombine.low %v7823_v18, %v7837_v29  ;;  %v688_v35 = vrot.slane %v686_v24, 5  ;;  %v692_v36 = vrot.slane %v690_v25, 4  ;;  %v698_v37 = vrot.slane %v696_v26, 5  ;;  %v636_v9 = vld [vmem:[%s7635_s9 + $0x2c] sm:$0x1] }
  0x4c   : > { %6836 = vmatmul.mubr.msk.bf16.gmra.mrb[24].mxu1 %vm347_vm1, %v7438_v52  ;;  %v683_v39 = vor.u32 %v682_v31, %v679_v30  ;;  %v704_v41 = vshll.u32 %v628_v22, 16  ;;  %v710_v42 = vshll.u32 %v629_v27, 16  ;;  %v714_v47 = vshrl.u32 %v629_v27, 16  ;;  %v633_v22 = vld [vmem:[%s7635_s9 + $0x20] sm:$0x1] }
  0x4d   : > { %6839 = vmatprep.mubr.msk.bf16.mxu1 %vm347_vm1, %v7439_v58  ;;  %6982 = vmatmul.mubr.msk.bf16.vlgmr.msra.gmra.mrb[0].mxu0 %vm347_vm1, %v6216_v57  ;;  %v693_v46 = vor.u32 %v692_v36, %v688_v35  ;;  %v720_v48 = vshll.u32 %v630_v32, 16  ;;  %v6204_v49 = vrot.slane %v6168_v33, 9  ;;  %v703_v52 = vrot.slane %v701_v40, 4  ;;  %v634_v32 = vld [vmem:[%s7635_s9 + $0x24] sm:$0xf] }
  0x4e   : > { %7014 = vmatpush3.bf16.msra.mxu0 %v7660_v14  ;;  %6985 = vmatprep.mubr.msk.bf16.mxu0 %vm347_vm1, %v6217_v63  ;;  %v684_v51 = vrot.slane %v683_v39, 4  ;;  %v706_v53 = vrot.slane %v704_v41, 5  ;;  %v712_v12 = vrot.slane %v710_v42, 5  ;;  %v716_v14 = vrot.slane %v714_v47, 4  ;;  %v6174_v23 = vld [vmem:[%s7635_s9 + $0x6c] sm:$0xe] }
  0x4f   : > { %7381 = vmatprep.subr.msk.bf16.mxu0 %vm396_vm0, %v7648_v8  ;;  %v694_v56 = vrot.slane %v693_v46, 4  ;;  %v722_v57 = vrot.slane %v720_v48, 5  ;;  %v3340_v58 = vrot.slane %v6169_v38, 5  ;;  %v3343_v62 = vrot.slane %v6170_v44, 5  ;;  %v6175_v44 = vld [vmem:[%s7635_s9 + $0x70] sm:$0xf] }
  0x50   : > { %v689_v60 = vsel %vm7682_vm4, %v684_v51, %v688_v35  ;;  %v707_v61 = vor.u32 %v706_v53, %v703_v52  ;;  %v6205_v63 = vrot.slane %v6171_v50, 9  ;;  %v717_v8 = vor.u32 %v716_v14, %v712_v12  ;;  %v635_v35 = vld [vmem:[%s7635_s9 + $0x28] sm:$0xf]  ;;  %v6177_v50 = vld [vmem:[%s7635_s9 + $0x78] sm:$0xe] }
  0x51   : > { %v699_v2 = vsel %vm7682_vm4, %v694_v56, %v698_v37  ;;  %v7862_v3 = vsel %vm7757_vm7, %v6204_v49, %v3340_v58  ;;  %v3342_v5 = vrot.slane %v3340_v58, 4  ;;  %v3347_v13 = vrot.slane %v6172_v55, 5  ;;  %v6178_v55 = vld [vmem:[%s7635_s9 + $0x7c] sm:$0xf] }
  0x52   : > { %v5923_v10 = vcombine.low %v689_v60, %v699_v2  ;;  %v708_v11 = vrot.slane %v707_v61, 4  ;;  %v3350_v17 = vrot.slane %v6173_v59, 5  ;;  %v718_v20 = vrot.slane %v717_v8, 4  ;;  %v6179_v59 = vld [vmem:[%s7635_s9 + $0x80] sm:$0x1] }
  0x53   : > { %v3344_v21 = vsel %vm7757_vm7, %v3342_v5, %v3343_v62  ;;  %v725_v24 = vshrl.u32 %v631_v1, 16  ;;  %v728_v25 = vshll.u32 %v631_v1, 16  ;;  %v7878_v30 = vsel %vm7757_vm7, %v6205_v63, %v3347_v13  ;;  %v637_v1 = vld [vmem:[%s7635_s9 + $0x30] sm:$0xf] }
  0x54   : > { %6840 = vmatmul.mubr.msk.bf16.gmra.mrb[28].mxu1 %vm347_vm1, %v7440_v45  ;;  %v713_v26 = vsel %vm7682_vm4, %v708_v11, %v712_v12  ;;  %v6221_v27 = vcombine.low %v7862_v3, %v3344_v21  ;;  %v3349_v31 = vrot.slane %v3347_v13, 4  ;;  %v723_v54 = vsel %vm7682_vm4, %v718_v20, %v722_v57  ;;  %v6176_v45 = vld [vmem:[%s7635_s9 + $0x74] sm:$0x1] }
  0x55   : > { %6986 = vmatmul.mubr.msk.bf16.gmra.mrb[4].mxu0 %vm347_vm1, %v6218_v7  ;;  %6845 = vmatprep.mubr.msk.bf16.mxu1 %vm347_vm1, %v5923_v10  ;;  %v727_v6 = vrot.slane %v725_v24, 4  ;;  %v730_v7 = vrot.slane %v728_v25, 5  ;;  %v734_v33 = vshll.u32 %v632_v19, 16  ;;  %v5924_v36 = vcombine.low %v713_v26, %v723_v54  ;;  %v639_v25 = vld [vmem:[%s7635_s9 + $0x38] sm:$0x1] }
  0x56   : > { %6989 = vmatprep.mubr.msk.bf16.mxu0 %vm347_vm1, %v6219_v28  ;;  %v7890_v37 = vsel %vm7757_vm7, %v3349_v31, %v3350_v17  ;;  %v738_v38 = vshrl.u32 %v632_v19, 16  ;;  %v744_v39 = vshll.u32 %v633_v22, 16  ;;  %v749_v42 = vshrl.u32 %v634_v32, 16  ;;  %v640_v26 = vld [vmem:[%s7635_s9 + $0x3c] sm:$0xf] }
  0x57   : > { %v6222_v28 = vcombine.low %v7878_v30, %v7890_v37  ;;  %v731_v40 = vor.u32 %v730_v7, %v727_v6  ;;  %v736_v41 = vrot.slane %v734_v33, 5  ;;  %v752_v48 = vshll.u32 %v634_v32, 16 }
  0x58   : > { %v740_v46 = vrot.slane %v738_v38, 4  ;;  %v746_v47 = vrot.slane %v744_v39, 5  ;;  %v758_v49 = vshll.u32 %v635_v35, 16  ;;  %v751_v52 = vrot.slane %v749_v42, 4 }
  0x59   : > { %v732_v51 = vrot.slane %v731_v40, 4  ;;  %v762_v53 = vshrl.u32 %v635_v35, 16  ;;  %v768_v12 = vshll.u32 %v636_v9, 16  ;;  %v754_v14 = vrot.slane %v752_v48, 5 }
  0x5a   : > { %v741_v56 = vor.u32 %v740_v46, %v736_v41  ;;  %v760_v57 = vrot.slane %v758_v49, 5  ;;  %v6206_v58 = vrot.slane %v6174_v23, 9  ;;  %v3354_v63 = vrot.slane %v6175_v44, 5  ;;  %v642_v23 = vld [vmem:[%s7635_s9 + $0x44] sm:$0x1] }
  0x5b   : > { %v737_v60 = vsel %vm7682_vm4, %v732_v51, %v736_v41  ;;  %v764_v61 = vrot.slane %v762_v53, 4  ;;  %v770_v62 = vrot.slane %v768_v12, 5  ;;  %v755_v8 = vor.u32 %v754_v14, %v751_v52  ;;  %v6180_v41 = vld [vmem:[%s7635_s9 + $0x84] sm:$0xe] }
  0x5c   : > { %6846 = vmatmul.mubr.msk.bf16.vlgmr.msra.gmra.mrb[0].mxu1 %vm347_vm1, %v5924_v36  ;;  %v742_v2 = vrot.slane %v741_v56, 4  ;;  %v3357_v3 = vrot.slane %v6176_v45, 5  ;;  %v6207_v5 = vrot.slane %v6177_v50, 9  ;;  %v3355_v10 = vsel %vm7757_vm7, %v6206_v58, %v3354_v63  ;;  %v641_v36 = vld [vmem:[%s7635_s9 + $0x40] sm:$0xf] }
  0x5d   : > { %6878 = vmatpush3.bf16.msra.mxu1 %v7664_v15  ;;  %6990 = vmatmul.mubr.msk.bf16.gmra.mrb[8].mxu0 %vm347_vm1, %v6220_v34  ;;  %v765_v15 = vor.u32 %v764_v61, %v760_v57  ;;  %v3356_v11 = vrot.slane %v3354_v63, 4  ;;  %v3361_v13 = vrot.slane %v6178_v55, 5  ;;  %v756_v18 = vrot.slane %v755_v8, 4  ;;  %v638_v34 = vld [vmem:[%s7635_s9 + $0x34] sm:$0xf] }
  0x5e   : > { %6993 = vmatprep.mubr.msk.bf16.mxu0 %vm347_vm1, %v6221_v27  ;;  %v747_v17 = vsel %vm7682_vm4, %v742_v2, %v746_v47  ;;  %v3364_v29 = vrot.slane %v6179_v59, 5  ;;  %v773_v19 = vshrl.u32 %v637_v1, 16  ;;  %v776_v7 = vshll.u32 %v637_v1, 16  ;;  %v6181_v47 = vld [vmem:[%s7635_s9 + $0x88] sm:$0xf] }
  0x5f   : > { %v5925_v20 = vcombine.low %v737_v60, %v747_v17  ;;  %v766_v21 = vrot.slane %v765_v15, 4  ;;  %v3358_v22 = vsel %vm7757_vm7, %v3356_v11, %v3357_v3  ;;  %v7920_v24 = vsel %vm7757_vm7, %v6207_v5, %v3361_v13  ;;  %v6182_v56 = vld [vmem:[%s7635_s9 + $0x8c] sm:$0x1]  ;;  %v6185_v3 = vld [vmem:[%s7635_s9 + $0x98] sm:$0x1] }
  0x60   : > { %v761_v27 = vsel %vm7682_vm4, %v756_v18, %v760_v57  ;;  %v6223_v31 = vcombine.low %v3355_v10, %v3358_v22  ;;  %v3363_v32 = vrot.slane %v3361_v13, 4  ;;  %v775_v54 = vrot.slane %v773_v19, 4  ;;  %v6183_v57 = vld [vmem:[%s7635_s9 + $0x90] sm:$0xe]  ;;  %v643_v5 = vld [vmem:[%s7635_s9 + $0x48] sm:$0xf] }
  0x61   : > { %6849 = vmatprep.mubr.msk.bf16.mxu1 %vm347_vm1, %v5925_v20  ;;  %v771_v6 = vsel %vm7682_vm4, %v766_v21, %v770_v62  ;;  %v782_v33 = vshll.u32 %v638_v34, 16  ;;  %v786_v35 = vshrl.u32 %v638_v34, 16  ;;  %v792_v9 = vshll.u32 %v639_v25, 16  ;;  %v6184_v62 = vld [vmem:[%s7635_s9 + $0x94] sm:$0xf] }
  0x62   : > { %v5926_v38 = vcombine.low %v761_v27, %v771_v6  ;;  %v3365_v39 = vsel %vm7757_vm7, %v3363_v32, %v3364_v29  ;;  %v797_v40 = vshrl.u32 %v640_v26, 16  ;;  %v778_v44 = vrot.slane %v776_v7, 5  ;;  %v644_v19 = vld [vmem:[%s7635_s9 + $0x4c] sm:$0xf] }
  0x63   : > { %v6224_v42 = vcombine.low %v7920_v24, %v3365_v39  ;;  %v784_v45 = vrot.slane %v782_v33, 5  ;;  %v788_v46 = vrot.slane %v786_v35, 4  ;;  %v794_v48 = vrot.slane %v792_v9, 5  ;;  %v645_v24 = vld [vmem:[%s7635_s9 + $0x50] sm:$0x1] }
  0x64   : > { %6850 = vmatmul.mubr.msk.bf16.gmra.mrb[4].mxu1 %vm347_vm1, %v5926_v38  ;;  %v799_v49 = vrot.slane %v797_v40, 4  ;;  %v800_v50 = vshll.u32 %v640_v26, 16  ;;  %v806_v51 = vshll.u32 %v641_v36, 16  ;;  %v779_v52 = vor.u32 %v778_v44, %v775_v54  ;;  %v646_v54 = vld [vmem:[%s7635_s9 + $0x54] sm:$0xf] }
  0x65   : > { %6994 = vmatmul.mubr.msk.bf16.gmra.mrb[12].mxu0 %vm347_vm1, %v6222_v28  ;;  %v789_v53 = vor.u32 %v788_v46, %v784_v45  ;;  %v810_v12 = vshrl.u32 %v641_v36, 16  ;;  %v816_v55 = vshll.u32 %v642_v23, 16  ;;  %v6208_v28 = vrot.slane %v6180_v41, 9  ;;  %v647_v36 = vld [vmem:[%s7635_s9 + $0x58] sm:$0xf] }
  0x66   : > { %6997 = vmatprep.mubr.msk.bf16.mxu0 %vm347_vm1, %v6223_v31  ;;  %v802_v30 = vrot.slane %v800_v50, 5  ;;  %v808_v37 = vrot.slane %v806_v51, 5  ;;  %v3368_v14 = vrot.slane %v6181_v47, 5  ;;  %v780_v58 = vrot.slane %v779_v52, 4  ;;  %v648_v40 = vld [vmem:[%s7635_s9 + $0x5c] sm:$0x1] }
  0x67   : > { %v790_v59 = vrot.slane %v789_v53, 4  ;;  %v812_v60 = vrot.slane %v810_v12, 4  ;;  %v818_v61 = vrot.slane %v816_v55, 5  ;;  %v3371_v8 = vrot.slane %v6182_v56, 5  ;;  %v6186_v41 = vld [vmem:[%s7635_s9 + $0x9c] sm:$0xe] }
  0x68   : > { %v803_v63 = vor.u32 %v802_v30, %v799_v49  ;;  %v3369_v1 = vsel %vm7757_vm7, %v6208_v28, %v3368_v14  ;;  %v3370_v2 = vrot.slane %v3368_v14, 4  ;;  %v785_v15 = vsel %vm7682_vm4, %v780_v58, %v784_v45  ;;  %v6187_v47 = vld [vmem:[%s7635_s9 + $0xa0] sm:$0xf]  ;;  %v6188_v52 = vld [vmem:[%s7635_s9 + $0xa4] sm:$0x1] }
  0x69   : > { %v795_v10 = vsel %vm7682_vm4, %v790_v59, %v794_v48  ;;  %v813_v11 = vor.u32 %v812_v60, %v808_v37  ;;  %v6209_v13 = vrot.slane %v6183_v57, 9  ;;  %v3375_v34 = vrot.slane %v6184_v62, 5  ;;  %v6189_v30 = vld [vmem:[%s7635_s9 + $0xa8] sm:$0xe]  ;;  %v6190_v58 = vld [vmem:[%s7635_s9 + $0xac] sm:$0xf] }
  0x6a   : > { %v5927_v17 = vcombine.low %v785_v15, %v795_v10  ;;  %v804_v18 = vrot.slane %v803_v63, 4  ;;  %v3372_v29 = vsel %vm7757_vm7, %v3370_v2, %v3371_v8  ;;  %v3378_v22 = vrot.slane %v6185_v3, 5  ;;  %v6191_v63 = vld [vmem:[%s7635_s9 + $0xb0] sm:$0x1]  ;;  %v650_v15 = vld [vmem:[%s7635_s9 + $0x64] sm:$0xf] }
  0x6b   : > { %v814_v20 = vrot.slane %v813_v11, 4  ;;  %v6225_v21 = vcombine.low %v3369_v1, %v3372_v29  ;;  %v821_v25 = vshrl.u32 %v643_v5, 16  ;;  %v3376_v27 = vsel %vm7757_vm7, %v6209_v13, %v3375_v34 }
  0x6c   : > { %6853 = vmatprep.mubr.msk.bf16.mxu1 %vm347_vm1, %v5927_v17  ;;  %v809_v26 = vsel %vm7682_vm4, %v804_v18, %v808_v37  ;;  %v3377_v31 = vrot.slane %v3375_v34, 4  ;;  %v824_v32 = vshll.u32 %v643_v5, 16  ;;  %v830_v33 = vshll.u32 %v644_v19, 16  ;;  %v649_v5 = vld [vmem:[%s7635_s9 + $0x60] sm:$0xf] }
  0x6d   : > { %6998 = vmatmul.mubr.msk.bf16.gmra.mrb[16].mxu0 %vm347_vm1, %v6224_v42  ;;  %v819_v6 = vsel %vm7682_vm4, %v814_v20, %v818_v61  ;;  %v823_v7 = vrot.slane %v821_v25, 4  ;;  %v834_v35 = vshrl.u32 %v644_v19, 16  ;;  %v840_v23 = vshll.u32 %v645_v24, 16  ;;  %v651_v18 = vld [vmem:[%s7635_s9 + $0x68] sm:$0x1] }
  0x6e   : > { %7001 = vmatprep.mubr.msk.bf16.mxu0 %vm347_vm1, %v6225_v21  ;;  %v5928_v38 = vcombine.low %v809_v26, %v819_v6  ;;  %v3379_v39 = vsel %vm7757_vm7, %v3377_v31, %v3378_v22  ;;  %v826_v9 = vrot.slane %v824_v32, 5  ;;  %v832_v44 = vrot.slane %v830_v33, 5  ;;  %v652_v21 = vld [vmem:[%s7635_s9 + $0x6c] sm:$0xf]  ;;  %v653_v6 = vld [vmem:[%s7635_s9 + $0x70] sm:$0xf] }
  0x6f   : > { %v6226_v42 = vcombine.low %v3376_v27, %v3379_v39  ;;  %v836_v45 = vrot.slane %v834_v35, 4  ;;  %v845_v46 = vshrl.u32 %v646_v54, 16  ;;  %v842_v49 = vrot.slane %v840_v23, 5 }
  0x70   : > { %6854 = vmatmul.mubr.msk.bf16.gmra.mrb[8].mxu1 %vm347_vm1, %v5928_v38  ;;  %v827_v48 = vor.u32 %v826_v9, %v823_v7  ;;  %v848_v50 = vshll.u32 %v646_v54, 16  ;;  %v854_v51 = vshll.u32 %v647_v36, 16  ;;  %v858_v55 = vshrl.u32 %v647_v36, 16  ;;  %v654_v38 = vld [vmem:[%s7635_s9 + $0x74] sm:$0x1] }
  0x71   : > { %v837_v53 = vor.u32 %v836_v45, %v832_v44  ;;  %v847_v12 = vrot.slane %v845_v46, 4  ;;  %v864_v56 = vshll.u32 %v648_v40, 16  ;;  %v6210_v57 = vrot.slane %v6186_v41, 9  ;;  %v6192_v41 = vld [vmem:[%s7635_s9 + $0xb4] sm:$0xe] }
  0x72   : > { %v828_v37 = vrot.slane %v827_v48, 4  ;;  %v850_v28 = vrot.slane %v848_v50, 5  ;;  %v856_v14 = vrot.slane %v854_v51, 5  ;;  %v860_v60 = vrot.slane %v858_v55, 4  ;;  %v6194_v48 = vld [vmem:[%s7635_s9 + $0xbc] sm:$0x1] }
  0x73   : > { %v838_v59 = vrot.slane %v837_v53, 4  ;;  %v866_v61 = vrot.slane %v864_v56, 5  ;;  %v3382_v62 = vrot.slane %v6187_v47, 5  ;;  %v3385_v8 = vrot.slane %v6188_v52, 5 }
  0x74   : > { %v833_v1 = vsel %vm7682_vm4, %v828_v37, %v832_v44  ;;  %v851_v2 = vor.u32 %v850_v28, %v847_v12  ;;  %v6211_v3 = vrot.slane %v6189_v30, 9  ;;  %v861_v11 = vor.u32 %v860_v60, %v856_v14  ;;  %v6196_v12 = vld [vmem:[%s7635_s9 + $0xc4] sm:$0xf]  ;;  %v6197_v28 = vld [vmem:[%s7635_s9 + $0xc8] sm:$0x1] }
  0x75   : > { %7002 = vmatmul.mubr.msk.bf16.gmra.mrb[20].mxu0 %vm347_vm1, %v6226_v42  ;;  %v843_v10 = vsel %vm7682_vm4, %v838_v59, %v842_v49  ;;  %v3383_v13 = vsel %vm7757_vm7, %v6210_v57, %v3382_v62  ;;  %v3384_v17 = vrot.slane %v3382_v62, 4  ;;  %v3389_v19 = vrot.slane %v6190_v58, 5  ;;  %v6193_v42 = vld [vmem:[%s7635_s9 + $0xb8] sm:$0xf]  ;;  %v6195_v49 = vld [vmem:[%s7635_s9 + $0xc0] sm:$0xe] }
  0x76   : > { %v5929_v29 = vcombine.low %v833_v1, %v843_v10  ;;  %v852_v34 = vrot.slane %v851_v2, 4  ;;  %v3392_v20 = vrot.slane %v6191_v63, 5  ;;  %v862_v22 = vrot.slane %v861_v11, 4 }
  0x77   : > { %v3386_v24 = vsel %vm7757_vm7, %v3384_v17, %v3385_v8  ;;  %v869_v25 = vshrl.u32 %v649_v5, 16  ;;  %v872_v26 = vshll.u32 %v649_v5, 16  ;;  %v3390_v32 = vsel %vm7757_vm7, %v6211_v3, %v3389_v19  ;;  %v656_v17 = vld [vmem:[%s7635_s9 + $0x7c] sm:$0xf] }
  0x78   : > { %6857 = vmatprep.mubr.msk.bf16.mxu1 %vm347_vm1, %v5929_v29  ;;  %v857_v27 = vsel %vm7682_vm4, %v852_v34, %v856_v14  ;;  %v6227_v31 = vcombine.low %v3383_v13, %v3386_v24  ;;  %v3391_v54 = vrot.slane %v3389_v19, 4  ;;  %v867_v7 = vsel %vm7682_vm4, %v862_v22, %v866_v61  ;;  %v655_v14 = vld [vmem:[%s7635_s9 + $0x78] sm:$0xf]  ;;  %v657_v19 = vld [vmem:[%s7635_s9 + $0x80] sm:$0x1] }
  0x79   : > { %v871_v33 = vrot.slane %v869_v25, 4  ;;  %v874_v35 = vrot.slane %v872_v26, 5  ;;  %v878_v36 = vshll.u32 %v650_v15, 16  ;;  %v5930_v39 = vcombine.low %v857_v27, %v867_v7  ;;  %v658_v26 = vld [vmem:[%s7635_s9 + $0x84] sm:$0xf] }
  0x7a   : > { %7005 = vmatprep.mubr.msk.bf16.mxu0 %vm347_vm1, %v6227_v31  ;;  %v3393_v9 = vsel %vm7757_vm7, %v3391_v54, %v3392_v20  ;;  %v882_v23 = vshrl.u32 %v650_v15, 16  ;;  %v888_v40 = vshll.u32 %v651_v18, 16  ;;  %v893_v47 = vshrl.u32 %v652_v21, 16  ;;  %v659_v27 = vld [vmem:[%s7635_s9 + $0x88] sm:$0xf] }
  0x7b   : > { %v6228_v44 = vcombine.low %v3390_v32, %v3393_v9  ;;  %v875_v45 = vor.u32 %v874_v35, %v871_v33  ;;  %v880_v46 = vrot.slane %v878_v36, 5  ;;  %6858 = vmatmul.mubr.msk.bf16.gmra.mrb[12].mxu1 %vm347_vm1, %v5930_v39  ;;  %v896_v52 = vshll.u32 %v652_v21, 16 }
  0x7c   : > { %v884_v50 = vrot.slane %v882_v23, 4  ;;  %v890_v51 = vrot.slane %v888_v40, 5  ;;  %v902_v53 = vshll.u32 %v653_v6, 16  ;;  %v895_v56 = vrot.slane %v893_v47, 4  ;;  %v660_v40 = vld [vmem:[%s7635_s9 + $0x8c] sm:$0x1] }
  0x7d   : > { %7006 = vmatmul.mubr.msk.bf16.gmra.mrb[24].mxu0 %vm347_vm1, %v6228_v44  ;;  %v876_v55 = vrot.slane %v875_v45, 4  ;;  %v906_v30 = vshrl.u32 %v653_v6, 16  ;;  %v912_v37 = vshll.u32 %v654_v38, 16  ;;  %v898_v58 = vrot.slane %v896_v52, 5  ;;  %v7441_v38 = vld [vmem:[%s7635_s9 + $0x18] sm:$0xff]  }
  0x7e   : > { %v885_v57 = vor.u32 %v884_v50, %v880_v46  ;;  %v904_v59 = vrot.slane %v902_v53, 5  ;;  %v6212_v60 = vrot.slane %v6192_v41, 9  ;;  %v3396_v1 = vrot.slane %v6193_v42, 5  ;;  %v661_v47 = vld [vmem:[%s7635_s9 + $0x90] sm:$0xf] }
  0x7f   : > { %v881_v61 = vsel %vm7682_vm4, %v876_v55, %v880_v46  ;;  %v908_v62 = vrot.slane %v906_v30, 4  ;;  %v914_v63 = vrot.slane %v912_v37, 5  ;;  %v899_v8 = vor.u32 %v898_v58, %v895_v56  ;;  %v662_v56 = vld [vmem:[%s7635_s9 + $0x94] sm:$0xf]  ;;  %v664_v58 = vld [vmem:[%s7635_s9 + $0x9c] sm:$0xf] }
  0x80   : > { %v886_v2 = vrot.slane %v885_v57, 4  ;;  %v3399_v3 = vrot.slane %v6194_v48, 5  ;;  %v6213_v5 = vrot.slane %v6195_v49, 9  ;;  %v3397_v10 = vsel %vm7757_vm7, %v6212_v60, %v3396_v1 }
  0x81   : > { %v909_v15 = vor.u32 %v908_v62, %v904_v59  ;;  %v3398_v11 = vrot.slane %v3396_v1, 4  ;;  %v3403_v13 = vrot.slane %v6196_v12, 5  ;;  %v900_v29 = vrot.slane %v899_v8, 4 }
  0x82   : > { %v891_v18 = vsel %vm7682_vm4, %v886_v2, %v890_v51  ;;  %v3406_v34 = vrot.slane %v6197_v28, 5  ;;  %v917_v20 = vshrl.u32 %v655_v14, 16  ;;  %v920_v33 = vshll.u32 %v655_v14, 16  ;;  %v663_v28 = vld [vmem:[%s7635_s9 + $0x98] sm:$0x1] }
  0x83   : > { %v5931_v21 = vcombine.low %v881_v61, %v891_v18  ;;  %v910_v22 = vrot.slane %v909_v15, 4  ;;  %v3400_v24 = vsel %vm7757_vm7, %v3398_v11, %v3399_v3  ;;  %v3404_v25 = vsel %vm7757_vm7, %v6213_v5, %v3403_v13  ;;  %v7442_v11 = vld [vmem:[%s7635_s9 + $0x24] sm:$0xff]  }
  0x84   : > { %v905_v31 = vsel %vm7682_vm4, %v900_v29, %v904_v59  ;;  %v6229_v32 = vcombine.low %v3397_v10, %v3400_v24  ;;  %v3405_v54 = vrot.slane %v3403_v13, 4  ;;  %v919_v6 = vrot.slane %v917_v20, 4  ;;  %v666_v24 = vld [vmem:[%s7635_s9 + $0xa4] sm:$0x1] }
  0x85   : > { %6861 = vmatprep.mubr.msk.bf16.mxu1 %vm347_vm1, %v5931_v21  ;;  %v915_v7 = vsel %vm7682_vm4, %v910_v22, %v914_v63  ;;  %v926_v35 = vshll.u32 %v656_v17, 16  ;;  %v930_v36 = vshrl.u32 %v656_v17, 16  ;;  %v936_v23 = vshll.u32 %v657_v19, 16  ;;  %v665_v63 = vld [vmem:[%s7635_s9 + $0xa0] sm:$0xf]  ;;  %v7443_v19 = vld [vmem:[%s7635_s9 + $0x30] sm:$0xff]  }
  0x86   : > { %v5932_v39 = vcombine.low %v905_v31, %v915_v7  ;;  %7009 = vmatprep.mubr.msk.bf16.mxu0 %vm347_vm1, %v6229_v32  ;;  %v3407_v9 = vsel %vm7757_vm7, %v3405_v54, %v3406_v34  ;;  %v941_v41 = vshrl.u32 %v658_v26, 16  ;;  %v922_v44 = vrot.slane %v920_v33, 5  ;;  %v667_v54 = vld [vmem:[%s7635_s9 + $0xa8] sm:$0xf] }
  0x87   : > { %v6230_v42 = vcombine.low %v3404_v25, %v3407_v9  ;;  %v928_v45 = vrot.slane %v926_v35, 5  ;;  %v932_v46 = vrot.slane %v930_v36, 4  ;;  %v938_v48 = vrot.slane %v936_v23, 5  ;;  %v668_v36 = vld [vmem:[%s7635_s9 + $0xac] sm:$0xf] }
  0x88   : > { %6862 = vmatmul.mubr.msk.bf16.gmra.mrb[16].mxu1 %vm347_vm1, %v5932_v39  ;;  %v943_v49 = vrot.slane %v941_v41, 4  ;;  %v944_v50 = vshll.u32 %v658_v26, 16  ;;  %v950_v51 = vshll.u32 %v659_v27, 16  ;;  %v923_v52 = vor.u32 %v922_v44, %v919_v6  ;;  %v670_v41 = vld [vmem:[%s7635_s9 + $0xb4] sm:$0xf] }
  0x89   : > { %7010 = vmatmul.mubr.msk.bf16.gmra.mrb[28].mxu0 %vm347_vm1, %v6230_v42  ;;  %v933_v53 = vor.u32 %v932_v46, %v928_v45  ;;  %v954_v12 = vshrl.u32 %v659_v27, 16  ;;  %v960_v55 = vshll.u32 %v660_v40, 16  ;;  %v965_v14 = vshrl.u32 %v661_v47, 16  ;;  %v669_v40 = vld [vmem:[%s7635_s9 + $0xb0] sm:$0x1] }
  0x8a   : > { %v946_v30 = vrot.slane %v944_v50, 5  ;;  %v952_v37 = vrot.slane %v950_v51, 5  ;;  %7015 = vmatprep.mubr.msk.bf16.mxu0 %vm347_vm1, %v7441_v38  ;;  %v968_v57 = vshll.u32 %v661_v47, 16  ;;  %v924_v59 = vrot.slane %v923_v52, 4  ;;  %v8068_v42 = vld [vmem:[%s8988_s1 + $0x6] sm:$0x3] }
  0x8b   : > { %v934_v60 = vrot.slane %v933_v53, 4  ;;  %v956_v61 = vrot.slane %v954_v12, 4  ;;  %v962_v62 = vrot.slane %v960_v55, 5  ;;  %v967_v2 = vrot.slane %v965_v14, 4  ;;  %7376 = vmatprep.subr.msk.bf16.mxu1 %vm396_vm0, %v8068_v42  ;;  %v7444_v55 = vld [vmem:[%s7635_s9 + $0x3c] sm:$0xff]  }
  0x8c   : > { %v947_v1 = vor.u32 %v946_v30, %v943_v49  ;;  %v970_v8 = vrot.slane %v968_v57, 5  ;;  %v974_v3 = vshll.u32 %v662_v56, 16  ;;  %v929_v5 = vsel %vm7682_vm4, %v924_v59, %v928_v45  ;;  %v672_v57 = vld [vmem:[%s7635_s9 + $0xbc] sm:$0x1] }
  0x8d   : > { %v939_v15 = vsel %vm7682_vm4, %v934_v60, %v938_v48  ;;  %v957_v10 = vor.u32 %v956_v61, %v952_v37  ;;  %v978_v13 = vshrl.u32 %v662_v56, 16  ;;  %v984_v22 = vshll.u32 %v663_v28, 16 }
  0x8e   : > { %v5933_v17 = vcombine.low %v929_v5, %v939_v15  ;;  %v948_v18 = vrot.slane %v947_v1, 4  ;;  %v971_v29 = vor.u32 %v970_v8, %v967_v2  ;;  %v976_v34 = vrot.slane %v974_v3, 5  ;;  %v1419_v5 = vld [vmem:[%s7635_s9 + $0x4] sm:$0xf]  ;;  %v1420_v15 = vld [vmem:[%s7635_s9 + $0x8] sm:$0x1] }
  0x8f   : > { %v958_v20 = vrot.slane %v957_v10, 4  ;;  %v980_v21 = vrot.slane %v978_v13, 4  ;;  %v989_v25 = vshrl.u32 %v664_v58, 16  ;;  %v992_v31 = vshll.u32 %v664_v58, 16  ;;  %v7445_v58 = vld [vmem:[%s7635_s9 + $0x48] sm:$0xff]  }
  0x90   : > { %6865 = vmatprep.mubr.msk.bf16.mxu1 %vm347_vm1, %v5933_v17  ;;  %v953_v26 = vsel %vm7682_vm4, %v948_v18, %v952_v37  ;;  %v972_v27 = vrot.slane %v971_v29, 4  ;;  %v998_v32 = vshll.u32 %v665_v63, 16  ;;  %v986_v33 = vrot.slane %v984_v22, 5  ;;  %v1421_v18 = vld [vmem:[%s7635_s9 + $0xc] sm:$0xe] }
  0x91   : > { %v963_v6 = vsel %vm7682_vm4, %v958_v20, %v962_v62  ;;  %7016 = vmatmul.mubr.msk.bf16.vlgmr.msra.gmra.mrb[0].mxu0 %vm347_vm1, %v7442_v11  ;;  %v981_v7 = vor.u32 %v980_v21, %v976_v34  ;;  %v991_v35 = vrot.slane %v989_v25, 4  ;;  %v994_v9 = vrot.slane %v992_v31, 5  ;;  %v1422_v21 = vld [vmem:[%s7635_s9 + $0x10] sm:$0xf]  ;;  %v1423_v22 = vld [vmem:[%s7635_s9 + $0x14] sm:$0x1] }
  0x92   : > { %v5934_v38 = vcombine.low %v953_v26, %v963_v6  ;;  %7048 = vmatpush3.bf16.msra.mxu0 %v7668_v16  ;;  %v977_v39 = vsel %vm7682_vm4, %v972_v27, %v976_v34  ;;  %v1000_v23 = vrot.slane %v998_v32, 5  ;;  %7019 = vmatprep.mubr.msk.bf16.mxu0 %vm347_vm1, %v7443_v19  ;;  %v1002_v45 = vshrl.u32 %v665_v63, 16  ;;  %v671_v16 = vld [vmem:[%s7635_s9 + $0xb8] sm:$0xf]  ;;  %v1418_v63 = vld [vmem:[%s7635_s9] sm:$0xe] }
  0x93   : > { %v982_v44 = vrot.slane %v981_v7, 4  ;;  %v1008_v46 = vshll.u32 %v666_v24, 16  ;;  %v1013_v47 = vshrl.u32 %v667_v54, 16  ;;  %v995_v48 = vor.u32 %v994_v9, %v991_v35  ;;  %v1424_v31 = vld [vmem:[%s7635_s9 + $0x18] sm:$0xe] }
  0x94   : > { %6866 = vmatmul.mubr.msk.bf16.gmra.mrb[20].mxu1 %vm347_vm1, %v5934_v38  ;;  %v1016_v49 = vshll.u32 %v667_v54, 16  ;;  %v1022_v50 = vshll.u32 %v668_v36, 16  ;;  %v1026_v51 = vshrl.u32 %v668_v36, 16  ;;  %v1004_v53 = vrot.slane %v1002_v45, 4  ;;  %v1425_v32 = vld [vmem:[%s7635_s9 + $0x1c] sm:$0xf] }
  0x95   : > { %v987_v52 = vsel %vm7682_vm4, %v982_v44, %v986_v33  ;;  %v1010_v12 = vrot.slane %v1008_v46, 5  ;;  %v1015_v56 = vrot.slane %v1013_v47, 4  ;;  %v996_v37 = vrot.slane %v995_v48, 4  ;;  %v7446_v35 = vld [vmem:[%s7635_s9 + $0x54] sm:$0xff]   ;;  %v1426_v36 = vld [vmem:[%s7635_s9 + $0x20] sm:$0x1] }
  0x96   : > { %v5935_v30 = vcombine.low %v977_v39, %v987_v52  ;;  %v1018_v28 = vrot.slane %v1016_v49, 5  ;;  %v1024_v14 = vrot.slane %v1022_v50, 5  ;;  %v1005_v59 = vor.u32 %v1004_v53, %v1000_v23  ;;  %v1427_v47 = vld [vmem:[%s7635_s9 + $0x24] sm:$0xe]  ;;  %v1429_v52 = vld [vmem:[%s7635_s9 + $0x2c] sm:$0x1] }
  0x97   : > { %v1028_v60 = vrot.slane %v1026_v51, 4  ;;  %v1032_v61 = vshll.u32 %v669_v40, 16  ;;  %v1037_v62 = vshrl.u32 %v670_v41, 16  ;;  %v1001_v1 = vsel %vm7682_vm4, %v996_v37, %v1000_v23  ;;  %v7447_v40 = vld [vmem:[%s7635_s9 + $0x60] sm:$0xff]  }
  0x98   : > { %6869 = vmatprep.mubr.msk.bf16.mxu1 %vm347_vm1, %v5935_v30  ;;  %v1019_v2 = vor.u32 %v1018_v28, %v1015_v56  ;;  %v1040_v8 = vshll.u32 %v670_v41, 16  ;;  %v1046_v3 = vshll.u32 %v671_v16, 16  ;;  %v1006_v10 = vrot.slane %v1005_v59, 4  ;;  %v1430_v30 = vld [vmem:[%s7635_s9 + $0x30] sm:$0xe] }
  0x99   : > { %7020 = vmatmul.mubr.msk.bf16.gmra.mrb[4].mxu0 %vm347_vm1, %v7444_v55  ;;  %v1029_v11 = vor.u32 %v1028_v60, %v1024_v14  ;;  %v1034_v13 = vrot.slane %v1032_v61, 5  ;;  %v1039_v17 = vrot.slane %v1037_v62, 4  ;;  %v1050_v20 = vshrl.u32 %v671_v16, 16  ;;  %v1428_v16 = vld [vmem:[%s7635_s9 + $0x28] sm:$0xf] }
  0x9a   : > { %v1020_v29 = vrot.slane %v1019_v2, 4  ;;  %v1042_v34 = vrot.slane %v1040_v8, 5  ;;  %v1048_v19 = vrot.slane %v1046_v3, 5  ;;  %7023 = vmatprep.mubr.msk.bf16.mxu0 %vm347_vm1, %v7445_v58  ;;  %v1011_v24 = vsel %vm7682_vm4, %v1006_v10, %v1010_v12  ;;  %v1431_v58 = vld [vmem:[%s7635_s9 + $0x34] sm:$0xf]  ;;  %v7448_v10 = vld [vmem:[%s7635_s9 + $0x6c] sm:$0xff]  }
  0x9b   : > { %v1030_v25 = vrot.slane %v1029_v11, 4  ;;  %v1056_v26 = vshll.u32 %v672_v57, 16  ;;  %v5955_v27 = vrot.slane %v1418_v63, 9  ;;  %v5936_v54 = vcombine.low %v1001_v1, %v1011_v24  ;;  %v1432_v59 = vld [vmem:[%s7635_s9 + $0x38] sm:$0x1] }
  0x9c   : > { %v1025_v6 = vsel %vm7682_vm4, %v1020_v29, %v1024_v14  ;;  %v1043_v7 = vor.u32 %v1042_v34, %v1039_v17  ;;  %v1052_v33 = vrot.slane %v1050_v20, 4  ;;  %v1519_v9 = vrot.slane %v1419_v5, 5  ;;  %v1433_v60 = vld [vmem:[%s7635_s9 + $0x3c] sm:$0xe]  ;;  %v1434_v61 = vld [vmem:[%s7635_s9 + $0x40] sm:$0xf] }
  0x9d   : > { %v1035_v38 = vsel %vm7682_vm4, %v1030_v25, %v1034_v13  ;;  %v1058_v39 = vrot.slane %v1056_v26, 5  ;;  %v1522_v23 = vrot.slane %v1420_v15, 5  ;;  %6870 = vmatmul.mubr.msk.bf16.gmra.mrb[24].mxu1 %vm347_vm1, %v5936_v54  ;;  %v5956_v46 = vrot.slane %v1421_v18, 9  ;;  %v1435_v8 = vld [vmem:[%s7635_s9 + $0x44] sm:$0x1]  ;;  %v7449_v34 = vld [vmem:[%s7635_s9 + $0x78] sm:$0xff]  }
  0x9e   : > { %v5937_v41 = vcombine.low %v1025_v6, %v1035_v38  ;;  %v1044_v44 = vrot.slane %v1043_v7, 4  ;;  %v1053_v45 = vor.u32 %v1052_v33, %v1048_v19  ;;  %v1520_v48 = vsel %vm7757_vm7, %v5955_v27, %v1519_v9  ;;  %v1436_v3 = vld [vmem:[%s7635_s9 + $0x48] sm:$0xe]  ;;  %v1437_v20 = vld [vmem:[%s7635_s9 + $0x4c] sm:$0xf] }
  0x9f   : > { %v1521_v49 = vrot.slane %v1519_v9, 4  ;;  %v1526_v50 = vrot.slane %v1422_v21, 5  ;;  %v1529_v51 = vrot.slane %v1423_v22, 5  ;;  %v5957_v55 = vrot.slane %v1424_v31, 9  ;;  %v1438_v21 = vld [vmem:[%s7635_s9 + $0x50] sm:$0x1] }
  0xa0   : > { %6873 = vmatprep.mubr.msk.bf16.mxu1 %vm347_vm1, %v5937_v41  ;;  %v1049_v53 = vsel %vm7682_vm4, %v1044_v44, %v1048_v19  ;;  %v1054_v12 = vrot.slane %v1053_v45, 4  ;;  %v1533_v56 = vrot.slane %v1425_v32, 5  ;;  %v1536_v57 = vrot.slane %v1426_v36, 5  ;;  %v1439_v27 = vld [vmem:[%s7635_s9 + $0x54] sm:$0xe] }
  0xa1   : > { %7024 = vmatmul.mubr.msk.bf16.gmra.mrb[8].mxu0 %vm347_vm1, %v7446_v35  ;;  %v1523_v37 = vsel %vm7757_vm7, %v1521_v49, %v1522_v23  ;;  %v8116_v28 = vsel %vm7757_vm7, %v5956_v46, %v1526_v50  ;;  %v1528_v14 = vrot.slane %v1526_v50, 4  ;;  %v5958_v11 = vrot.slane %v1427_v47, 9  ;;  %v1440_v31 = vld [vmem:[%s7635_s9 + $0x58] sm:$0xf]  ;;  %v1441_v7 = vld [vmem:[%s7635_s9 + $0x5c] sm:$0x1] }
  0xa2   : > { %v1059_v62 = vsel %vm7682_vm4, %v1054_v12, %v1058_v39  ;;  %v5972_v63 = vcombine.low %v1520_v48, %v1523_v37  ;;  %7027 = vmatprep.mubr.msk.bf16.mxu0 %vm347_vm1, %v7447_v40  ;;  %v8127_v1 = vsel %vm7757_vm7, %v5957_v55, %v1533_v56  ;;  %v1535_v2 = vrot.slane %v1533_v56, 4  ;;  %v1442_v39 = vld [vmem:[%s7635_s9 + $0x60] sm:$0xe]  ;;  %v1443_v44 = vld [vmem:[%s7635_s9 + $0x64] sm:$0xf] }
  0xa3   : > { %v5938_v5 = vcombine.low %v1049_v53, %v1059_v62  ;;  %v8133_v15 = vsel %vm7757_vm7, %v1528_v14, %v1529_v51  ;;  %v1540_v13 = vrot.slane %v1428_v16, 5  ;;  %v1543_v29 = vrot.slane %v1429_v52, 5  ;;  %v1444_v45 = vld [vmem:[%s7635_s9 + $0x68] sm:$0x1]  ;;  %v1445_v46 = vld [vmem:[%s7635_s9 + $0x6c] sm:$0xe] }
  0xa4   : > { %v5973_v17 = vcombine.low %v8116_v28, %v8133_v15  ;;  %v8140_v18 = vsel %vm7757_vm7, %v1535_v2, %v1536_v57  ;;  %v8145_v19 = vsel %vm396_vm0, %v8068_v42, 0  ;;  %v5959_v26 = vrot.slane %v1430_v30, 9  ;;  %v1446_v47 = vld [vmem:[%s7635_s9 + $0x70] sm:$0xf]  ;;  %v1447_v51 = vld [vmem:[%s7635_s9 + $0x74] sm:$0x1] }
  0xa5   : > { %v5974_v22 = vcombine.low %v8127_v1, %v8140_v18  ;;  %v8153_v24 = vsel %vm7757_vm7, %v5958_v11, %v1540_v13  ;;  %v1542_v25 = vrot.slane %v1540_v13, 4  ;;  %6874 = vmatmul.mubr.msk.bf16.gmra.mrb[28].mxu1 %vm347_vm1, %v5938_v5  ;;  %v1547_v32 = vrot.slane %v1431_v58, 5  ;;  %v1448_v14 = vld [vmem:[%s7635_s9 + $0x78] sm:$0xe]  ;;  %v1449_v57 = vld [vmem:[%s7635_s9 + $0x7c] sm:$0xf] }
  0xa6   : > { %v1550_v42 = vrot.slane %v1432_v59, 5  ;;  %v5960_v54 = vrot.slane %v1433_v60, 9  ;;  %v1554_v6 = vrot.slane %v1434_v61, 5  ;;  %6879 = vmatprep.mubr.msk.bf16.mxu1 %vm347_vm1, %v5972_v63  ;;  %v1557_v35 = vrot.slane %v1435_v8, 5  ;;  %v7450_v58 = vld [vmem:[%s7635_s9 + $0x84] sm:$0xff]  }
  0xa7   : > { %v8162_v33 = vsel %vm7757_vm7, %v1542_v25, %v1543_v29  ;;  %v5961_v36 = vrot.slane %v1436_v3, 9  ;;  %v1561_v38 = vrot.slane %v1437_v20, 5  ;;  %v8169_v23 = vsel %vm7757_vm7, %v5959_v26, %v1547_v32  ;;  %v1450_v63 = vld [vmem:[%s7635_s9 + $0x80] sm:$0x1]  ;;  %v1451_v1 = vld [vmem:[%s7635_s9 + $0x84] sm:$0xe] }
  0xa8   : > { %v5975_v9 = vcombine.low %v8153_v24, %v8162_v33  ;;  %v1549_v40 = vrot.slane %v1547_v32, 4  ;;  %v8173_v41 = vsel %vm7757_vm7, %v5960_v54, %v1554_v6  ;;  %v1556_v16 = vrot.slane %v1554_v6, 4  ;;  %v1452_v15 = vld [vmem:[%s7635_s9 + $0x88] sm:$0xf]  ;;  %v6312_v26 = vld [vmem:[%s7635_s9 + $0x18] sm:$0xf] }
  0xa9   : > { %7028 = vmatmul.mubr.msk.bf16.gmra.mrb[12].mxu0 %vm347_vm1, %v7448_v10  ;;  %v8182_v48 = vsel %vm7757_vm7, %v5961_v36, %v1561_v38  ;;  %v1563_v49 = vrot.slane %v1561_v38, 4  ;;  %v1564_v50 = vrot.slane %v1438_v21, 5  ;;  %v5962_v53 = vrot.slane %v1439_v27, 9  ;;  %v7451_v10 = vld [vmem:[%s7635_s9 + $0x90] sm:$0xff]   ;;  %v6313_v32 = vld [vmem:[%s7635_s9 + $0x1c] sm:$0xf] }
  0xaa   : > { %7031 = vmatprep.mubr.msk.bf16.mxu0 %vm347_vm1, %v7449_v34  ;;  %v8188_v52 = vsel %vm7757_vm7, %v1549_v40, %v1550_v42  ;;  %v1568_v12 = vrot.slane %v1440_v31, 5  ;;  %v1571_v55 = vrot.slane %v1441_v7, 5  ;;  %v8194_v30 = vsel %vm7757_vm7, %v1556_v16, %v1557_v35  ;;  %v1453_v34 = vld [vmem:[%s7635_s9 + $0x8c] sm:$0x1]  ;;  %v7473_v42 = vld [vmem:[%s8988_s1 + $0x8] sm:$0x3] }
  0xab   : > { %v5976_v56 = vcombine.low %v8169_v23, %v8188_v52  ;;  %v8198_v37 = vsel %vm7757_vm7, %v1563_v49, %v1564_v50  ;;  %v5963_v28 = vrot.slane %v1442_v39, 9  ;;  %v5977_v59 = vcombine.low %v8173_v41, %v8194_v30  ;;  %v6457_v36 = vld [vmem:[%s8988_s1 + $0x10] sm:$0x3] }
  0xac   : > { %v5978_v60 = vcombine.low %v8182_v48, %v8198_v37  ;;  %v8209_v61 = vsel %vm7757_vm7, %v5962_v53, %v1568_v12  ;;  %v1570_v62 = vrot.slane %v1568_v12, 4  ;;  %v1575_v2 = vrot.slane %v1443_v44, 5  ;;  %v6314_v44 = vld [vmem:[%s7635_s9 + $0x20] sm:$0x1]  ;;  %7382 = vmatprep.subr.msk.bf16.mxu0 %vm396_vm0, %v6457_v36 }
  0xad   : > { %v1578_v8 = vrot.slane %v1444_v45, 5  ;;  %v5964_v3 = vrot.slane %v1445_v46, 9  ;;  %v1582_v5 = vrot.slane %v1446_v47, 5  ;;  %6880 = vmatmul.mubr.msk.bf16.vlgmr.msra.gmra.mrb[0].mxu1 %vm347_vm1, %v5973_v17  ;;  %v1585_v13 = vrot.slane %v1447_v51, 5  ;;  %v6315_v46 = vld [vmem:[%s7635_s9 + $0x24] sm:$0xf] }
  0xae   : > { %v8218_v11 = vsel %vm7757_vm7, %v1570_v62, %v1571_v55  ;;  %v5965_v18 = vrot.slane %v1448_v14, 9  ;;  %v1589_v29 = vrot.slane %v1449_v57, 5  ;;  %6883 = vmatprep.mubr.msk.bf16.mxu1 %vm347_vm1, %v5974_v22  ;;  %6912 = vmatpush3.bf16.msra.mxu1 %v8145_v19  ;;  %v8227_v17 = vsel %vm7757_vm7, %v5963_v28, %v1575_v2  ;;  %v6316_v28 = vld [vmem:[%s7635_s9 + $0x28] sm:$0xf]  ;;  %v7452_v14 = vld [vmem:[%s7635_s9 + $0x9c] sm:$0xff]  }
  0xaf   : > { %v5979_v20 = vcombine.low %v8209_v61, %v8218_v11  ;;  %v1577_v21 = vrot.slane %v1575_v2, 4  ;;  %v8231_v25 = vsel %vm7757_vm7, %v5964_v3, %v1582_v5  ;;  %v1584_v27 = vrot.slane %v1582_v5, 4  ;;  %7378 = vmatprep.subr.msk.bf16.mxu1 %vm396_vm0, %v7473_v42  ;;  %v6317_v62 = vld [vmem:[%s7635_s9 + $0x2c] sm:$0x1] }
  0xb0   : > { %v8236_v31 = vsel %vm7757_vm7, %v5965_v18, %v1589_v29  ;;  %v1591_v19 = vrot.slane %v1589_v29, 4  ;;  %v1592_v22 = vrot.slane %v1450_v63, 5  ;;  %v5966_v6 = vrot.slane %v1451_v1, 9  ;;  %v7453_v2 = vld [vmem:[%s7635_s9 + $0xa8] sm:$0xff]   ;;  %v1455_v18 = vld [vmem:[%s7635_s9 + $0x94] sm:$0xf] }
  0xb1   : > { %7032 = vmatmul.mubr.msk.bf16.gmra.mrb[16].mxu0 %vm347_vm1, %v7450_v58  ;;  %v8246_v54 = vsel %vm7757_vm7, %v1577_v21, %v1578_v8  ;;  %v1596_v7 = vrot.slane %v1452_v15, 5  ;;  %v1599_v35 = vrot.slane %v1453_v34, 5  ;;  %v8256_v39 = vsel %vm7757_vm7, %v1584_v27, %v1585_v13  ;;  %v1456_v27 = vld [vmem:[%s7635_s9 + $0x98] sm:$0x1] }
  0xb2   : > { %7035 = vmatprep.mubr.msk.bf16.mxu0 %vm347_vm1, %v7451_v10  ;;  %v5980_v38 = vcombine.low %v8227_v17, %v8246_v54  ;;  %v8260_v40 = vsel %vm7757_vm7, %v1591_v19, %v1592_v22  ;;  %v4238_v45 = vshrl.u32 %v6312_v26, 16  ;;  %v5981_v47 = vcombine.low %v8231_v25, %v8256_v39  ;;  %v1454_v10 = vld [vmem:[%s7635_s9 + $0x90] sm:$0xe]  ;;  %v1457_v19 = vld [vmem:[%s7635_s9 + $0x9c] sm:$0xe] }
  0xb3   : > { %v5982_v16 = vcombine.low %v8236_v31, %v8260_v40  ;;  %v8271_v49 = vsel %vm7757_vm7, %v5966_v6, %v1596_v7  ;;  %v1598_v50 = vrot.slane %v1596_v7, 4  ;;  %v4241_v53 = vshll.u32 %v6312_v26, 16  ;;  %v6325_v17 = vld [vmem:[%s7635_s9 + $0x4c] sm:$0xf]  ;;  %v6331_v39 = vld [vmem:[%s7635_s9 + $0x64] sm:$0xf] }
  0xb4   : > { %v4240_v51 = vrot.slane %v4238_v45, 4  ;;  %v4247_v12 = vshll.u32 %v6313_v32, 16  ;;  %v4251_v55 = vshrl.u32 %v6313_v32, 16  ;;  %v4257_v58 = vshll.u32 %v6314_v44, 16 }
  0xb5   : > { %v8277_v57 = vsel %vm7757_vm7, %v1598_v50, %v1599_v35  ;;  %v4262_v63 = vshrl.u32 %v6315_v46, 16  ;;  %v4265_v1 = vshll.u32 %v6315_v46, 16  ;;  %6884 = vmatmul.mubr.msk.bf16.gmra.mrb[4].mxu1 %vm347_vm1, %v5975_v9  ;;  %v4243_v3 = vrot.slane %v4241_v53, 5  ;;  %v1459_v50 = vld [vmem:[%s7635_s9 + $0xa4] sm:$0x1] }
  0xb6   : > { %v5983_v8 = vcombine.low %v8271_v49, %v8277_v57  ;;  %v4249_v5 = vrot.slane %v4247_v12, 5  ;;  %v4253_v15 = vrot.slane %v4251_v55, 4  ;;  %6887 = vmatprep.mubr.msk.bf16.mxu1 %vm347_vm1, %v5976_v56  ;;  %v4259_v13 = vrot.slane %v4257_v58, 5  ;;  %v1458_v56 = vld [vmem:[%s7635_s9 + $0xa0] sm:$0xf]  ;;  %v7454_v58 = vld [vmem:[%s7635_s9 + $0xb4] sm:$0xff]  }
  0xb7   : > { %v4264_v24 = vrot.slane %v4262_v63, 4  ;;  %v4267_v33 = vrot.slane %v4265_v1, 5  ;;  %v4271_v9 = vshll.u32 %v6316_v28, 16  ;;  %v4244_v29 = vor.u32 %v4243_v3, %v4240_v51  ;;  %v7455_v3 = vld [vmem:[%s7635_s9 + $0xc0] sm:$0xff]  }
  0xb8   : > { %v4254_v34 = vor.u32 %v4253_v15, %v4249_v5  ;;  %v4275_v21 = vshrl.u32 %v6316_v28, 16  ;;  %v4281_v26 = vshll.u32 %v6317_v62, 16  ;;  %v8297_v23 = vsel %vm396_vm0, %v6457_v36, 0  ;;  %v6318_v28 = vld [vmem:[%s7635_s9 + $0x30] sm:$0xf] }
  0xb9   : > { %7036 = vmatmul.mubr.msk.bf16.gmra.mrb[20].mxu0 %vm347_vm1, %v7452_v14  ;;  %v4268_v22 = vor.u32 %v4267_v33, %v4264_v24  ;;  %v4273_v32 = vrot.slane %v4271_v9, 5  ;;  %v5967_v52 = vrot.slane %v1454_v10, 9  ;;  %v4245_v42 = vrot.slane %v4244_v29, 4  ;;  %v6319_v14 = vld [vmem:[%s7635_s9 + $0x34] sm:$0xf] }
  0xba   : > { %7039 = vmatprep.mubr.msk.bf16.mxu0 %vm347_vm1, %v7453_v2  ;;  %v4255_v6 = vrot.slane %v4254_v34, 4  ;;  %v4277_v7 = vrot.slane %v4275_v21, 4  ;;  %v4283_v35 = vrot.slane %v4281_v26, 5  ;;  %v1603_v45 = vrot.slane %v1455_v18, 5  ;;  %v6320_v24 = vld [vmem:[%s7635_s9 + $0x38] sm:$0x1] }
  0xbb   : > { %v4269_v44 = vrot.slane %v4268_v22, 4  ;;  %v1606_v46 = vrot.slane %v1456_v27, 5  ;;  %v5968_v51 = vrot.slane %v1457_v19, 9  ;;  %v4250_v36 = vsel %vm7682_vm4, %v4245_v42, %v4249_v5  ;;  %v6321_v9 = vld [vmem:[%s7635_s9 + $0x3c] sm:$0xf] }
  0xbc   : > { %v4260_v53 = vsel %vm7682_vm4, %v4255_v6, %v4259_v13  ;;  %v4278_v12 = vor.u32 %v4277_v7, %v4273_v32  ;;  %v1610_v55 = vrot.slane %v1458_v56, 5  ;;  %v8315_v1 = vsel %vm7757_vm7, %v5967_v52, %v1603_v45  ;;  %v6323_v34 = vld [vmem:[%s7635_s9 + $0x44] sm:$0x1]  ;;  %v1460_v22 = vld [vmem:[%s7635_s9 + $0xa8] sm:$0xe] }
  0xbd   : > { %v8309_v62 = vcombine.low %v4250_v36, %v4260_v53  ;;  %v4274_v63 = vsel %vm7682_vm4, %v4269_v44, %v4273_v32  ;;  %v1605_v2 = vrot.slane %v1603_v45, 4  ;;  %6888 = vmatmul.mubr.msk.bf16.gmra.mrb[8].mxu1 %vm347_vm1, %v5977_v59  ;;  %v1613_v13 = vrot.slane %v1459_v50, 5  ;;  %v1461_v32 = vld [vmem:[%s7635_s9 + $0xac] sm:$0xf]  ;;  %v1462_v7 = vld [vmem:[%s7635_s9 + $0xb0] sm:$0x1] }
  0xbe   : > { %v4279_v5 = vrot.slane %v4278_v12, 4  ;;  %v8324_v15 = vsel %vm7757_vm7, %v5968_v51, %v1610_v55  ;;  %v1612_v10 = vrot.slane %v1610_v55, 4  ;;  %6891 = vmatprep.mubr.msk.bf16.mxu1 %vm347_vm1, %v5978_v60  ;;  %v4286_v30 = vshrl.u32 %v6318_v28, 16  ;;  %v6322_v60 = vld [vmem:[%s7635_s9 + $0x40] sm:$0xf]  ;;  %v7456_v51 = vld [vmem:[%s7635_s9 + $0xcc] sm:$0xff]  }
  0xbf   : > { %v8333_v41 = vsel %vm7757_vm7, %v1605_v2, %v1606_v46  ;;  %v4289_v59 = vshll.u32 %v6318_v28, 16  ;;  %v4295_v33 = vshll.u32 %v6319_v14, 16  ;;  %v4299_v37 = vshrl.u32 %v6319_v14, 16  ;;  %v1463_v50 = vld [vmem:[%s7635_s9 + $0xb4] sm:$0xe] }
  0xc0   : > { %v4284_v18 = vsel %vm7682_vm4, %v4279_v5, %v4283_v35  ;;  %v5984_v29 = vcombine.low %v8315_v1, %v8333_v41  ;;  %v8342_v48 = vsel %vm7757_vm7, %v1612_v10, %v1613_v13  ;;  %v4288_v27 = vrot.slane %v4286_v30, 4  ;;  %v1464_v28 = vld [vmem:[%s7635_s9 + $0xb8] sm:$0xf]  ;;  %v6324_v5 = vld [vmem:[%s7635_s9 + $0x48] sm:$0xf] }
  0xc1   : > { %7040 = vmatmul.mubr.msk.bf16.gmra.mrb[24].mxu0 %vm347_vm1, %v7454_v58  ;;  %v8347_v21 = vcombine.low %v4274_v63, %v4284_v18  ;;  %v5985_v26 = vcombine.low %v8324_v15, %v8342_v48  ;;  %v4291_v19 = vrot.slane %v4289_v59, 5  ;;  %v4297_v52 = vrot.slane %v4295_v33, 5 }
  0xc2   : > { %7043 = vmatprep.mubr.msk.bf16.mxu0 %vm347_vm1, %v7455_v3  ;;  %v4301_v56 = vrot.slane %v4299_v37, 4  ;;  %v4305_v42 = vshll.u32 %v6320_v24, 16  ;;  %v4310_v6 = vshrl.u32 %v6321_v9, 16  ;;  %v4313_v44 = vshll.u32 %v6321_v9, 16  ;;  %v1465_v3 = vld [vmem:[%s7635_s9 + $0xbc] sm:$0x1] }
  0xc3   : > { %v4292_v35 = vor.u32 %v4291_v19, %v4288_v27  ;;  %v4319_v45 = vshll.u32 %v6322_v60, 16  ;;  %v4323_v46 = vshrl.u32 %v6322_v60, 16  ;;  %v4329_v55 = vshll.u32 %v6323_v34, 16  ;;  %v6326_v27 = vld [vmem:[%s7635_s9 + $0x50] sm:$0x1] }
  0xc4   : > { %v4302_v36 = vor.u32 %v4301_v56, %v4297_v52  ;;  %v4307_v53 = vrot.slane %v4305_v42, 5  ;;  %v4312_v12 = vrot.slane %v4310_v6, 4  ;;  %v4315_v58 = vrot.slane %v4313_v44, 5  ;;  %v6327_v56 = vld [vmem:[%s7635_s9 + $0x54] sm:$0xf] }
  0xc5   : > { %v4293_v14 = vrot.slane %v4292_v35, 4  ;;  %v4321_v63 = vrot.slane %v4319_v45, 5  ;;  %v4325_v2 = vrot.slane %v4323_v46, 4  ;;  %6892 = vmatmul.mubr.msk.bf16.gmra.mrb[12].mxu1 %vm347_vm1, %v5979_v20  ;;  %v4331_v13 = vrot.slane %v4329_v55, 5  ;;  %v6328_v35 = vld [vmem:[%s7635_s9 + $0x58] sm:$0xf] }
  0xc6   : > { %v4303_v10 = vrot.slane %v4302_v36, 4  ;;  %v5969_v24 = vrot.slane %v1460_v22, 9  ;;  %v1617_v30 = vrot.slane %v1461_v32, 5  ;;  %6895 = vmatprep.mubr.msk.bf16.mxu1 %vm347_vm1, %v5980_v38  ;;  %v4316_v33 = vor.u32 %v4315_v58, %v4312_v12  ;;  %v6330_v36 = vld [vmem:[%s7635_s9 + $0x60] sm:$0xf] }
  0xc7   : > { %v4298_v59 = vsel %vm7682_vm4, %v4293_v14, %v4297_v52  ;;  %v4326_v9 = vor.u32 %v4325_v2, %v4321_v63  ;;  %v1620_v18 = vrot.slane %v1462_v7, 5  ;;  %v5970_v37 = vrot.slane %v1463_v50, 9 }
  0xc8   : > { %v4308_v61 = vsel %vm7682_vm4, %v4303_v10, %v4307_v53  ;;  %v8374_v11 = vsel %vm7757_vm7, %v5969_v24, %v1617_v30  ;;  %v1619_v20 = vrot.slane %v1617_v30, 4  ;;  %v4317_v38 = vrot.slane %v4316_v33, 4 }
  0xc9   : > { %7044 = vmatmul.mubr.msk.bf16.gmra.mrb[28].mxu0 %vm347_vm1, %v7456_v51  ;;  %v6363_v54 = vcombine.low %v4298_v59, %v4308_v61  ;;  %v4327_v60 = vrot.slane %v4326_v9, 4  ;;  %v1624_v34 = vrot.slane %v1464_v28, 5  ;;  %v1627_v22 = vrot.slane %v1465_v3, 5  ;;  %v6329_v51 = vld [vmem:[%s7635_s9 + $0x5c] sm:$0x1] }
  0xca   : > { %7049 = vmatprep.mubr.msk.bf16.mxu0 %vm347_vm1, %v8309_v62  ;;  %v8383_v19 = vsel %vm7757_vm7, %v1619_v20, %v1620_v18  ;;  %v4334_v32 = vshrl.u32 %v6324_v5, 16  ;;  %v4337_v52 = vshll.u32 %v6324_v5, 16  ;;  %v4322_v42 = vsel %vm7682_vm4, %v4317_v38, %v4321_v63  ;;  %v6332_v18 = vld [vmem:[%s7635_s9 + $0x68] sm:$0x1] }
  0xcb   : > { %v4332_v6 = vsel %vm7682_vm4, %v4327_v60, %v4331_v13  ;;  %v5986_v7 = vcombine.low %v8374_v11, %v8383_v19  ;;  %v8394_v62 = vsel %vm7757_vm7, %v5970_v37, %v1624_v34  ;;  %v1626_v45 = vrot.slane %v1624_v34, 4  ;;  %v6333_v37 = vld [vmem:[%s7635_s9 + $0x6c] sm:$0xf]  ;;  %v6334_v34 = vld [vmem:[%s7635_s9 + $0x70] sm:$0xf] }
  0xcc   : > { %v8397_v44 = vcombine.low %v4322_v42, %v4332_v6  ;;  %v4336_v46 = vrot.slane %v4334_v32, 4  ;;  %v4339_v50 = vrot.slane %v4337_v52, 5  ;;  %v4343_v53 = vshll.u32 %v6325_v17, 16 }
  0xcd   : > { %v4347_v12 = vshrl.u32 %v6325_v17, 16  ;;  %v4353_v55 = vshll.u32 %v6326_v27, 16  ;;  %v4358_v28 = vshrl.u32 %v6327_v56, 16  ;;  %6896 = vmatmul.mubr.msk.bf16.gmra.mrb[16].mxu1 %vm347_vm1, %v5981_v47  ;;  %v8407_v14 = vsel %vm7757_vm7, %v1626_v45, %v1627_v22 }
  0xce   : > { %v4340_v58 = vor.u32 %v4339_v50, %v4336_v46  ;;  %v4361_v63 = vshll.u32 %v6327_v56, 16  ;;  %v4367_v2 = vshll.u32 %v6328_v35, 16  ;;  %6899 = vmatprep.mubr.msk.bf16.mxu1 %vm347_vm1, %v5982_v16  ;;  %v5987_v3 = vcombine.low %v8394_v62, %v8407_v14 }
  0xcf   : > { %v4345_v5 = vrot.slane %v4343_v53, 5  ;;  %v4349_v10 = vrot.slane %v4347_v12, 4  ;;  %v4355_v25 = vrot.slane %v4353_v55, 5  ;;  %v4360_v13 = vrot.slane %v4358_v28, 4 }
  0xd0   : > { %v4341_v47 = vrot.slane %v4340_v58, 4  ;;  %v4363_v24 = vrot.slane %v4361_v63, 5  ;;  %v4369_v30 = vrot.slane %v4367_v2, 5  ;;  %v4371_v31 = vshrl.u32 %v6328_v35, 16 }
  0xd1   : > { %7050 = vmatmul.mubr.msk.bf16.vlgmr.msra.gmra.mrb[0].mxu0 %vm347_vm1, %v8347_v21  ;;  %v4350_v59 = vor.u32 %v4349_v10, %v4345_v5  ;;  %v4377_v40 = vshll.u32 %v6329_v51, 16  ;;  %v4382_v16 = vshrl.u32 %v6330_v36, 16  ;;  %v4385_v61 = vshll.u32 %v6330_v36, 16  ;;  %v6336_v51 = vld [vmem:[%s7635_s9 + $0x78] sm:$0xf] }
  0xd2   : > { %7082 = vmatpush3.bf16.msra.mxu0 %v8297_v23  ;;  %7053 = vmatprep.mubr.msk.bf16.mxu0 %vm347_vm1, %v6363_v54  ;;  %v4346_v33 = vsel %vm7682_vm4, %v4341_v47, %v4345_v5  ;;  %v4364_v9 = vor.u32 %v4363_v24, %v4360_v13  ;;  %v4391_v20 = vshll.u32 %v6331_v39, 16  ;;  %v4373_v21 = vrot.slane %v4371_v31, 4  ;;  %v6335_v54 = vld [vmem:[%s7635_s9 + $0x74] sm:$0x1]  ;;  %v6339_v47 = vld [vmem:[%s7635_s9 + $0x84] sm:$0xf] }
  0xd3   : > { %v4351_v17 = vrot.slane %v4350_v59, 4  ;;  %v4379_v38 = vrot.slane %v4377_v40, 5  ;;  %v4384_v60 = vrot.slane %v4382_v16, 4  ;;  %v4387_v22 = vrot.slane %v4385_v61, 5  ;;  %v6340_v59 = vld [vmem:[%s7635_s9 + $0x88] sm:$0xf] }
  0xd4   : > { %v4365_v27 = vrot.slane %v4364_v9, 4  ;;  %v4393_v23 = vrot.slane %v4391_v20, 5  ;;  %v4395_v32 = vshrl.u32 %v6331_v39, 16  ;;  %v4374_v56 = vor.u32 %v4373_v21, %v4369_v30  ;;  %v6338_v39 = vld [vmem:[%s7635_s9 + $0x80] sm:$0x1] }
  0xd5   : > { %v4356_v52 = vsel %vm7682_vm4, %v4351_v17, %v4355_v25  ;;  %v4401_v42 = vshll.u32 %v6332_v18, 16  ;;  %v4406_v6 = vshrl.u32 %v6333_v37, 16  ;;  %6900 = vmatmul.mubr.msk.bf16.gmra.mrb[20].mxu1 %vm347_vm1, %v5983_v8  ;;  %v4388_v46 = vor.u32 %v4387_v22, %v4384_v60 }
  0xd6   : > { %v6365_v35 = vcombine.low %v4346_v33, %v4356_v52  ;;  %v4370_v45 = vsel %vm7682_vm4, %v4365_v27, %v4369_v30  ;;  %v4397_v50 = vrot.slane %v4395_v32, 4  ;;  %6903 = vmatprep.mubr.msk.bf16.mxu1 %vm347_vm1, %v5984_v29  ;;  %v4375_v36 = vrot.slane %v4374_v56, 4  ;;  %v6337_v29 = vld [vmem:[%s7635_s9 + $0x7c] sm:$0xf]  ;;  %v6343_v52 = vld [vmem:[%s7635_s9 + $0x94] sm:$0xf] }
  0xd7   : > { %v4403_v53 = vrot.slane %v4401_v42, 5  ;;  %v4408_v12 = vrot.slane %v4406_v6, 4  ;;  %v4409_v55 = vshll.u32 %v6333_v37, 16  ;;  %v4389_v49 = vrot.slane %v4388_v46, 4  ;;  %v6344_v42 = vld [vmem:[%s7635_s9 + $0x98] sm:$0x1] }
  0xd8   : > { %v4398_v57 = vor.u32 %v4397_v50, %v4393_v23  ;;  %v4415_v8 = vshll.u32 %v6334_v34, 16  ;;  %v4419_v28 = vshrl.u32 %v6334_v34, 16  ;;  %v4380_v58 = vsel %vm7682_vm4, %v4375_v36, %v4379_v38  ;;  %v6341_v38 = vld [vmem:[%s7635_s9 + $0x8c] sm:$0x1]  ;;  %v6345_v50 = vld [vmem:[%s7635_s9 + $0x9c] sm:$0xf] }
  0xd9   : > { %7054 = vmatmul.mubr.msk.bf16.gmra.mrb[4].mxu0 %vm347_vm1, %v8397_v44  ;;  %v4411_v1 = vrot.slane %v4409_v55, 5  ;;  %v4425_v41 = vshll.u32 %v6335_v54, 16  ;;  %v4430_v63 = vshrl.u32 %v6336_v51, 16  ;;  %v6366_v2 = vcombine.low %v4370_v45, %v4380_v58  ;;  %v6342_v54 = vld [vmem:[%s7635_s9 + $0x90] sm:$0xf] }
  0xda   : > { %7057 = vmatprep.mubr.msk.bf16.mxu0 %vm347_vm1, %v6365_v35  ;;  %v4394_v5 = vsel %vm7682_vm4, %v4389_v49, %v4393_v23  ;;  %v4399_v10 = vrot.slane %v4398_v57, 4  ;;  %v4417_v25 = vrot.slane %v4415_v8, 5  ;;  %v4421_v44 = vrot.slane %v4419_v28, 4 }
  0xdb   : > { %v4412_v13 = vor.u32 %v4411_v1, %v4408_v12  ;;  %v4427_v24 = vrot.slane %v4425_v41, 5  ;;  %v4432_v30 = vrot.slane %v4430_v63, 4  ;;  %v4433_v40 = vshll.u32 %v6336_v51, 16  ;;  %v7457_v51 = vld [vmem:[%s7635_s9 + $0xc] sm:$0xff]   ;;  %v6346_v63 = vld [vmem:[%s7635_s9 + $0xa0] sm:$0xf] }
  0xdc   : > { %v4404_v31 = vsel %vm7682_vm4, %v4399_v10, %v4403_v53  ;;  %v4439_v16 = vshll.u32 %v6337_v29, 16  ;;  %v4443_v33 = vshrl.u32 %v6337_v29, 16  ;;  %v4422_v61 = vor.u32 %v4421_v44, %v4417_v25 }
  0xdd   : > { %v6367_v9 = vcombine.low %v4394_v5, %v4404_v31  ;;  %v4413_v18 = vrot.slane %v4412_v13, 4  ;;  %v4449_v20 = vshll.u32 %v6338_v39, 16  ;;  %6904 = vmatmul.mubr.msk.bf16.gmra.mrb[24].mxu1 %vm347_vm1, %v5985_v26  ;;  %v4435_v37 = vrot.slane %v4433_v40, 5  ;;  %v6347_v13 = vld [vmem:[%s7635_s9 + $0xa4] sm:$0x1]  ;;  %v7458_v31 = vld [vmem:[%s7635_s9 + $0x18] sm:$0xff]  }
  0xde   : > { %v4441_v17 = vrot.slane %v4439_v16, 5  ;;  %v4445_v21 = vrot.slane %v4443_v33, 4  ;;  %v4454_v60 = vshrl.u32 %v6339_v47, 16  ;;  %6907 = vmatprep.mubr.msk.bf16.mxu1 %vm347_vm1, %v5986_v7  ;;  %v4423_v27 = vrot.slane %v4422_v61, 4 }
  0xdf   : > { %v4418_v34 = vsel %vm7682_vm4, %v4413_v18, %v4417_v25  ;;  %v4451_v15 = vrot.slane %v4449_v20, 5  ;;  %v4457_v48 = vshll.u32 %v6339_v47, 16  ;;  %v4436_v22 = vor.u32 %v4435_v37, %v4432_v30  ;;  %v6349_v18 = vld [vmem:[%s7635_s9 + $0xac] sm:$0xf] }
  0xe0   : > { %v4446_v26 = vor.u32 %v4445_v21, %v4441_v17  ;;  %v4456_v23 = vrot.slane %v4454_v60, 4  ;;  %v4463_v32 = vshll.u32 %v6340_v59, 16  ;;  %v4428_v11 = vsel %vm7682_vm4, %v4423_v27, %v4427_v24  ;;  %v6350_v21 = vld [vmem:[%s7635_s9 + $0xb0] sm:$0x1] }
  0xe1   : > { %7058 = vmatmul.mubr.msk.bf16.gmra.mrb[8].mxu0 %vm347_vm1, %v6366_v2  ;;  %v4459_v19 = vrot.slane %v4457_v48, 5  ;;  %v4467_v7 = vshrl.u32 %v6340_v59, 16  ;;  %v4473_v56 = vshll.u32 %v6341_v38, 16  ;;  %v6368_v6 = vcombine.low %v4418_v34, %v4428_v11  ;;  %v6348_v59 = vld [vmem:[%s7635_s9 + $0xa8] sm:$0xf] }
  0xe2   : > { %7061 = vmatprep.mubr.msk.bf16.mxu0 %vm347_vm1, %v6367_v9  ;;  %v4437_v35 = vrot.slane %v4436_v22, 4  ;;  %v4447_v45 = vrot.slane %v4446_v26, 4  ;;  %v4465_v46 = vrot.slane %v4463_v32, 5  ;;  %v4478_v55 = vshrl.u32 %v6342_v54, 16  ;;  %v7459_v38 = vld [vmem:[%s7635_s9 + $0x24] sm:$0xff]  }
  0xe3   : > { %v4460_v36 = vor.u32 %v4459_v19, %v4456_v23  ;;  %v4469_v53 = vrot.slane %v4467_v7, 4  ;;  %v4475_v12 = vrot.slane %v4473_v56, 5  ;;  %v4481_v8 = vshll.u32 %v6342_v54, 16  ;;  %v6351_v48 = vld [vmem:[%s7635_s9 + $0xb4] sm:$0xf] }
  0xe4   : > { %v4442_v49 = vsel %vm7682_vm4, %v4437_v35, %v4441_v17  ;;  %v4452_v57 = vsel %vm7682_vm4, %v4447_v45, %v4451_v15  ;;  %v4487_v28 = vshll.u32 %v6343_v52, 16  ;;  %v4480_v29 = vrot.slane %v4478_v55, 4  ;;  %v6352_v35 = vld [vmem:[%s7635_s9 + $0xb8] sm:$0xf]  ;;  %v6353_v55 = vld [vmem:[%s7635_s9 + $0xbc] sm:$0x1] }
  0xe5   : > { %v6369_v58 = vcombine.low %v4442_v49, %v4452_v57  ;;  %v4461_v1 = vrot.slane %v4460_v36, 4  ;;  %v4470_v41 = vor.u32 %v4469_v53, %v4465_v46  ;;  %6908 = vmatmul.mubr.msk.bf16.gmra.mrb[28].mxu1 %vm347_vm1, %v5987_v3  ;;  %v4483_v2 = vrot.slane %v4481_v8, 5  ;;  %v7460_v36 = vld [vmem:[%s7635_s9 + $0x30] sm:$0xff]   ;;  %v7461_v8 = vld [vmem:[%s7635_s9 + $0x3c] sm:$0xff]  }
  0xe6   : > { %v4489_v5 = vrot.slane %v4487_v28, 5  ;;  %v4491_v10 = vshrl.u32 %v6343_v52, 16  ;;  %v4497_v25 = vshll.u32 %v6344_v42, 16  ;;  %6913 = vmatprep.mubr.msk.bf16.mxu1 %vm347_vm1, %v7457_v51  ;;  %v4502_v44 = vshrl.u32 %v6345_v50, 16 }
  0xe7   : > { %v4466_v39 = vsel %vm7682_vm4, %v4461_v1, %v4465_v46  ;;  %v4471_v47 = vrot.slane %v4470_v41, 4  ;;  %v4505_v24 = vshll.u32 %v6345_v50, 16  ;;  %v4484_v30 = vor.u32 %v4483_v2, %v4480_v29  ;;  %v6354_v41 = vld [vmem:[%s7635_s9 + $0xc0] sm:$0xf] }
  0xe8   : > { %v4493_v62 = vrot.slane %v4491_v10, 4  ;;  %v4499_v14 = vrot.slane %v4497_v25, 5  ;;  %v4511_v3 = vshll.u32 %v6346_v63, 16  ;;  %v4504_v16 = vrot.slane %v4502_v44, 4  ;;  %v6355_v10 = vld [vmem:[%s7635_s9 + $0xc4] sm:$0xf] }
  0xe9   : > { %7062 = vmatmul.mubr.msk.bf16.gmra.mrb[12].mxu0 %vm347_vm1, %v6368_v6  ;;  %v4476_v40 = vsel %vm7682_vm4, %v4471_v47, %v4475_v12  ;;  %v4507_v33 = vrot.slane %v4505_v24, 5  ;;  %v4515_v9 = vshrl.u32 %v6346_v63, 16  ;;  %v4485_v20 = vrot.slane %v4484_v30, 4  ;;  %v6356_v44 = vld [vmem:[%s7635_s9 + $0xc8] sm:$0x1] }
  0xea   : > { %7065 = vmatprep.mubr.msk.bf16.mxu0 %vm347_vm1, %v6369_v58  ;;  %v6370_v61 = vcombine.low %v4466_v39, %v4476_v40  ;;  %v4494_v37 = vor.u32 %v4493_v62, %v4489_v5  ;;  %v4513_v17 = vrot.slane %v4511_v3, 5  ;;  %v4521_v27 = vshll.u32 %v6347_v13, 16 }
  0xeb   : > { %v4508_v60 = vor.u32 %v4507_v33, %v4504_v16  ;;  %v4517_v34 = vrot.slane %v4515_v9, 4  ;;  %v4526_v15 = vshrl.u32 %v6348_v59, 16  ;;  %v4490_v22 = vsel %vm7682_vm4, %v4485_v20, %v4489_v5  ;;  %v6357_v16 = vld [vmem:[%s7635_s9 + $0xcc] sm:$0xf]  ;;  %v6358_v20 = vld [vmem:[%s7635_s9 + $0xd0] sm:$0xf] }
  0xec   : > { %v4495_v26 = vrot.slane %v4494_v37, 4  ;;  %v4529_v23 = vshll.u32 %v6348_v59, 16  ;;  %v4535_v32 = vshll.u32 %v6349_v18, 16  ;;  %v4523_v11 = vrot.slane %v4521_v27, 5 }
  0xed   : > { %v4509_v54 = vrot.slane %v4508_v60, 4  ;;  %v4518_v52 = vor.u32 %v4517_v34, %v4513_v17  ;;  %v4528_v19 = vrot.slane %v4526_v15, 4  ;;  %6914 = vmatmul.mubr.msk.bf16.vlgmr.msra.gmra.mrb[0].mxu1 %vm347_vm1, %v7458_v31  ;;  %v4539_v6 = vshrl.u32 %v6349_v18, 16  ;;  %v6359_v60 = vld [vmem:[%s7635_s9 + $0xd4] sm:$0x1]  ;;  %v7462_v34 = vld [vmem:[%s7635_s9 + $0x48] sm:$0xff]  }
  0xee   : > { %v4500_v7 = vsel %vm7682_vm4, %v4495_v26, %v4499_v14  ;;  %v4531_v56 = vrot.slane %v4529_v23, 5  ;;  %v4537_v42 = vrot.slane %v4535_v32, 5  ;;  %6917 = vmatprep.mubr.msk.bf16.mxu1 %vm347_vm1, %v7459_v38  ;;  %7116 = vmatpush3.bf16.msra.mxu1 %v7624_v4  ;;  %v4545_v51 = vshll.u32 %v6350_v21, 16  ;;  %v6393_v26 = vld [vmem:[%s7635_s9 + $0x18] sm:$0xe] }
  0xef   : > { %v6371_v45 = vcombine.low %v4490_v22, %v4500_v7  ;;  %v4514_v46 = vsel %vm7682_vm4, %v4509_v54, %v4513_v17  ;;  %v4519_v50 = vrot.slane %v4518_v52, 4  ;;  %v4541_v12 = vrot.slane %v4539_v6, 4  ;;  %v6394_v23 = vld [vmem:[%s7635_s9 + $0x1c] sm:$0xf]  ;;  %v7463_v32 = vld [vmem:[%s7635_s9 + $0x54] sm:$0xff]  }
  0xf0   : > { %v4532_v53 = vor.u32 %v4531_v56, %v4528_v19  ;;  %v4550_v49 = vshrl.u32 %v6351_v48, 16  ;;  %v4553_v57 = vshll.u32 %v6351_v48, 16  ;;  %v4547_v28 = vrot.slane %v4545_v51, 5  ;;  %v6395_v7 = vld [vmem:[%s7635_s9 + $0x20] sm:$0x1] }
  0xf1   : > { %7066 = vmatmul.mubr.msk.bf16.gmra.mrb[16].mxu0 %vm347_vm1, %v6370_v61  ;;  %v4524_v4 = vsel %vm7682_vm4, %v4519_v50, %v4523_v11  ;;  %v4559_v58 = vshll.u32 %v6352_v35, 16  ;;  %v4563_v1 = vshrl.u32 %v6352_v35, 16  ;;  %v4542_v2 = vor.u32 %v4541_v12, %v4537_v42  ;;  %v6397_v56 = vld [vmem:[%s7635_s9 + $0x28] sm:$0xf] }
  0xf2   : > { %7069 = vmatprep.mubr.msk.bf16.mxu0 %vm347_vm1, %v6371_v45  ;;  %v6372_v29 = vcombine.low %v4514_v46, %v4524_v4  ;;  %v4533_v63 = vrot.slane %v4532_v53, 4  ;;  %v4552_v5 = vrot.slane %v4550_v49, 4  ;;  %v4555_v25 = vrot.slane %v4553_v57, 5  ;;  %v6396_v45 = vld [vmem:[%s7635_s9 + $0x24] sm:$0xe] }
  0xf3   : > { %v4561_v39 = vrot.slane %v4559_v58, 5  ;;  %v4565_v47 = vrot.slane %v4563_v1, 4  ;;  %v4569_v13 = vshll.u32 %v6353_v55, 16  ;;  %v4543_v30 = vrot.slane %v4542_v2, 4  ;;  %v6398_v57 = vld [vmem:[%s7635_s9 + $0x2c] sm:$0x1] }
  0xf4   : > { %v4538_v24 = vsel %vm7682_vm4, %v4533_v63, %v4537_v42  ;;  %v4574_v62 = vshrl.u32 %v6354_v41, 16  ;;  %v4577_v14 = vshll.u32 %v6354_v41, 16  ;;  %v4556_v3 = vor.u32 %v4555_v25, %v4552_v5  ;;  %v6399_v1 = vld [vmem:[%s7635_s9 + $0x30] sm:$0xe]  ;;  %v6400_v5 = vld [vmem:[%s7635_s9 + $0x34] sm:$0xf] }
  0xf5   : > { %v4566_v59 = vor.u32 %v4565_v47, %v4561_v39  ;;  %v4571_v31 = vrot.slane %v4569_v13, 5  ;;  %v4583_v40 = vshll.u32 %v6355_v10, 16  ;;  %6918 = vmatmul.mubr.msk.bf16.gmra.mrb[4].mxu1 %vm347_vm1, %v7460_v36  ;;  %v4548_v33 = vsel %vm7682_vm4, %v4543_v30, %v4547_v28  ;;  %v6401_v13 = vld [vmem:[%s7635_s9 + $0x38] sm:$0x1] }
  0xf6   : > { %v4576_v9 = vrot.slane %v4574_v62, 4  ;;  %v4579_v18 = vrot.slane %v4577_v14, 5  ;;  %v4587_v61 = vshrl.u32 %v6355_v10, 16  ;;  %6921 = vmatprep.mubr.msk.bf16.mxu1 %vm347_vm1, %v7461_v8  ;;  %v6373_v37 = vcombine.low %v4538_v24, %v4548_v33  ;;  %v6402_v62 = vld [vmem:[%s7635_s9 + $0x3c] sm:$0xe]  ;;  %v7464_v14 = vld [vmem:[%s7635_s9 + $0x60] sm:$0xff]  }
  0xf7   : > { %v4557_v17 = vrot.slane %v4556_v3, 4  ;;  %v4567_v21 = vrot.slane %v4566_v59, 4  ;;  %v4585_v38 = vrot.slane %v4583_v40, 5  ;;  %v4593_v48 = vshll.u32 %v6356_v44, 16  ;;  %v7465_v33 = vld [vmem:[%s7635_s9 + $0x6c] sm:$0xff]  }
  0xf8   : > { %v4580_v27 = vor.u32 %v4579_v18, %v4576_v9  ;;  %v4589_v15 = vrot.slane %v4587_v61, 4  ;;  %v4598_v22 = vshrl.u32 %v6357_v16, 16  ;;  %v4601_v11 = vshll.u32 %v6357_v16, 16  ;;  %v6403_v16 = vld [vmem:[%s7635_s9 + $0x40] sm:$0xf] }
  0xf9   : > { %7070 = vmatmul.mubr.msk.bf16.gmra.mrb[20].mxu0 %vm347_vm1, %v6372_v29  ;;  %v4562_v54 = vsel %vm7682_vm4, %v4557_v17, %v4561_v39  ;;  %v4572_v52 = vsel %vm7682_vm4, %v4567_v21, %v4571_v31  ;;  %v4607_v19 = vshll.u32 %v6358_v20, 16  ;;  %v4595_v35 = vrot.slane %v4593_v48, 5 }
  0xfa   : > { %7073 = vmatprep.mubr.msk.bf16.mxu0 %vm347_vm1, %v6373_v37  ;;  %v4581_v42 = vrot.slane %v4580_v27, 4  ;;  %v4590_v6 = vor.u32 %v4589_v15, %v4585_v38  ;;  %v4600_v46 = vrot.slane %v4598_v22, 4  ;;  %v4603_v50 = vrot.slane %v4601_v11, 5  ;;  %v6406_v37 = vld [vmem:[%s7635_s9 + $0x4c] sm:$0xf] }
  0xfb   : > { %v4609_v51 = vrot.slane %v4607_v19, 5  ;;  %v4611_v36 = vshrl.u32 %v6358_v20, 16  ;;  %v6374_v53 = vcombine.low %v4562_v54, %v4572_v52  ;;  %v4617_v49 = vshll.u32 %v6359_v60, 16  ;;  %v6405_v20 = vld [vmem:[%s7635_s9 + $0x48] sm:$0xe] }
  0xfc   : > { %v4586_v12 = vsel %vm7682_vm4, %v4581_v42, %v4585_v38  ;;  %v4591_v55 = vrot.slane %v4590_v6, 4  ;;  %v4604_v8 = vor.u32 %v4603_v50, %v4600_v46  ;;  %v6441_v28 = vrot.slane %v6393_v26, 9  ;;  %v6404_v60 = vld [vmem:[%s7635_s9 + $0x44] sm:$0x1]  ;;  %v6408_v27 = vld [vmem:[%s7635_s9 + $0x54] sm:$0xe] }
  0xfd   : > { %v4613_v4 = vrot.slane %v4611_v36, 4  ;;  %v5077_v58 = vrot.slane %v6394_v23, 5  ;;  %6922 = vmatmul.mubr.msk.bf16.gmra.mrb[8].mxu1 %vm347_vm1, %v7462_v34  ;;  %v4619_v29 = vrot.slane %v4617_v49, 5  ;;  %v5080_v63 = vrot.slane %v6395_v7, 5  ;;  %v6407_v34 = vld [vmem:[%s7635_s9 + $0x50] sm:$0x1] }
  0xfe   : > { %v4596_v41 = vsel %vm7682_vm4, %v4591_v55, %v4595_v35  ;;  %v5084_v2 = vrot.slane %v6397_v56, 5  ;;  %6925 = vmatprep.mubr.msk.bf16.mxu1 %vm347_vm1, %v7463_v32  ;;  %v4605_v25 = vrot.slane %v4604_v8, 4  ;;  %v6442_v47 = vrot.slane %v6396_v45, 9  ;;  %v6409_v23 = vld [vmem:[%s7635_s9 + $0x58] sm:$0xf] }
  0xff   : > { %v6375_v10 = vcombine.low %v4586_v12, %v4596_v41  ;;  %v4614_v39 = vor.u32 %v4613_v4, %v4609_v51  ;;  %v5079_v44 = vrot.slane %v5077_v58, 4  ;;  %v5087_v30 = vrot.slane %v6398_v57, 5  ;;  %v6410_v19 = vld [vmem:[%s7635_s9 + $0x5c] sm:$0x1]  ;;  %v6093_v7 = vld [vmem:[%s7635_s9 + $0x6c] sm:$0xf] }
 0x100   : > { %v5086_v24 = vrot.slane %v5084_v2, 4  ;;  %v5078_v59 = vsel %vm7757_vm7, %v6441_v28, %v5077_v58  ;;  %v6443_v31 = vrot.slane %v6399_v1, 9  ;;  %v5091_v40 = vrot.slane %v6400_v5, 5  ;;  %v6094_v45 = vld [vmem:[%s7635_s9 + $0x70] sm:$0xf]  ;;  %v7466_v41 = vld [vmem:[%s7635_s9 + $0x78] sm:$0xff]  }
 0x101   : > { %7074 = vmatmul.mubr.msk.bf16.gmra.mrb[24].mxu0 %vm347_vm1, %v6374_v53  ;;  %v4615_v3 = vrot.slane %v4614_v39, 4  ;;  %v4610_v9 = vsel %vm7682_vm4, %v4605_v25, %v4609_v51  ;;  %v5081_v18 = vsel %vm7757_vm7, %v5079_v44, %v5080_v63  ;;  %v5094_v61 = vrot.slane %v6401_v13, 5  ;;  %v6095_v55 = vld [vmem:[%s7635_s9 + $0x74] sm:$0x1]  ;;  %v6096_v57 = vld [vmem:[%s7635_s9 + $0x78] sm:$0xf] }
 0x102   : > { %7077 = vmatprep.mubr.msk.bf16.mxu0 %vm347_vm1, %v6375_v10  ;;  %v8565_v21 = vsel %vm7757_vm7, %v6442_v47, %v5084_v2  ;;  %v8569_v38 = vsel %vm7757_vm7, %v5086_v24, %v5087_v30  ;;  %v6458_v15 = vcombine.low %v5078_v59, %v5081_v18  ;;  %v5093_v48 = vrot.slane %v5091_v40, 4  ;;  %v6097_v1 = vld [vmem:[%s7635_s9 + $0x7c] sm:$0xf]  ;;  %v7467_v10 = vld [vmem:[%s7635_s9 + $0x84] sm:$0xff]   ;;  %v6098_v24 = vld [vmem:[%s7635_s9 + $0x80] sm:$0x1] }
 0x103   : > { %v4620_v17 = vsel %vm7682_vm4, %v4615_v3, %v4619_v29  ;;  %v6444_v22 = vrot.slane %v6402_v62, 9  ;;  %v5098_v26 = vrot.slane %v6403_v16, 5  ;;  %v8577_v54 = vsel %vm7757_vm7, %v6443_v31, %v5091_v40  ;;  %v6411_v16 = vld [vmem:[%s7635_s9 + $0x60] sm:$0xe] }
 0x104   : > { %v6376_v32 = vcombine.low %v4610_v9, %v4620_v17  ;;  %v6445_v52 = vrot.slane %v6405_v20, 9  ;;  %v5105_v11 = vrot.slane %v6406_v37, 5  ;;  %v8584_v56 = vsel %vm7757_vm7, %v5093_v48, %v5094_v61  ;;  %v6415_v37 = vld [vmem:[%s7635_s9 + $0x70] sm:$0xf]  ;;  %v6413_v48 = vld [vmem:[%s7635_s9 + $0x68] sm:$0x1] }
 0x105   : > { %6926 = vmatmul.mubr.msk.bf16.gmra.mrb[12].mxu1 %vm347_vm1, %v7464_v14  ;;  %v5100_v42 = vrot.slane %v5098_v26, 4  ;;  %v5101_v6 = vrot.slane %v6404_v60, 5  ;;  %v6446_v35 = vrot.slane %v6408_v27, 9  ;;  %v6459_v46 = vcombine.low %v8565_v21, %v8569_v38 }
 0x106   : > { %6929 = vmatprep.mubr.msk.bf16.mxu1 %vm347_vm1, %v7465_v33  ;;  %v5108_v50 = vrot.slane %v6407_v34, 5  ;;  %v5112_v51 = vrot.slane %v6409_v23, 5  ;;  %v6460_v36 = vcombine.low %v8577_v54, %v8584_v56  ;;  %v8594_v53 = vsel %vm7757_vm7, %v6444_v22, %v5098_v26  ;;  %v6412_v33 = vld [vmem:[%s7635_s9 + $0x64] sm:$0xf]  ;;  %v6414_v34 = vld [vmem:[%s7635_s9 + $0x6c] sm:$0xe] }
 0x107   : > { %v8598_v12 = vsel %vm7757_vm7, %v6445_v52, %v5105_v11  ;;  %v2651_v49 = vshrl.u32 %v6093_v7, 16  ;;  %v5107_v8 = vrot.slane %v5105_v11, 4  ;;  %v5115_v4 = vrot.slane %v6410_v19, 5  ;;  %v7468_v23 = vld [vmem:[%s7635_s9 + $0x90] sm:$0xff]   ;;  %v6099_v19 = vld [vmem:[%s7635_s9 + $0x84] sm:$0xf] }
 0x108   : > { %v2654_v28 = vshll.u32 %v6093_v7, 16  ;;  %v2660_v58 = vshll.u32 %v6094_v45, 16  ;;  %v8608_v29 = vsel %vm7757_vm7, %v5100_v42, %v5101_v6  ;;  %v8612_v63 = vsel %vm7757_vm7, %v6446_v35, %v5112_v51  ;;  %v6416_v6 = vld [vmem:[%s7635_s9 + $0x74] sm:$0x1] }
 0x109   : > { %7078 = vmatmul.mubr.msk.bf16.gmra.mrb[28].mxu0 %vm347_vm1, %v6376_v32  ;;  %v2653_v2 = vrot.slane %v2651_v49, 4  ;;  %v2664_v5 = vshrl.u32 %v6094_v45, 16  ;;  %v5114_v25 = vrot.slane %v5112_v51, 4  ;;  %v2670_v13 = vshll.u32 %v6095_v55, 16  ;;  %v6100_v45 = vld [vmem:[%s7635_s9 + $0x88] sm:$0xf] }
 0x10a   : > { %7083 = vmatprep.mubr.msk.bf16.mxu0 %vm347_vm1, %v6458_v15  ;;  %v2656_v39 = vrot.slane %v2654_v28, 5  ;;  %v2662_v47 = vrot.slane %v2660_v58, 5  ;;  %v2675_v30 = vshrl.u32 %v6096_v57, 16  ;;  %v2678_v62 = vshll.u32 %v6096_v57, 16  ;;  %v6101_v57 = vld [vmem:[%s7635_s9 + $0x8c] sm:$0x1] }
 0x10b   : > { %v2666_v44 = vrot.slane %v2664_v5, 4  ;;  %v2684_v14 = vshll.u32 %v6097_v1, 16  ;;  %v8618_v3 = vsel %vm7757_vm7, %v5107_v8, %v5108_v50  ;;  %v2672_v31 = vrot.slane %v2670_v13, 5 }
 0x10c   : > { %v2657_v59 = vor.u32 %v2656_v39, %v2653_v2  ;;  %v2688_v40 = vshrl.u32 %v6097_v1, 16  ;;  %v2677_v18 = vrot.slane %v2675_v30, 4  ;;  %v2680_v61 = vrot.slane %v2678_v62, 5  ;;  %v6104_v39 = vld [vmem:[%s7635_s9 + $0x98] sm:$0x1] }
 0x10d   : > { %6930 = vmatmul.mubr.msk.bf16.gmra.mrb[16].mxu1 %vm347_vm1, %v7466_v41  ;;  %v2667_v9 = vor.u32 %v2666_v44, %v2662_v47  ;;  %v8623_v20 = vrot.slane %v2684_v14, 5  ;;  %v8629_v17 = vsel %vm7757_vm7, %v5114_v25, %v5115_v4  ;;  %v2694_v60 = vshll.u32 %v6098_v24, 16  ;;  %v6102_v4 = vld [vmem:[%s7635_s9 + $0x90] sm:$0xf]  ;;  %v6417_v30 = vld [vmem:[%s7635_s9 + $0x78] sm:$0xe] }
 0x10e   : > { %6933 = vmatprep.mubr.msk.bf16.mxu1 %vm347_vm1, %v7467_v10  ;;  %v2658_v21 = vrot.slane %v2657_v59, 4  ;;  %v2690_v38 = vrot.slane %v2688_v40, 4  ;;  %v2681_v15 = vor.u32 %v2680_v61, %v2677_v18  ;;  %v6447_v22 = vrot.slane %v6411_v16, 9  ;;  %v6419_v18 = vld [vmem:[%s7635_s9 + $0x80] sm:$0x1] }
 0x10f   : > { %v2668_v27 = vrot.slane %v2667_v9, 4  ;;  %v5119_v26 = vrot.slane %v6412_v33, 5  ;;  %v6461_v32 = vcombine.low %v8594_v53, %v8608_v29  ;;  %v5126_v11 = vrot.slane %v6415_v37, 5  ;;  %v6103_v29 = vld [vmem:[%s7635_s9 + $0x94] sm:$0xf]  ;;  %v7470_v37 = vld [vmem:[%s7635_s9 + $0xa8] sm:$0xff]  }
 0x110   : > { %v2663_v54 = vsel %vm7682_vm4, %v2658_v21, %v2662_v47  ;;  %v2691_v52 = vor.u32 %v2690_v38, %v8623_v20  ;;  %v6462_v7 = vcombine.low %v8598_v12, %v8618_v3  ;;  %v8646_v42 = vrot.slane %v2681_v15, 4  ;;  %v6420_v61 = vld [vmem:[%s7635_s9 + $0x84] sm:$0xe]  ;;  %v7471_v15 = vld [vmem:[%s7635_s9 + $0xb4] sm:$0xff]  }
 0x111   : > { %7084 = vmatmul.mubr.msk.bf16.vlgmr.msra.gmra.mrb[0].mxu0 %vm347_vm1, %v6459_v46  ;;  %v2673_v56 = vsel %vm7682_vm4, %v2668_v27, %v2672_v31  ;;  %v6448_v35 = vrot.slane %v6414_v34, 9  ;;  %v7469_v46 = vld [vmem:[%s7635_s9 + $0x9c] sm:$0xff]   ;;  %v6463_v50 = vcombine.low %v8612_v63, %v8629_v17  ;;  %v8653_v51 = vrot.slane %v2694_v60, 5  ;;  %v6421_v27 = vld [vmem:[%s7635_s9 + $0x88] sm:$0xf] }
 0x112   : > { %7087 = vmatprep.mubr.msk.bf16.mxu0 %vm347_vm1, %v6460_v36  ;;  %v5121_v36 = vrot.slane %v5119_v26, 4  ;;  %v5122_v53 = vrot.slane %v6413_v48, 5  ;;  %v8655_v55 = vcombine.low %v2663_v54, %v2673_v56  ;;  %v8657_v12 = vrot.slane %v2691_v52, 4  ;;  %v6418_v31 = vld [vmem:[%s7635_s9 + $0x7c] sm:$0xf] }
 0x113   : > { %v8661_v49 = vsel %vm7757_vm7, %v6447_v22, %v5119_v26  ;;  %v2699_v8 = vshrl.u32 %v6099_v19, 16  ;;  %v5128_v28 = vrot.slane %v5126_v11, 4  ;;  %v5129_v58 = vrot.slane %v6416_v6, 5  ;;  %v6422_v56 = vld [vmem:[%s7635_s9 + $0x8c] sm:$0x1] }
 0x114   : > { %v2702_v1 = vshll.u32 %v6099_v19, 16  ;;  %v2708_v41 = vshll.u32 %v6100_v45, 16  ;;  %v2687_v2 = vsel %vm7682_vm4, %v8646_v42, %v8623_v20  ;;  %v8673_v5 = vsel %vm7757_vm7, %v6448_v35, %v5126_v11 }
 0x115   : > { %6934 = vmatmul.mubr.msk.bf16.gmra.mrb[20].mxu1 %vm347_vm1, %v7468_v23  ;;  %v2701_v10 = vrot.slane %v2699_v8, 4  ;;  %v2712_v25 = vshrl.u32 %v6100_v45, 16  ;;  %v8679_v47 = vsel %vm7757_vm7, %v5121_v36, %v5122_v53  ;;  %v2718_v24 = vshll.u32 %v6101_v57, 16  ;;  %v6105_v45 = vld [vmem:[%s7635_s9 + $0x9c] sm:$0xf] }
 0x116   : > { %6937 = vmatprep.mubr.msk.bf16.mxu1 %vm347_vm1, %v7469_v46  ;;  %v2704_v13 = vrot.slane %v2702_v1, 5  ;;  %v8681_v44 = vrot.slane %v2708_v41, 5  ;;  %v2723_v14 = vshrl.u32 %v6102_v4, 16  ;;  %v2726_v3 = vshll.u32 %v6102_v4, 16  ;;  %v6106_v8 = vld [vmem:[%s7635_s9 + $0xa0] sm:$0xf] }
 0x117   : > { %v2714_v62 = vrot.slane %v2712_v25, 4  ;;  %v2732_v59 = vshll.u32 %v6103_v29, 16  ;;  %v8688_v40 = vsel %vm7757_vm7, %v5128_v28, %v5129_v58  ;;  %v2736_v33 = vshrl.u32 %v6103_v29, 16  ;;  %v6108_v25 = vld [vmem:[%s7635_s9 + $0xa8] sm:$0xf] }
 0x118   : > { %v2705_v16 = vor.u32 %v2704_v13, %v2701_v10  ;;  %v2742_v9 = vshll.u32 %v6104_v39, 16  ;;  %v2725_v38 = vrot.slane %v2723_v14, 4  ;;  %v2728_v60 = vrot.slane %v2726_v3, 5 }
 0x119   : > { %7088 = vmatmul.mubr.msk.bf16.gmra.mrb[4].mxu0 %vm347_vm1, %v6461_v32  ;;  %v2715_v21 = vor.u32 %v2714_v62, %v8681_v44  ;;  %v8695_v34 = vrot.slane %v2732_v59, 5  ;;  %v8701_v22 = vrot.slane %v2718_v24, 5  ;;  %v2738_v26 = vrot.slane %v2736_v33, 4  ;;  %v6109_v24 = vld [vmem:[%s7635_s9 + $0xac] sm:$0xf] }
 0x11a   : > { %7091 = vmatprep.mubr.msk.bf16.mxu0 %vm347_vm1, %v6462_v7  ;;  %v8699_v48 = vrot.slane %v2705_v16, 4  ;;  %v6449_v23 = vrot.slane %v6417_v30, 9  ;;  %v2729_v54 = vor.u32 %v2728_v60, %v2725_v38  ;;  %v5133_v52 = vrot.slane %v6418_v31, 5  ;;  %v7472_v30 = vld [vmem:[%s7635_s9 + $0xc0] sm:$0xff]  }
 0x11b   : > { %v8703_v32 = vrot.slane %v2715_v21, 4  ;;  %v5136_v11 = vrot.slane %v6419_v18, 5  ;;  %v2697_v19 = vsel %vm7682_vm4, %v8657_v12, %v8653_v51  ;;  %v2739_v7 = vor.u32 %v2738_v26, %v8695_v34  ;;  %v6112_v12 = vld [vmem:[%s7635_s9 + $0xb8] sm:$0xf] }
 0x11c   : > { %v6450_v6 = vrot.slane %v6420_v61, 9  ;;  %v5140_v35 = vrot.slane %v6421_v27, 5  ;;  %v6464_v46 = vcombine.low %v8661_v49, %v8679_v47  ;;  %v8715_v36 = vrot.slane %v2729_v54, 4  ;;  %v6423_v61 = vld [vmem:[%s7635_s9 + $0x90] sm:$0xe] }
 0x11d   : > { %6938 = vmatmul.mubr.msk.bf16.gmra.mrb[24].mxu1 %vm347_vm1, %v7470_v37  ;;  %v8717_v53 = vrot.slane %v2742_v9, 5  ;;  %v5135_v57 = vrot.slane %v5133_v52, 4  ;;  %v6465_v4 = vcombine.low %v8673_v5, %v8688_v40  ;;  %v2711_v28 = vsel %vm7682_vm4, %v8699_v48, %v8681_v44  ;;  %v6107_v5 = vld [vmem:[%s7635_s9 + $0xa4] sm:$0x1]  ;;  %v6110_v40 = vld [vmem:[%s7635_s9 + $0xb0] sm:$0x1] }
 0x11e   : > { %6941 = vmatprep.mubr.msk.bf16.mxu1 %vm347_vm1, %v7471_v15  ;;  %v2721_v49 = vsel %vm7682_vm4, %v8703_v32, %v8701_v22  ;;  %v2740_v58 = vrot.slane %v2739_v7, 4  ;;  %v5134_v1 = vsel %vm7757_vm7, %v6449_v23, %v5133_v52  ;;  %v8737_v29 = vsel %vm7757_vm7, %v6450_v6, %v5140_v35  ;;  %v6425_v27 = vld [vmem:[%s7635_s9 + $0x98] sm:$0x1]  ;;  %v6427_v23 = vld [vmem:[%s7635_s9 + $0xa0] sm:$0xf] }
 0x11f   : > { %v5137_v41 = vsel %vm7757_vm7, %v5135_v57, %v5136_v11  ;;  %v2747_v10 = vshrl.u32 %v6105_v45, 16  ;;  %v5142_v39 = vrot.slane %v5140_v35, 4  ;;  %v5143_v47 = vrot.slane %v6422_v56, 5  ;;  %v6111_v57 = vld [vmem:[%s7635_s9 + $0xb4] sm:$0xf] }
 0x120   : > { %v2750_v13 = vshll.u32 %v6105_v45, 16  ;;  %v2756_v44 = vshll.u32 %v6106_v8, 16  ;;  %v2735_v62 = vsel %vm7682_vm4, %v8715_v36, %v8695_v34  ;;  %v2745_v63 = vsel %vm7682_vm4, %v2740_v58, %v8717_v53  ;;  %v6424_v34 = vld [vmem:[%s7635_s9 + $0x94] sm:$0xf]  ;;  %v6426_v45 = vld [vmem:[%s7635_s9 + $0x9c] sm:$0xe] }
 0x121   : > { %7092 = vmatmul.mubr.msk.bf16.gmra.mrb[8].mxu0 %vm347_vm1, %v6463_v50  ;;  %v2749_v17 = vrot.slane %v2747_v10, 4  ;;  %v2760_v50 = vshrl.u32 %v6106_v8, 16  ;;  %v6466_v14 = vcombine.low %v5134_v1, %v5137_v41  ;;  %v2766_v31 = vshll.u32 %v6107_v5, 16  ;;  %v6113_v5 = vld [vmem:[%s7635_s9 + $0xbc] sm:$0x1] }
 0x122   : > { %7095 = vmatprep.mubr.msk.bf16.mxu0 %vm347_vm1, %v6464_v46  ;;  %v2752_v3 = vrot.slane %v2750_v13, 5  ;;  %v2758_v59 = vrot.slane %v2756_v44, 5  ;;  %v2771_v33 = vshrl.u32 %v6108_v25, 16  ;;  %v2774_v9 = vshll.u32 %v6108_v25, 16  ;;  %v6114_v25 = vld [vmem:[%s7635_s9 + $0xc0] sm:$0xf] }
 0x123   : > { %v2762_v16 = vrot.slane %v2760_v50, 4  ;;  %v2780_v18 = vshll.u32 %v6109_v24, 16  ;;  %v8759_v37 = vsel %vm7757_vm7, %v5142_v39, %v5143_v47  ;;  %v2768_v38 = vrot.slane %v2766_v31, 5 }
 0x124   : > { %v2753_v21 = vor.u32 %v2752_v3, %v2749_v17  ;;  %v2784_v60 = vshrl.u32 %v6109_v24, 16  ;;  %v2773_v48 = vrot.slane %v2771_v33, 4  ;;  %v2776_v22 = vrot.slane %v2774_v9, 5  ;;  %v6429_v33 = vld [vmem:[%s7635_s9 + $0xa8] sm:$0xe] }
 0x125   : > { %6942 = vmatmul.mubr.msk.bf16.gmra.mrb[28].mxu1 %vm347_vm1, %v7472_v30  ;;  %v2763_v15 = vor.u32 %v2762_v16, %v2758_v59  ;;  %v8764_v26 = vrot.slane %v2780_v18, 5  ;;  %v2790_v52 = vshll.u32 %v6110_v40, 16  ;;  %v6451_v11 = vrot.slane %v6423_v61, 9 }
 0x126   : > { %6963 = vmatprep.mubr.msk.bf16.mxu1 %vm347_vm1, %v8655_v55  ;;  %v2754_v32 = vrot.slane %v2753_v21, 4  ;;  %v2786_v54 = vrot.slane %v2784_v60, 4  ;;  %v2777_v56 = vor.u32 %v2776_v22, %v2773_v48  ;;  %v5147_v6 = vrot.slane %v6424_v34, 5  ;;  %v6430_v21 = vld [vmem:[%s7635_s9 + $0xac] sm:$0xf] }
 0x127   : > { %v2764_v7 = vrot.slane %v2763_v15, 4  ;;  %v5150_v35 = vrot.slane %v6425_v27, 5  ;;  %v6127_v55 = vcombine.low %v2687_v2, %v2697_v19  ;;  %v5154_v53 = vrot.slane %v6427_v23, 5  ;;  %v6116_v27 = vld [vmem:[%s7635_s9 + $0xc8] sm:$0x1] }
 0x128   : > { %v2759_v46 = vsel %vm7682_vm4, %v2754_v32, %v2758_v59  ;;  %v2787_v36 = vor.u32 %v2786_v54, %v8764_v26  ;;  %v6128_v8 = vcombine.low %v2711_v28, %v2721_v49  ;;  %v8785_v51 = vcombine.low %v2735_v62, %v2745_v63  ;;  %v6428_v28 = vld [vmem:[%s7635_s9 + $0xa4] sm:$0x1]  ;;  %v6433_v22 = vld [vmem:[%s7635_s9 + $0xb8] sm:$0xf] }
 0x129   : > { %7096 = vmatmul.mubr.msk.bf16.gmra.mrb[12].mxu0 %vm347_vm1, %v6465_v4  ;;  %v2769_v20 = vsel %vm7682_vm4, %v2764_v7, %v2768_v38  ;;  %v5149_v42 = vrot.slane %v5147_v6, 4  ;;  %v6467_v2 = vcombine.low %v8737_v29, %v8759_v37  ;;  %v8793_v19 = vrot.slane %v2790_v52, 5  ;;  %v6115_v29 = vld [vmem:[%s7635_s9 + $0xc4] sm:$0xf]  ;;  %v6431_v38 = vld [vmem:[%s7635_s9 + $0xb0] sm:$0x1] }
 0x12a   : > { %7099 = vmatprep.mubr.msk.bf16.mxu0 %vm347_vm1, %v6466_v14  ;;  %v5148_v4 = vsel %vm7757_vm7, %v6451_v11, %v5147_v6  ;;  %v6452_v49 = vrot.slane %v6426_v45, 9  ;;  %v6130_v58 = vcombine.low %v2759_v46, %v2769_v20  ;;  %v2778_v1 = vrot.slane %v2777_v56, 4  ;;  %v6432_v52 = vld [vmem:[%s7635_s9 + $0xb4] sm:$0xe] }
 0x12b   : > { %v5151_v41 = vsel %vm7757_vm7, %v5149_v42, %v5150_v35  ;;  %v2795_v10 = vshrl.u32 %v6111_v57, 16  ;;  %v2788_v39 = vrot.slane %v2787_v36, 4  ;;  %v5156_v47 = vrot.slane %v5154_v53, 4  ;;  %v6435_v36 = vld [vmem:[%s7635_s9 + $0xc0] sm:$0xe] }
 0x12c   : > { %v2798_v13 = vshll.u32 %v6111_v57, 16  ;;  %v2804_v44 = vshll.u32 %v6112_v12, 16  ;;  %v6468_v24 = vcombine.low %v5148_v4, %v5151_v41  ;;  %v5157_v30 = vrot.slane %v6428_v28, 5  ;;  %v6436_v42 = vld [vmem:[%s7635_s9 + $0xc4] sm:$0xf] }
 0x12d   : > { %6964 = vmatmul.mubr.msk.bf16.vlgmr.msra.gmra.mrb[16].mxu1 %vm347_vm1, %v6127_v55  ;;  %v2797_v62 = vrot.slane %v2795_v10, 4  ;;  %v2808_v63 = vshrl.u32 %v6112_v12, 16  ;;  %v5155_v17 = vsel %vm7757_vm7, %v6452_v49, %v5154_v53  ;;  %v2814_v3 = vshll.u32 %v6113_v5, 16  ;;  %v6434_v55 = vld [vmem:[%s7635_s9 + $0xbc] sm:$0x1] }
 0x12e   : > { %6967 = vmatprep.mubr.msk.bf16.mxu1 %vm347_vm1, %v6128_v8  ;;  %v2800_v50 = vrot.slane %v2798_v13, 5  ;;  %v2806_v14 = vrot.slane %v2804_v44, 5  ;;  %v2819_v31 = vshrl.u32 %v6114_v25, 16  ;;  %v2822_v40 = vshll.u32 %v6114_v25, 16  ;;  %v6437_v12 = vld [vmem:[%s7635_s9 + $0xc8] sm:$0x1] }
 0x12f   : > { %v2810_v59 = vrot.slane %v2808_v63, 4  ;;  %v2828_v16 = vshll.u32 %v6115_v29, 16  ;;  %v2783_v9 = vsel %vm7682_vm4, %v2778_v1, %v8764_v26  ;;  %v2793_v18 = vsel %vm7682_vm4, %v2788_v39, %v8793_v19  ;;  %v6439_v49 = vld [vmem:[%s7635_s9 + $0xd0] sm:$0xf] }
 0x130   : > { %v2801_v61 = vor.u32 %v2800_v50, %v2797_v62  ;;  %v2832_v37 = vshrl.u32 %v6115_v29, 16  ;;  %v5158_v60 = vsel %vm7757_vm7, %v5156_v47, %v5157_v30  ;;  %v2821_v15 = vrot.slane %v2819_v31, 4  ;;  %v6440_v50 = vld [vmem:[%s7635_s9 + $0xd4] sm:$0x1] }
 0x131   : > { %7100 = vmatmul.mubr.msk.bf16.gmra.mrb[16].mxu0 %vm347_vm1, %v6467_v2  ;;  %v2811_v34 = vor.u32 %v2810_v59, %v2806_v14  ;;  %v2824_v48 = vrot.slane %v2822_v40, 5  ;;  %v2830_v23 = vrot.slane %v2828_v16, 5  ;;  %v6453_v54 = vrot.slane %v6429_v33, 9 }
 0x132   : > { %7103 = vmatprep.mubr.msk.bf16.mxu0 %vm347_vm1, %v6468_v24  ;;  %v2802_v26 = vrot.slane %v2801_v61, 4  ;;  %v2834_v32 = vrot.slane %v2832_v37, 4  ;;  %v2816_v7 = vrot.slane %v2814_v3, 5  ;;  %v5161_v56 = vrot.slane %v6430_v21, 5 }
 0x133   : > { %v2812_v11 = vrot.slane %v2811_v34, 4  ;;  %v5164_v6 = vrot.slane %v6431_v38, 5  ;;  %v6469_v35 = vcombine.low %v5155_v17, %v5158_v60  ;;  %v2838_v45 = vshll.u32 %v6116_v27, 16  ;;  %v6438_v17 = vld [vmem:[%s7635_s9 + $0xcc] sm:$0xe]  ;;  %s6560_s9 = sshll.u32 %s7582_s16, 11 }
 0x134   : > { %v5168_v46 = vrot.slane %v6433_v22, 5  ;;  %v2825_v53 = vor.u32 %v2824_v48, %v2821_v15  ;;  %v5162_v57 = vsel %vm7757_vm7, %v6453_v54, %v5161_v56  ;;  %v5163_v8 = vrot.slane %v5161_v56, 4  ;;  %s8938_s19 = scalar_lea.hbm %s8990_s3, %s6560_s9  ;;  %s8946_s16 = scalar_lea.sflag [#allocation4], %s161_s6 }
 0x135   : > { %6968 = vmatmul.mubr.msk.bf16.gmra.mrb[20].mxu1 %vm347_vm1, %v8785_v51  ;;  %v6454_v20 = vrot.slane %v6432_v52, 9  ;;  %v6131_v2 = vcombine.low %v2783_v9, %v2793_v18  ;;  %v2807_v19 = vsel %vm7682_vm4, %v2802_v26, %v2806_v14  ;;  %v2835_v4 = vor.u32 %v2834_v32, %v2830_v23 }
 0x136   : > { %6971 = vmatprep.mubr.msk.bf16.mxu1 %vm347_vm1, %v6130_v58  ;;  %v5170_v28 = vrot.slane %v5168_v46, 4  ;;  %v2817_v51 = vsel %vm7682_vm4, %v2812_v11, %v2816_v7  ;;  %v5165_v1 = vsel %vm7757_vm7, %v5163_v8, %v5164_v6  ;;  %v5171_v41 = vrot.slane %v6434_v55, 5  ;;  %v8876_v6 = vld [vmem:[%s8989_s2] ss:$0 sm:$0xff] }
 0x137   : > { %v6455_v5 = vrot.slane %v6435_v36, 9  ;;  %v2840_v58 = vrot.slane %v2838_v45, 5  ;;  %v6470_v10 = vcombine.low %v5162_v57, %v5165_v1  ;;  %v5175_v25 = vrot.slane %v6436_v42, 5 }
 0x138   : > { %v5178_v39 = vrot.slane %v6437_v12, 5  ;;  %v2826_v47 = vrot.slane %v2825_v53, 4  ;;  %v5169_v13 = vsel %vm7757_vm7, %v6454_v20, %v5168_v46  ;;  %v5172_v44 = vsel %vm7757_vm7, %v5170_v28, %v5171_v41 }
 0x139   : > { %7104 = vmatmul.mubr.msk.bf16.gmra.mrb[20].mxu0 %vm347_vm1, %v6469_v35  ;;  %v5182_v29 = vrot.slane %v6439_v49, 5  ;;  %v6132_v24 = vcombine.low %v2807_v19, %v2817_v51  ;;  %v2836_v30 = vrot.slane %v2835_v4, 4  ;;  %v5176_v62 = vsel %vm7757_vm7, %v6455_v5, %v5175_v25 }
 0x13a   : > { %7107 = vmatprep.mubr.msk.bf16.mxu0 %vm347_vm1, %v6470_v10  ;;  %v5177_v63 = vrot.slane %v5175_v25, 4  ;;  %v6471_v14 = vcombine.low %v5169_v13, %v5172_v44  ;;  %v6456_v31 = vrot.slane %v6438_v17, 9  ;;  %v5185_v16 = vrot.slane %v6440_v50, 5 }
 0x13b   : > { %v5184_v40 = vrot.slane %v5182_v29, 4  ;;  %v2831_v33 = vsel %vm7682_vm4, %v2826_v47, %v2830_v23  ;;  %v2841_v9 = vsel %vm7682_vm4, %v2836_v30, %v2840_v58 }
 0x13c   : > { %v5179_v3 = vsel %vm7757_vm7, %v5177_v63, %v5178_v39  ;;  %v6133_v18 = vcombine.low %v2831_v33, %v2841_v9  ;;  %v5183_v61 = vsel %vm7757_vm7, %v6456_v31, %v5182_v29 }
 0x13d   : > { %6972 = vmatmul.mubr.msk.bf16.gmra.mrb[24].mxu1 %vm347_vm1, %v6131_v2  ;;  %v6472_v59 = vcombine.low %v5176_v62, %v5179_v3  ;;  %v5186_v37 = vsel %vm7757_vm7, %v5184_v40, %v5185_v16 }
 0x13e   : > { %6975 = vmatprep.mubr.msk.bf16.mxu1 %vm347_vm1, %v6132_v24  ;;  %v6473_v21 = vcombine.low %v5183_v61, %v5186_v37 }
 0x141   : > { %7108 = vmatmul.mubr.msk.bf16.gmra.mrb[24].mxu0 %vm347_vm1, %v6471_v14 }
 0x142   : > { %7111 = vmatprep.mubr.msk.bf16.mxu0 %vm347_vm1, %v6472_v59 }
 0x145   : > { %6976 = vmatmul.mubr.msk.bf16.gmra.mrb[28].mxu1 %vm347_vm1, %v6133_v18 }
 0x149   : > { %7112 = vmatmul.mubr.msk.bf16.gmra.mrb[28].mxu0 %vm347_vm1, %v6473_v21 }
 0x1c0   : > { %v6915_v38 = vpop.f32.mrb[0].mxu1 }
 0x1c1   : > { %v2219_v60 = vpop.f32.mrb[1].mxu1 }
 0x1c2   : > { %v6916_v43 = vpop.f32.mrb[2].mxu1 }
 0x1c3   : > { %v2222_v34 = vpop.f32.mrb[3].mxu1 }
 0x1c8   : > { %v6919_v27 = vpop.f32.mrb[4].mxu1 }
 0x1c9   : > { %v2235_v15 = vpop.f32.mrb[5].mxu1 }
 0x1ca   : > { %v6920_v48 = vpop.f32.mrb[6].mxu1 }
 0x1cb   : > { %v2238_v22 = vpop.f32.mrb[7].mxu1 }
 0x1d0   : > { %v6923_v26 = vpop.f32.mrb[8].mxu1 }
 0x1d1   : > { %v2251_v23 = vpop.f32.mrb[9].mxu1 }
 0x1d2   : > { %v6924_v32 = vpop.f32.mrb[10].mxu1 }
 0x1d3   : > { %v2254_v54 = vpop.f32.mrb[11].mxu1 }
 0x1d8   : > { %v8865_v0 = vpop.f32.mrb[12].mxu1 }
 0x1d9   : > { %v8867_v52 = vpop.f32.mrb[13].mxu1 }
 0x1da   : > { %v8869_v11 = vpop.f32.mrb[14].mxu1 }
 0x1db   : > { %v8871_v7 = vpop.f32.mrb[15].mxu1 }
 0x1e4   : > { %v7085_v56 = vpop.f32.mrb[0].mxu0 }
 0x1e5   : > { %v7117_v35 = vadd.f32 %v7085_v56, %v6915_v38  ;;  %v5354_v45 = vpop.f32.mrb[1].mxu0 }
 0x1e6   : > { %v7118_v55 = vadd.f32 %v5354_v45, %v2219_v60  ;;  %v7086_v46 = vpop.f32.mrb[2].mxu0 }
 0x1e7   : > { %v5586_v36 = vadd.f32 %v7117_v35, %v8876_v6  ;;  %v7119_v53 = vadd.f32 %v7086_v46, %v6916_v43  ;;  %v5357_v57 = vpop.f32.mrb[3].mxu0 }
 0x1e8   : > { %v5584_v8 = vadd.f32 %v7118_v55, %v8876_v6  ;;  %v7120_v20 = vadd.f32 %v5357_v57, %v2222_v34 }
 0x1e9   : > { %v5587_v42 = vadd.f32 %v7119_v53, %v8876_v6  ;;  %v5618_v2 = vmax.f32 %v5586_v36, 0.0 }
 0x1ea   : > { %v5585_v12 = vadd.f32 %v7120_v20, %v8876_v6  ;;  %v5616_v4 = vmax.f32 %v5584_v8, 0.0 }
 0x1eb   : > { %v5619_v19 = vmax.f32 %v5587_v42, 0.0 }
 0x1ec   : > { %v5617_v28 = vmax.f32 %v5585_v12, 0.0  ;;  %v7089_v49 = vpop.f32.mrb[4].mxu0 }
 0x1ed   : > { %v6569_v51 = vpack.c.bf16 %v5619_v19, %v5618_v2  ;;  %v7121_v1 = vadd.f32 %v7089_v49, %v6919_v27  ;;  %v5370_v41 = vpop.f32.mrb[5].mxu0 }
 0x1ee   : > { %v6564_v5 = vpack.c.bf16 %v5617_v28, %v5616_v4  ;;  %v7122_v58 = vadd.f32 %v5370_v41, %v2235_v15  ;;  %v7090_v10 = vpop.f32.mrb[6].mxu0 }
 0x1ef   : > { %6641 = vst [vmem:[%s8885_s8 + $0x8] sm:$0xff] %v6569_v51   ;;  %v5590_v25 = vadd.f32 %v7121_v1, %v8876_v6  ;;  %v7123_v39 = vadd.f32 %v7090_v10, %v6920_v48  ;;  %v5373_v47 = vpop.f32.mrb[7].mxu0 }
 0x1f0   : > { %6565 = vst [vmem:[%s8885_s8] sm:$0xff] %v6564_v5   ;;  %v5588_v13 = vadd.f32 %v7122_v58, %v8876_v6  ;;  %v7124_v44 = vadd.f32 %v5373_v47, %v2238_v22 }
 0x1f1   : > { %v5591_v29 = vadd.f32 %v7123_v39, %v8876_v6  ;;  %v5622_v30 = vmax.f32 %v5590_v25, 0.0 }
 0x1f2   : > { %v5589_v24 = vadd.f32 %v7124_v44, %v8876_v6  ;;  %v5620_v63 = vmax.f32 %v5588_v13, 0.0 }
 0x1f3   : > { %v5623_v62 = vmax.f32 %v5591_v29, 0.0 }
 0x1f4   : > { %v5621_v17 = vmax.f32 %v5589_v24, 0.0  ;;  %v7093_v50 = vpop.f32.mrb[8].mxu0 }
 0x1f5   : > { %v6579_v14 = vpack.c.bf16 %v5623_v62, %v5622_v30  ;;  %v7125_v3 = vadd.f32 %v7093_v50, %v6923_v26  ;;  %v5386_v59 = vpop.f32.mrb[9].mxu0 }
 0x1f6   : > { %v6574_v31 = vpack.c.bf16 %v5621_v17, %v5620_v63  ;;  %v7126_v40 = vadd.f32 %v5386_v59, %v2251_v23  ;;  %v7094_v16 = vpop.f32.mrb[10].mxu0 }
 0x1f7   : > { %6643 = vst [vmem:[%s8885_s8 + $0x18] sm:$0xff] %v6579_v14   ;;  %v5594_v33 = vadd.f32 %v7125_v3, %v8876_v6  ;;  %v7127_v9 = vadd.f32 %v7094_v16, %v6924_v32  ;;  %v5389_v18 = vpop.f32.mrb[11].mxu0 }
 0x1f8   : > { %6642 = vst [vmem:[%s8885_s8 + $0x10] sm:$0xff] %v6574_v31   ;;  %v5592_v61 = vadd.f32 %v7126_v40, %v8876_v6  ;;  %v7128_v37 = vadd.f32 %v5389_v18, %v2254_v54 }
 0x1f9   : > { %v5595_v21 = vadd.f32 %v7127_v9, %v8876_v6  ;;  %v5626_v60 = vmax.f32 %v5594_v33, 0.0 }
 0x1fa   : > { %v5593_v38 = vadd.f32 %v7128_v37, %v8876_v6  ;;  %v5624_v34 = vmax.f32 %v5592_v61, 0.0 }
 0x1fb   : > { %v5627_v43 = vmax.f32 %v5595_v21, 0.0 }
 0x1fc   : > { %v5625_v27 = vmax.f32 %v5593_v38, 0.0  ;;  %v7097_v15 = vpop.f32.mrb[12].mxu0 }
 0x1fd   : > { %v6589_v48 = vpack.c.bf16 %v5627_v43, %v5626_v60  ;;  %v7129_v22 = vadd.f32 %v7097_v15, %v8865_v0  ;;  %v5402_v26 = vpop.f32.mrb[13].mxu0 }
 0x1fe   : > { %v6584_v23 = vpack.c.bf16 %v5625_v27, %v5624_v34  ;;  %v7130_v32 = vadd.f32 %v5402_v26, %v8867_v52  ;;  %v7098_v56 = vpop.f32.mrb[14].mxu0 }
 0x1ff   : > { %6645 = vst [vmem:[%s8885_s8 + $0x28] sm:$0xff] %v6589_v48   ;;  %v5598_v54 = vadd.f32 %v7129_v22, %v8876_v6  ;;  %v7131_v35 = vadd.f32 %v7098_v56, %v8869_v11  ;;  %v5405_v45 = vpop.f32.mrb[15].mxu0 }
 0x200   : > { %6644 = vst [vmem:[%s8885_s8 + $0x20] sm:$0xff] %v6584_v23   ;;  %v5596_v55 = vadd.f32 %v7130_v32, %v8876_v6  ;;  %v7132_v46 = vadd.f32 %v5405_v45, %v8871_v7  ;;  %v6965_v36 = vpop.f32.mrb[16].mxu1 }
 0x201   : > { %v5599_v53 = vadd.f32 %v7131_v35, %v8876_v6  ;;  %v3073_v0 = vpop.f32.mrb[17].mxu1  ;;  %v5630_v52 = vmax.f32 %v5598_v54, 0.0 }
 0x202   : > { %v5597_v57 = vadd.f32 %v7132_v46, %v8876_v6  ;;  %v6966_v8 = vpop.f32.mrb[18].mxu1  ;;  %v5628_v42 = vmax.f32 %v5596_v55, 0.0 }
 0x203   : > { %v5631_v20 = vmax.f32 %v5599_v53, 0.0  ;;  %v3076_v12 = vpop.f32.mrb[19].mxu1 }
 0x204   : > { %v5629_v11 = vmax.f32 %v5597_v57, 0.0  ;;  %v7101_v2 = vpop.f32.mrb[16].mxu0 }
 0x205   : > { %v6599_v19 = vpack.c.bf16 %v5631_v20, %v5630_v52  ;;  %v7133_v4 = vadd.f32 %v7101_v2, %v6965_v36  ;;  %v5418_v28 = vpop.f32.mrb[17].mxu0 }
 0x206   : > { %v6594_v49 = vpack.c.bf16 %v5629_v11, %v5628_v42  ;;  %v7134_v7 = vadd.f32 %v5418_v28, %v3073_v0  ;;  %v7102_v51 = vpop.f32.mrb[18].mxu0 }
 0x207   : > { %6647 = vst [vmem:[%s8885_s8 + $0x38] sm:$0xff] %v6599_v19   ;;  %v5602_v1 = vadd.f32 %v7133_v4, %v8876_v6  ;;  %v7135_v41 = vadd.f32 %v7102_v51, %v6966_v8  ;;  %v5421_v5 = vpop.f32.mrb[19].mxu0 }
 0x208   : > { %6646 = vst [vmem:[%s8885_s8 + $0x30] sm:$0xff] %v6594_v49   ;;  %v5600_v58 = vadd.f32 %v7134_v7, %v8876_v6  ;;  %v7136_v10 = vadd.f32 %v5421_v5, %v3076_v12  ;;  %v6969_v25 = vpop.f32.mrb[20].mxu1 }
 0x209   : > { %v5603_v39 = vadd.f32 %v7135_v41, %v8876_v6  ;;  %v3089_v47 = vpop.f32.mrb[21].mxu1  ;;  %v5634_v44 = vmax.f32 %v5602_v1, 0.0 }
 0x20a   : > { %v5601_v13 = vadd.f32 %v7136_v10, %v8876_v6  ;;  %v6970_v29 = vpop.f32.mrb[22].mxu1  ;;  %v5632_v30 = vmax.f32 %v5600_v58, 0.0 }
 0x20b   : > { %v5635_v24 = vmax.f32 %v5603_v39, 0.0  ;;  %v3092_v62 = vpop.f32.mrb[23].mxu1 }
 0x20c   : > { %v5633_v63 = vmax.f32 %v5601_v13, 0.0  ;;  %v7105_v17 = vpop.f32.mrb[20].mxu0 }
 0x20d   : > { %v6609_v50 = vpack.c.bf16 %v5635_v24, %v5634_v44  ;;  %v7137_v14 = vadd.f32 %v7105_v17, %v6969_v25  ;;  %v5434_v3 = vpop.f32.mrb[21].mxu0 }
 0x20e   : > { %v6604_v59 = vpack.c.bf16 %v5633_v63, %v5632_v30  ;;  %v7138_v31 = vadd.f32 %v5434_v3, %v3089_v47  ;;  %v7106_v40 = vpop.f32.mrb[22].mxu0 }
 0x20f   : > { %6649 = vst [vmem:[%s8885_s8 + $0x48] sm:$0xff] %v6609_v50   ;;  %v5606_v16 = vadd.f32 %v7137_v14, %v8876_v6  ;;  %v7139_v33 = vadd.f32 %v7106_v40, %v6970_v29  ;;  %v5437_v9 = vpop.f32.mrb[23].mxu0 }
 0x210   : > { %6648 = vst [vmem:[%s8885_s8 + $0x40] sm:$0xff] %v6604_v59   ;;  %v5604_v18 = vadd.f32 %v7138_v31, %v8876_v6  ;;  %v7140_v61 = vadd.f32 %v5437_v9, %v3092_v62  ;;  %v6973_v37 = vpop.f32.mrb[24].mxu1 }
 0x211   : > { %v5607_v21 = vadd.f32 %v7139_v33, %v8876_v6  ;;  %v3105_v38 = vpop.f32.mrb[25].mxu1  ;;  %v5638_v43 = vmax.f32 %v5606_v16, 0.0 }
 0x212   : > { %v5605_v60 = vadd.f32 %v7140_v61, %v8876_v6  ;;  %v6974_v34 = vpop.f32.mrb[26].mxu1  ;;  %v5636_v15 = vmax.f32 %v5604_v18, 0.0 }
 0x213   : > { %v5639_v27 = vmax.f32 %v5607_v21, 0.0  ;;  %v3108_v48 = vpop.f32.mrb[27].mxu1 }
 0x214   : > { %v5637_v22 = vmax.f32 %v5605_v60, 0.0  ;;  %v7109_v26 = vpop.f32.mrb[24].mxu0 }
 0x215   : > { %v6619_v23 = vpack.c.bf16 %v5639_v27, %v5638_v43  ;;  %v7141_v32 = vadd.f32 %v7109_v26, %v6973_v37  ;;  %v5450_v56 = vpop.f32.mrb[25].mxu0 }
 0x216   : > { %v6614_v54 = vpack.c.bf16 %v5637_v22, %v5636_v15  ;;  %v7142_v35 = vadd.f32 %v5450_v56, %v3105_v38  ;;  %v7110_v45 = vpop.f32.mrb[26].mxu0 }
 0x217   : > { %6651 = vst [vmem:[%s8885_s8 + $0x58] sm:$0xff] %v6619_v23   ;;  %v5610_v55 = vadd.f32 %v7141_v32, %v8876_v6  ;;  %v7143_v46 = vadd.f32 %v7110_v45, %v6974_v34  ;;  %v5453_v36 = vpop.f32.mrb[27].mxu0 }
 0x218   : > { %6650 = vst [vmem:[%s8885_s8 + $0x50] sm:$0xff] %v6614_v54   ;;  %v5608_v53 = vadd.f32 %v7142_v35, %v8876_v6  ;;  %v7144_v0 = vadd.f32 %v5453_v36, %v3108_v48  ;;  %v6977_v57 = vpop.f32.mrb[28].mxu1 }
 0x219   : > { %v5611_v52 = vadd.f32 %v7143_v46, %v8876_v6  ;;  %v3121_v8 = vpop.f32.mrb[29].mxu1  ;;  %v5642_v42 = vmax.f32 %v5610_v55, 0.0 }
 0x21a   : > { %v5609_v20 = vadd.f32 %v7144_v0, %v8876_v6  ;;  %v6978_v12 = vpop.f32.mrb[30].mxu1  ;;  %v5640_v2 = vmax.f32 %v5608_v53, 0.0 }
 0x21b   : > { %v5643_v11 = vmax.f32 %v5611_v52, 0.0  ;;  %v3124_v19 = vpop.f32.mrb[31].mxu1 }
 0x21c   : > { %v5641_v4 = vmax.f32 %v5609_v20, 0.0  ;;  %v7113_v28 = vpop.f32.mrb[28].mxu0 }
 0x21d   : > { %v6629_v49 = vpack.c.bf16 %v5643_v11, %v5642_v42  ;;  %v7145_v7 = vadd.f32 %v7113_v28, %v6977_v57  ;;  %v5466_v51 = vpop.f32.mrb[29].mxu0 }
 0x21e   : > { %v6624_v1 = vpack.c.bf16 %v5641_v4, %v5640_v2  ;;  %v7146_v41 = vadd.f32 %v5466_v51, %v3121_v8  ;;  %v7114_v5 = vpop.f32.mrb[30].mxu0 }
 0x21f   : > { %6653 = vst [vmem:[%s8885_s8 + $0x68] sm:$0xff] %v6629_v49   ;;  %v5614_v58 = vadd.f32 %v7145_v7, %v8876_v6  ;;  %v7147_v10 = vadd.f32 %v7114_v5, %v6978_v12  ;;  %v5469_v25 = vpop.f32.mrb[31].mxu0 }
 0x220   : > { %6652 = vst [vmem:[%s8885_s8 + $0x60] sm:$0xff] %v6624_v1   ;;  %v5612_v39 = vadd.f32 %v7146_v41, %v8876_v6  ;;  %v7148_v47 = vadd.f32 %v5469_v25, %v3124_v19 }
 0x221   : > { %v5615_v13 = vadd.f32 %v7147_v10, %v8876_v6  ;;  %v5646_v29 = vmax.f32 %v5614_v58, 0.0 }
 0x222   : > { %v5613_v44 = vadd.f32 %v7148_v47, %v8876_v6  ;;  %v5644_v30 = vmax.f32 %v5612_v39, 0.0 }
 0x223   : > { %v5647_v24 = vmax.f32 %v5615_v13, 0.0 }
 0x224   : > { %v5645_v62 = vmax.f32 %v5613_v44, 0.0 }
 0x225   : > { %v6639_v63 = vpack.c.bf16 %v5647_v24, %v5646_v29 }
 0x226   : > { %v6634_v17 = vpack.c.bf16 %v5645_v62, %v5644_v30 }
 0x227   : > { %6655 = vst [vmem:[%s8885_s8 + $0x78] sm:$0xff] %v6639_v63  }
 0x228   : > { %6654 = vst [vmem:[%s8885_s8 + $0x70] sm:$0xff] %v6634_v17  }
 0x229   : > { %7487 = shalt.err (!%p7484_p3)
}
 0x22a   : > { %s7488_s27 = scalar_lea.hbm %s8938_s19, 2048  ;;  %s7492_s30 = scalar_lea.hbm %s8990_s3, 4096 }
 0x22b   : > { %p7489_p4 = scmp.ne.s32.totalorder %s8938_s19, %s7488_s27  ;;  %p7493_p9 = scmp.lt.u32.totalorder %s8938_s19, %s8990_s3 }
 0x22c   : > { %p7494_p10 = scmp.lt.u32.totalorder %s7492_s30, %s7488_s27  ;;  %p7496_p12 = scmp.lt.u32.totalorder %s7488_s27, %s8938_s19 }
 0x22d   : > { %p7490_p7 = pnand %p7489_p4, %p7599_p5 }
 0x22e   : > { %p7495_p11 = por %p7494_p10, %p7493_p9 }
 0x22f   : > { %p7491_p8 = pneg %p7490_p7 }
 0x230   : > { %p7497_p13 = por %p7496_p12, %p7495_p11 }
 0x232   : > { %p7498_p0 = pnand %p7497_p13, %p7491_p8 }
 0x234   : > { %7501 = shalt.err (!%p7498_p0)
}
 0x235   : > { %s7539_s6 = smov 64   ;;  %s7540_s7 = smov 4  }
 0x236   : > { %7384 = dma.vmem_to_hbm [thread:$0]  (%p7599_p5), %s8940_s10, 2048, %s8938_s19, %s8946_s16, %s7539_s6, %s7539_s6, %s7540_s7  }
 0x237 PF: > { %p7390_p1 = scmp.ge.s32.totalorder %s7536_s15, 2  ;;  %s5837_s8 = sand.u32 1, %s7524_s12  }
 0x238   : > { %s5838_s9 = scalar_lea.sflag [#allocation4], %s5837_s8 }
 0x239   : > { %p7387_p2 = pnand %p7390_p1, %p7603_p6 }
 0x23b   : > { %7519 = dma.done.wait (!%p7387_p2), %s5838_s9, 2048  }
 0x23c   : > { %7521 = vsyncadd (!%p7387_p2), %s5838_s9, 4294965248  ;;  %p13_p3 = scmp.ge.s32.totalorder %s7586_s18, 4   ;;  %s8997_s12 = smov %s7528_s13 }
 0x23d   : > { %s8998_s13 = smov %s7532_s14  ;;  %s8999_s14 = smov %s7597_s21 }
 0x23e   : > { %s9000_s15 = smov %s7586_s18  ;;  %15 = sbr.rel (!%p13_p3) target bundleno = 3 (0x3), region = 77 }
 0x245   :  { %5843 = vsyncpa [#allocation4], 1 }
 0x246   :  { %5845 = vsyncpa [#allocation4 + $0x1], 1 }

</bundles_post_ra>
